<compile_context>
chip_gen: v5e
topology: v5e:2x2
jax: 0.10.0
libtpu: 0.0.40
codegen_flags: <defaults>
</compile_context>

<pallas_src>
import jax
import jax.numpy as jnp
from jax import lax
from jax.experimental import pallas as pl
from jax.experimental.pallas import tpu as pltpu


def _round_up(x, m):
    return (x + m - 1) // m * m


# ----------------------------- Pallas kernel ------------------------------ #
def char_rnn_kernel(ids_ref, gi_table_ref, b_hn_ref, b_fc_ref,
                    w_hh_r_hbm, w_hh_z_hbm, w_hh_n_hbm, w_fc_hbm,
                    out_ref,
                    gi_ref, w_hh_buf, w_fc_buf, sem):
    """GRU recurrence over time + final Linear, all on-chip.

    ids_ref     : [T*B, 1]      time-major token ids (int32, VMEM)
    gi_table_ref: [V_pad, 3H]   emb @ W_ih.T + b_comb, row-padded (f32, VMEM)
    b_hn_ref    : [1, H]        hidden bias of the n gate (f32, VMEM)
    b_fc_ref    : [1, Opad]     fc bias, lane-padded (f32, VMEM)
    w_hh_*_hbm  : [H, H]        per-gate hidden->hidden weights (bf16, HBM)
    w_fc_hbm    : [H, Opad]     fc weight, lane-padded (bf16, HBM)
    out_ref     : [B, Opad]     logits of the last timestep (f32)
    gi_ref      : [T*B, 3H]     VMEM scratch, hoisted input projection (f32)
    w_hh_buf    : [3, H, H]     VMEM scratch for DMA'd W_hh slabs (bf16)
    w_fc_buf    : [H, Opad]     VMEM scratch for DMA'd W_fc (bf16)
    sem         : DMA sems (4,)
    """
    TB, G = gi_ref.shape
    H = G // 3
    B = out_ref.shape[0]
    T = TB // B
    V_pad = gi_table_ref.shape[0]

    # ---- start weight DMAs; hidden behind the hoisted projection ----------
    cp_r = pltpu.make_async_copy(w_hh_r_hbm, w_hh_buf.at[0], sem.at[0])
    cp_z = pltpu.make_async_copy(w_hh_z_hbm, w_hh_buf.at[1], sem.at[1])
    cp_n = pltpu.make_async_copy(w_hh_n_hbm, w_hh_buf.at[2], sem.at[2])
    cp_fc = pltpu.make_async_copy(w_fc_hbm, w_fc_buf, sem.at[3])
    cp_r.start(); cp_z.start(); cp_n.start(); cp_fc.start()

    # ---- fused embedding gather + input projection (one-hot MXU matmul) ---
    ids = ids_ref[...]                                           # [T*B, 1] i32
    vocab = lax.broadcasted_iota(jnp.int32, (TB, V_pad), 1)      # [T*B, V_pad]
    one_hot = (vocab == ids).astype(jnp.float32)                 # exact 0/1
    # Each row of one_hot selects exactly one row of gi_table (bias included).
    gi_ref[...] = jnp.dot(one_hot, gi_table_ref[...],
                          preferred_element_type=jnp.float32)    # [T*B, 3H]

    # Hoisted bias broadcast (JAX does not CSE broadcast_in_dim inside loops).
    b_hn = jnp.broadcast_to(b_hn_ref[...], (B, H))               # f32 [B, H]

    # W_hh needed from the first step onwards.
    cp_r.wait(); cp_z.wait(); cp_n.wait()
    w_hh_r = w_hh_buf[0]                                         # bf16 [H, H]
    w_hh_z = w_hh_buf[1]
    w_hh_n = w_hh_buf[2]

    def step(t, h):
        off = pl.multiple_of(t * B, B)
        gi = gi_ref[pl.ds(off, B), :]                            # [B, 3H] f32
        h_b = h.astype(w_hh_r.dtype)                             # bf16 for MXU
        # Three per-gate matmuls instead of one h @ [H, 3H] so weight pushes
        # can be spread across the MXUs.
        # TODO(synk): keep W_hh resident across steps with
        # pltpu.matmul_push_rhs / matmul_acc_lhs / matmul_pop (MRB on v7x);
        # the serial loop is weight-push bound, not FLOP bound.
        gh_r = jnp.dot(h_b, w_hh_r, preferred_element_type=jnp.float32)
        gh_z = jnp.dot(h_b, w_hh_z, preferred_element_type=jnp.float32)
        gh_n = jnp.dot(h_b, w_hh_n, preferred_element_type=jnp.float32)
        # Gate math stays f32 (v5e has no bf16 VPU/EUP path).
        r = jax.nn.sigmoid(gi[:, 0:H] + gh_r)
        z = jax.nn.sigmoid(gi[:, H:2 * H] + gh_z)
        n = jnp.tanh(gi[:, 2 * H:3 * H] + r * (gh_n + b_hn))
        return n + z * (h - n)                                   # == (1-z)n + zh

    h0 = jnp.zeros((B, H), dtype=jnp.float32)
    h_last = lax.fori_loop(0, T, step, h0, unroll=True)          # T static

    # fc weight only needed now; its DMA overlapped with the recurrence.
    cp_fc.wait()
    out_ref[...] = (jnp.dot(h_last.astype(w_fc_buf.dtype), w_fc_buf[...],
                            preferred_element_type=jnp.float32)
                    + b_fc_ref[...])


# ------------------- one-time parameter preparation ------------------------ #
def prepare_params(params):
    """One-time layout/packing of the torch-layout parameters.

    Everything expensive (transposes, casts, bias folding, lane padding and
    the fused embedding/input-projection table) happens here, once, so each
    forward call only ships pre-formatted arrays to the kernel.
    """
    emb = params["embedding"].astype(jnp.float32)      # [V, H]
    w_ih = params["w_ih"]                              # [3H, H] torch layout
    w_hh = params["w_hh"]                              # [3H, H]
    b_ih = params["b_ih"]                              # [3H]
    b_hh = params["b_hh"]                              # [3H]
    w_fc = params["w_fc"]                              # [O, H]
    b_fc = params["b_fc"]                              # [O]

    V, H = emb.shape
    O = w_fc.shape[0]
    assert H % 128 == 0, "hidden_size must be a multiple of 128 for lane-dense gate slices"

    V_pad = _round_up(max(V, 128), 128)                # lane-dense one-hot width
    O_pad = _round_up(max(O, 128), 128)                # lane-dense output store

    # Fold b_hh into the r,z gate slabs; the n-gate hidden bias must stay
    # inside r * (.) per PyTorch GRU semantics.
    b_comb = jnp.concatenate([b_ih[:2 * H] + b_hh[:2 * H], b_ih[2 * H:]])
    b_comb = b_comb.astype(jnp.float32)

    # Fused embedding gather + input projection table:
    #   gi_table[v] = emb[v] @ W_ih.T + b_comb   (exact f32; selected in-kernel
    #   by a one-hot matmul, so the bias is added exactly once per row).
    gi_table = emb @ w_ih.T.astype(jnp.float32) + b_comb[None, :]     # [V, 3H]
    gi_table_p = jnp.zeros((V_pad, 3 * H), jnp.float32).at[:V].set(gi_table)

    # Per-gate hidden->hidden weights, transposed to plain x @ W layout (bf16).
    w_hh_t = w_hh.T.astype(jnp.bfloat16)               # [H, 3H]
    w_hh_r = w_hh_t[:, 0:H]
    w_hh_z = w_hh_t[:, H:2 * H]
    w_hh_n = w_hh_t[:, 2 * H:3 * H]
    b_hn = b_hh[2 * H:].reshape(1, H).astype(jnp.float32)

    # Lane-padded fc weight/bias (zero columns -> zero logits, sliced off).
    w_fc_p = jnp.zeros((H, O_pad), jnp.bfloat16).at[:, :O].set(
        w_fc.T.astype(jnp.bfloat16))
    b_fc_p = jnp.zeros((1, O_pad), jnp.float32).at[:, :O].set(b_fc)

    return {
        "gi_table": gi_table_p,
        "w_hh_r": w_hh_r, "w_hh_z": w_hh_z, "w_hh_n": w_hh_n,
        "b_hn": b_hn, "w_fc": w_fc_p, "b_fc": b_fc_p,
        "dims": (H, O, V_pad, O_pad),                   # static Python ints
    }


# ------------------------------ wrapper ----------------------------------- #
def char_rnn_forward(x_idx, prepared):
    """x_idx: int32 [B, T] token ids.  Returns logits [B, output_size]."""
    H, O, V_pad, O_pad = prepared["dims"]
    B, T = x_idx.shape
    B_pad = _round_up(max(B, 8), 8)                    # sublane-dense batch

    # Only per-call plumbing: pad the tiny id matrix (extra rows use token 0,
    # results discarded) and flatten in time-major order.
    x_pad = jnp.zeros((B_pad, T), jnp.int32).at[:B].set(x_idx.astype(jnp.int32))
    ids_tm = x_pad.T.reshape(T * B_pad, 1)             # [T*B_pad, 1] int32

    vmem = pl.BlockSpec(memory_space=pltpu.MemorySpace.VMEM)
    hbm = pl.BlockSpec(memory_space=pl.ANY)

    out = pl.pallas_call(
        char_rnn_kernel,
        out_shape=jax.ShapeDtypeStruct((B_pad, O_pad), jnp.float32),
        in_specs=[vmem, vmem, vmem, vmem, hbm, hbm, hbm, hbm],
        out_specs=vmem,
        scratch_shapes=[
            pltpu.VMEM((T * B_pad, 3 * H), jnp.float32),   # hoisted projection
            pltpu.VMEM((3, H, H), jnp.bfloat16),           # W_hh slabs (DMA dst)
            pltpu.VMEM((H, O_pad), jnp.bfloat16),          # W_fc (DMA dst)
            pltpu.SemaphoreType.DMA((4,)),
        ],
        compiler_params=pltpu.CompilerParams(
            vmem_limit_bytes=32 * 1024 * 1024),
    )(ids_tm, prepared["gi_table"], prepared["b_hn"], prepared["b_fc"],
      prepared["w_hh_r"], prepared["w_hh_z"], prepared["w_hh_n"],
      prepared["w_fc"])

    return out[:B, :O]


# --------------------------- pure-JAX reference ---------------------------- #
def char_rnn_reference(x_idx, params):
    emb = jnp.take(params["embedding"], x_idx, axis=0).astype(jnp.float32)
    H = params["embedding"].shape[1]
    w_ih_t = params["w_ih"].T
    w_hh_t = params["w_hh"].T
    b_ih = params["b_ih"]
    b_hh = params["b_hh"]

    def step(h, x_t):
        gi = x_t @ w_ih_t + b_ih
        gh = h @ w_hh_t + b_hh
        r = jax.nn.sigmoid(gi[:, 0:H] + gh[:, 0:H])
        z = jax.nn.sigmoid(gi[:, H:2 * H] + gh[:, H:2 * H])
        n = jnp.tanh(gi[:, 2 * H:3 * H] + r * gh[:, 2 * H:3 * H])
        h_new = (1.0 - z) * n + z * h
        return h_new, None

    h0 = jnp.zeros((x_idx.shape[0], H), jnp.float32)
    h_last, _ = lax.scan(step, h0, jnp.transpose(emb, (1, 0, 2)))
    return h_last @ params["w_fc"].T + params["b_fc"]


# ----------------------------- parameter init ------------------------------ #
def init_params(key, input_size, hidden_size, output_size):
    ks = jax.random.split(key, 7)
    H = hidden_size
    k_gru = 1.0 / jnp.sqrt(H)
    k_fc = 1.0 / jnp.sqrt(H)
    return {
        "embedding": jax.random.normal(ks[0], (input_size, H), jnp.float32),
        "w_ih": jax.random.uniform(ks[1], (3 * H, H), jnp.float32, -k_gru, k_gru),
        "w_hh": jax.random.uniform(ks[2], (3 * H, H), jnp.float32, -k_gru, k_gru),
        "b_ih": jax.random.uniform(ks[3], (3 * H,), jnp.float32, -k_gru, k_gru),
        "b_hh": jax.random.uniform(ks[4], (3 * H,), jnp.float32, -k_gru, k_gru),
        "w_fc": jax.random.uniform(ks[5], (output_size, H), jnp.float32, -k_fc, k_fc),
        "b_fc": jax.random.uniform(ks[6], (output_size,), jnp.float32, -k_fc, k_fc),
    }


if __name__ == "__main__":
    input_size = 65      # char vocab size
    hidden_size = 256    # matches the module-level constant in the PyTorch spec
    output_size = 65
    batch, seq = 2, 8

    key = jax.random.PRNGKey(0)
    k_params, k_x = jax.random.split(key)
    params = init_params(k_params, input_size, hidden_size, output_size)
    x = jax.random.randint(k_x, (batch, seq), 0, input_size, dtype=jnp.int32)

    prepared = prepare_params(params)    # one-time layout/packing

    out = jax.block_until_ready(char_rnn_forward(x, prepared))
    ref = jax.block_until_ready(char_rnn_reference(x, params))

    assert out.shape == (batch, output_size)
    # bf16 matmul operands (h@W_hh, fc) with f32 accumulation -> slightly
    # looser tolerance than the pure-f32 reference; gi itself is exact f32.
    assert jnp.allclose(out, ref, atol=2e-2, rtol=2e-2), (out, ref)

    print("KERNEL_OK")
</pallas_src>

<mosaic_0001>
module attributes {stable_mosaic.version = 11 : i64} {
  func.func @char_rnn_kernel(%arg0: memref<64x1xi32, #tpu.memory_space<vmem>>, %arg1: memref<128x768xf32, #tpu.memory_space<vmem>>, %arg2: memref<1x256xf32, #tpu.memory_space<vmem>>, %arg3: memref<1x128xf32, #tpu.memory_space<vmem>>, %arg4: memref<256x256xbf16, #tpu.memory_space<any>>, %arg5: memref<256x256xbf16, #tpu.memory_space<any>>, %arg6: memref<256x256xbf16, #tpu.memory_space<any>>, %arg7: memref<256x128xbf16, #tpu.memory_space<any>>, %arg8: memref<8x128xf32, #tpu.memory_space<vmem>>, %arg9: memref<64x768xf32, #tpu.memory_space<vmem>>, %arg10: memref<3x256x256xbf16, #tpu.memory_space<vmem>>, %arg11: memref<256x128xbf16, #tpu.memory_space<vmem>>, %arg12: memref<4x!tpu.dma_semaphore, #tpu.memory_space<semaphore_mem>>) attributes {dimension_semantics = [], scalar_prefetch = 0 : i64, scratch_operands = 4 : i64, tpu.core_type = #tpu.core_type<tc>} {
    %c0_i32 = arith.constant 0 : i32
    %c0_i32_0 = arith.constant 0 : i32
    %c0_i32_1 = arith.constant 0 : i32
    %c0_i32_2 = arith.constant 0 : i32
    %0 = tpu.memref_slice %arg10[%c0_i32, %c0_i32_1, %c0_i32_2] : memref<3x256x256xbf16, #tpu.memory_space<vmem>> -> memref<1x256x256xbf16, #tpu.memory_space<vmem>>
    %1 = tpu.memref_squeeze %0 : memref<1x256x256xbf16, #tpu.memory_space<vmem>> -> memref<256x256xbf16, #tpu.memory_space<vmem>>
    %2 = tpu.memref_slice %arg12[%c0_i32_0] : memref<4x!tpu.dma_semaphore, #tpu.memory_space<semaphore_mem>> -> memref<1x!tpu.dma_semaphore, #tpu.memory_space<semaphore_mem>>
    %3 = tpu.memref_squeeze %2 : memref<1x!tpu.dma_semaphore, #tpu.memory_space<semaphore_mem>> -> memref<!tpu.dma_semaphore, #tpu.memory_space<semaphore_mem>>
    tpu.enqueue_dma source(%arg4 : memref<256x256xbf16, #tpu.memory_space<any>>) target(%1 : memref<256x256xbf16, #tpu.memory_space<vmem>>) target_semaphore(%3 : memref<!tpu.dma_semaphore, #tpu.memory_space<semaphore_mem>>)
    %c1_i32 = arith.constant 1 : i32
    %c1_i32_3 = arith.constant 1 : i32
    %c0_i32_4 = arith.constant 0 : i32
    %c0_i32_5 = arith.constant 0 : i32
    %4 = tpu.memref_slice %arg10[%c1_i32, %c0_i32_4, %c0_i32_5] : memref<3x256x256xbf16, #tpu.memory_space<vmem>> -> memref<1x256x256xbf16, #tpu.memory_space<vmem>>
    %5 = tpu.memref_squeeze %4 : memref<1x256x256xbf16, #tpu.memory_space<vmem>> -> memref<256x256xbf16, #tpu.memory_space<vmem>>
    %6 = tpu.memref_slice %arg12[%c1_i32_3] : memref<4x!tpu.dma_semaphore, #tpu.memory_space<semaphore_mem>> -> memref<1x!tpu.dma_semaphore, #tpu.memory_space<semaphore_mem>>
    %7 = tpu.memref_squeeze %6 : memref<1x!tpu.dma_semaphore, #tpu.memory_space<semaphore_mem>> -> memref<!tpu.dma_semaphore, #tpu.memory_space<semaphore_mem>>
    tpu.enqueue_dma source(%arg5 : memref<256x256xbf16, #tpu.memory_space<any>>) target(%5 : memref<256x256xbf16, #tpu.memory_space<vmem>>) target_semaphore(%7 : memref<!tpu.dma_semaphore, #tpu.memory_space<semaphore_mem>>)
    %c2_i32 = arith.constant 2 : i32
    %c2_i32_6 = arith.constant 2 : i32
    %c0_i32_7 = arith.constant 0 : i32
    %c0_i32_8 = arith.constant 0 : i32
    %8 = tpu.memref_slice %arg10[%c2_i32, %c0_i32_7, %c0_i32_8] : memref<3x256x256xbf16, #tpu.memory_space<vmem>> -> memref<1x256x256xbf16, #tpu.memory_space<vmem>>
    %9 = tpu.memref_squeeze %8 : memref<1x256x256xbf16, #tpu.memory_space<vmem>> -> memref<256x256xbf16, #tpu.memory_space<vmem>>
    %10 = tpu.memref_slice %arg12[%c2_i32_6] : memref<4x!tpu.dma_semaphore, #tpu.memory_space<semaphore_mem>> -> memref<1x!tpu.dma_semaphore, #tpu.memory_space<semaphore_mem>>
    %11 = tpu.memref_squeeze %10 : memref<1x!tpu.dma_semaphore, #tpu.memory_space<semaphore_mem>> -> memref<!tpu.dma_semaphore, #tpu.memory_space<semaphore_mem>>
    tpu.enqueue_dma source(%arg6 : memref<256x256xbf16, #tpu.memory_space<any>>) target(%9 : memref<256x256xbf16, #tpu.memory_space<vmem>>) target_semaphore(%11 : memref<!tpu.dma_semaphore, #tpu.memory_space<semaphore_mem>>)
    %c3_i32 = arith.constant 3 : i32
    %12 = tpu.memref_slice %arg12[%c3_i32] : memref<4x!tpu.dma_semaphore, #tpu.memory_space<semaphore_mem>> -> memref<1x!tpu.dma_semaphore, #tpu.memory_space<semaphore_mem>>
    %13 = tpu.memref_squeeze %12 : memref<1x!tpu.dma_semaphore, #tpu.memory_space<semaphore_mem>> -> memref<!tpu.dma_semaphore, #tpu.memory_space<semaphore_mem>>
    tpu.enqueue_dma source(%arg7 : memref<256x128xbf16, #tpu.memory_space<any>>) target(%arg11 : memref<256x128xbf16, #tpu.memory_space<vmem>>) target_semaphore(%13 : memref<!tpu.dma_semaphore, #tpu.memory_space<semaphore_mem>>)
    %c0 = arith.constant 0 : index
    %c0_9 = arith.constant 0 : index
    %14 = vector.load %arg0[%c0, %c0_9] : memref<64x1xi32, #tpu.memory_space<vmem>>, vector<64x1xi32>
    %15 = tpu.iota {dimensions = array<i32: 1>} : vector<64x128xi32>
    %16 = vector.broadcast %14 : vector<64x1xi32> to vector<64x128xi32>
    %17 = arith.cmpi eq, %15, %16 : vector<64x128xi32>
    %18 = arith.extui %17 : vector<64x128xi1> to vector<64x128xi32>
    %19 = arith.sitofp %18 : vector<64x128xi32> to vector<64x128xf32>
    %c0_10 = arith.constant 0 : index
    %c0_11 = arith.constant 0 : index
    %20 = vector.load %arg1[%c0_10, %c0_11] : memref<128x768xf32, #tpu.memory_space<vmem>>, vector<128x768xf32>
    %cst = arith.constant dense<0.000000e+00> : vector<64x768xf32>
    %21 = tpu.matmul %19, %20, %cst {dimension_numbers = #tpu.dot_dimension_numbers<[1], [0], [0], [1], [0, 0, 1, 1], [], []>} : vector<64x128xf32>, vector<128x768xf32>, vector<64x768xf32> -> vector<64x768xf32>
    %c0_12 = arith.constant 0 : index
    %c0_13 = arith.constant 0 : index
    %22 = vector.load %arg9[%c0_12, %c0_13] : memref<64x768xf32, #tpu.memory_space<vmem>>, vector<64x768xf32>
    tpu.vector_store %arg9[%c0_12, %c0_13], %21 {strides = array<i32>} : memref<64x768xf32, #tpu.memory_space<vmem>>, vector<64x768xf32>,
    %c0_14 = arith.constant 0 : index
    %c0_15 = arith.constant 0 : index
    %23 = vector.load %arg2[%c0_14, %c0_15] : memref<1x256xf32, #tpu.memory_space<vmem>>, vector<1x256xf32>
    %24 = vector.shape_cast %23 : vector<1x256xf32> to vector<1x256xf32>
    %25 = vector.broadcast %24 : vector<1x256xf32> to vector<8x256xf32>
    %c0_i32_16 = arith.constant 0 : i32
    %c0_i32_17 = arith.constant 0 : i32
    %c0_i32_18 = arith.constant 0 : i32
    %c0_i32_19 = arith.constant 0 : i32
    %26 = tpu.memref_slice %arg10[%c0_i32_16, %c0_i32_18, %c0_i32_19] : memref<3x256x256xbf16, #tpu.memory_space<vmem>> -> memref<1x256x256xbf16, #tpu.memory_space<vmem>>
    %27 = tpu.memref_squeeze %26 : memref<1x256x256xbf16, #tpu.memory_space<vmem>> -> memref<256x256xbf16, #tpu.memory_space<vmem>>
    %28 = tpu.memref_slice %arg12[%c0_i32_17] : memref<4x!tpu.dma_semaphore, #tpu.memory_space<semaphore_mem>> -> memref<1x!tpu.dma_semaphore, #tpu.memory_space<semaphore_mem>>
    %29 = tpu.memref_squeeze %28 : memref<1x!tpu.dma_semaphore, #tpu.memory_space<semaphore_mem>> -> memref<!tpu.dma_semaphore, #tpu.memory_space<semaphore_mem>>
    tpu.wait_dma2 semaphore(%29 : memref<!tpu.dma_semaphore, #tpu.memory_space<semaphore_mem>>) src(%arg4 : memref<256x256xbf16, #tpu.memory_space<any>>) dst(%27 : memref<256x256xbf16, #tpu.memory_space<vmem>>)
    %c1_i32_20 = arith.constant 1 : i32
    %c1_i32_21 = arith.constant 1 : i32
    %c0_i32_22 = arith.constant 0 : i32
    %c0_i32_23 = arith.constant 0 : i32
    %30 = tpu.memref_slice %arg10[%c1_i32_20, %c0_i32_22, %c0_i32_23] : memref<3x256x256xbf16, #tpu.memory_space<vmem>> -> memref<1x256x256xbf16, #tpu.memory_space<vmem>>
    %31 = tpu.memref_squeeze %30 : memref<1x256x256xbf16, #tpu.memory_space<vmem>> -> memref<256x256xbf16, #tpu.memory_space<vmem>>
    %32 = tpu.memref_slice %arg12[%c1_i32_21] : memref<4x!tpu.dma_semaphore, #tpu.memory_space<semaphore_mem>> -> memref<1x!tpu.dma_semaphore, #tpu.memory_space<semaphore_mem>>
    %33 = tpu.memref_squeeze %32 : memref<1x!tpu.dma_semaphore, #tpu.memory_space<semaphore_mem>> -> memref<!tpu.dma_semaphore, #tpu.memory_space<semaphore_mem>>
    tpu.wait_dma2 semaphore(%33 : memref<!tpu.dma_semaphore, #tpu.memory_space<semaphore_mem>>) src(%arg5 : memref<256x256xbf16, #tpu.memory_space<any>>) dst(%31 : memref<256x256xbf16, #tpu.memory_space<vmem>>)
    %c2_i32_24 = arith.constant 2 : i32
    %c2_i32_25 = arith.constant 2 : i32
    %c0_i32_26 = arith.constant 0 : i32
    %c0_i32_27 = arith.constant 0 : i32
    %34 = tpu.memref_slice %arg10[%c2_i32_24, %c0_i32_26, %c0_i32_27] : memref<3x256x256xbf16, #tpu.memory_space<vmem>> -> memref<1x256x256xbf16, #tpu.memory_space<vmem>>
    %35 = tpu.memref_squeeze %34 : memref<1x256x256xbf16, #tpu.memory_space<vmem>> -> memref<256x256xbf16, #tpu.memory_space<vmem>>
    %36 = tpu.memref_slice %arg12[%c2_i32_25] : memref<4x!tpu.dma_semaphore, #tpu.memory_space<semaphore_mem>> -> memref<1x!tpu.dma_semaphore, #tpu.memory_space<semaphore_mem>>
    %37 = tpu.memref_squeeze %36 : memref<1x!tpu.dma_semaphore, #tpu.memory_space<semaphore_mem>> -> memref<!tpu.dma_semaphore, #tpu.memory_space<semaphore_mem>>
    tpu.wait_dma2 semaphore(%37 : memref<!tpu.dma_semaphore, #tpu.memory_space<semaphore_mem>>) src(%arg6 : memref<256x256xbf16, #tpu.memory_space<any>>) dst(%35 : memref<256x256xbf16, #tpu.memory_space<vmem>>)
    %c0_28 = arith.constant 0 : index
    %c0_29 = arith.constant 0 : index
    %c0_30 = arith.constant 0 : index
    %38 = vector.load %arg10[%c0_28, %c0_29, %c0_30] : memref<3x256x256xbf16, #tpu.memory_space<vmem>>, vector<1x256x256xbf16>
    %39 = vector.shape_cast %38 : vector<1x256x256xbf16> to vector<256x256xbf16>
    %c1 = arith.constant 1 : index
    %c0_31 = arith.constant 0 : index
    %c0_32 = arith.constant 0 : index
    %40 = vector.load %arg10[%c1, %c0_31, %c0_32] : memref<3x256x256xbf16, #tpu.memory_space<vmem>>, vector<1x256x256xbf16>
    %41 = vector.shape_cast %40 : vector<1x256x256xbf16> to vector<256x256xbf16>
    %c2 = arith.constant 2 : index
    %c0_33 = arith.constant 0 : index
    %c0_34 = arith.constant 0 : index
    %42 = vector.load %arg10[%c2, %c0_33, %c0_34] : memref<3x256x256xbf16, #tpu.memory_space<vmem>>, vector<1x256x256xbf16>
    %43 = vector.shape_cast %42 : vector<1x256x256xbf16> to vector<256x256xbf16>
    %cst_35 = arith.constant 0.000000e+00 : f32
    %44 = vector.broadcast %cst_35 : f32 to vector<8x256xf32>
    %c0_i32_36 = arith.constant 0 : i32
    %c8_i32 = arith.constant 8 : i32
    %45 = arith.muli %c0_i32_36, %c8_i32 : i32
    %46 = tpu.assume_multiple %45, 8 : i32
    %47 = arith.index_cast %46 : i32 to index
    %c0_37 = arith.constant 0 : index
    %48 = vector.load %arg9[%47, %c0_37] : memref<64x768xf32, #tpu.memory_space<vmem>>, vector<8x768xf32>
    %49 = arith.truncf %44 : vector<8x256xf32> to vector<8x256xbf16>
    %cst_38 = arith.constant dense<0.000000e+00> : vector<8x256xf32>
    %50 = tpu.matmul %49, %39, %cst_38 {dimension_numbers = #tpu.dot_dimension_numbers<[1], [0], [0], [1], [0, 0, 1, 1], [], []>} : vector<8x256xbf16>, vector<256x256xbf16>, vector<8x256xf32> -> vector<8x256xf32>
    %cst_39 = arith.constant dense<0.000000e+00> : vector<8x256xf32>
    %51 = tpu.matmul %49, %41, %cst_39 {dimension_numbers = #tpu.dot_dimension_numbers<[1], [0], [0], [1], [0, 0, 1, 1], [], []>} : vector<8x256xbf16>, vector<256x256xbf16>, vector<8x256xf32> -> vector<8x256xf32>
    %cst_40 = arith.constant dense<0.000000e+00> : vector<8x256xf32>
    %52 = tpu.matmul %49, %43, %cst_40 {dimension_numbers = #tpu.dot_dimension_numbers<[1], [0], [0], [1], [0, 0, 1, 1], [], []>} : vector<8x256xbf16>, vector<256x256xbf16>, vector<8x256xf32> -> vector<8x256xf32>
    %53 = vector.extract_strided_slice %48 {offsets = [0, 0], sizes = [8, 256], strides = [1, 1]} : vector<8x768xf32> to vector<8x256xf32>
    %54 = arith.addf %53, %50 : vector<8x256xf32>
    %55 = arith.negf %54 : vector<8x256xf32>
    %56 = math.exp %55 : vector<8x256xf32>
    %cst_41 = arith.constant 1.000000e+00 : f32
    %57 = vector.broadcast %cst_41 : f32 to vector<8x256xf32>
    %58 = arith.addf %57, %56 : vector<8x256xf32>
    %59 = arith.divf %57, %58 : vector<8x256xf32>
    %60 = vector.extract_strided_slice %48 {offsets = [0, 256], sizes = [8, 256], strides = [1, 1]} : vector<8x768xf32> to vector<8x256xf32>
    %61 = arith.addf %60, %51 : vector<8x256xf32>
    %62 = arith.negf %61 : vector<8x256xf32>
    %63 = math.exp %62 : vector<8x256xf32>
    %cst_42 = arith.constant 1.000000e+00 : f32
    %64 = vector.broadcast %cst_42 : f32 to vector<8x256xf32>
    %65 = arith.addf %64, %63 : vector<8x256xf32>
    %66 = arith.divf %64, %65 : vector<8x256xf32>
    %67 = vector.extract_strided_slice %48 {offsets = [0, 512], sizes = [8, 256], strides = [1, 1]} : vector<8x768xf32> to vector<8x256xf32>
    %68 = arith.addf %52, %25 : vector<8x256xf32>
    %69 = arith.mulf %59, %68 : vector<8x256xf32>
    %70 = arith.addf %67, %69 : vector<8x256xf32>
    %71 = math.tanh %70 : vector<8x256xf32>
    %72 = arith.subf %44, %71 : vector<8x256xf32>
    %73 = arith.mulf %66, %72 : vector<8x256xf32>
    %74 = arith.addf %71, %73 : vector<8x256xf32>
    %c1_i32_43 = arith.constant 1 : i32
    %c8_i32_44 = arith.constant 8 : i32
    %75 = arith.muli %c1_i32_43, %c8_i32_44 : i32
    %76 = tpu.assume_multiple %75, 8 : i32
    %77 = arith.index_cast %76 : i32 to index
    %c0_45 = arith.constant 0 : index
    %78 = vector.load %arg9[%77, %c0_45] : memref<64x768xf32, #tpu.memory_space<vmem>>, vector<8x768xf32>
    %79 = arith.truncf %74 : vector<8x256xf32> to vector<8x256xbf16>
    %cst_46 = arith.constant dense<0.000000e+00> : vector<8x256xf32>
    %80 = tpu.matmul %79, %39, %cst_46 {dimension_numbers = #tpu.dot_dimension_numbers<[1], [0], [0], [1], [0, 0, 1, 1], [], []>} : vector<8x256xbf16>, vector<256x256xbf16>, vector<8x256xf32> -> vector<8x256xf32>
    %cst_47 = arith.constant dense<0.000000e+00> : vector<8x256xf32>
    %81 = tpu.matmul %79, %41, %cst_47 {dimension_numbers = #tpu.dot_dimension_numbers<[1], [0], [0], [1], [0, 0, 1, 1], [], []>} : vector<8x256xbf16>, vector<256x256xbf16>, vector<8x256xf32> -> vector<8x256xf32>
    %cst_48 = arith.constant dense<0.000000e+00> : vector<8x256xf32>
    %82 = tpu.matmul %79, %43, %cst_48 {dimension_numbers = #tpu.dot_dimension_numbers<[1], [0], [0], [1], [0, 0, 1, 1], [], []>} : vector<8x256xbf16>, vector<256x256xbf16>, vector<8x256xf32> -> vector<8x256xf32>
    %83 = vector.extract_strided_slice %78 {offsets = [0, 0], sizes = [8, 256], strides = [1, 1]} : vector<8x768xf32> to vector<8x256xf32>
    %84 = arith.addf %83, %80 : vector<8x256xf32>
    %85 = arith.negf %84 : vector<8x256xf32>
    %86 = math.exp %85 : vector<8x256xf32>
    %cst_49 = arith.constant 1.000000e+00 : f32
    %87 = vector.broadcast %cst_49 : f32 to vector<8x256xf32>
    %88 = arith.addf %87, %86 : vector<8x256xf32>
    %89 = arith.divf %87, %88 : vector<8x256xf32>
    %90 = vector.extract_strided_slice %78 {offsets = [0, 256], sizes = [8, 256], strides = [1, 1]} : vector<8x768xf32> to vector<8x256xf32>
    %91 = arith.addf %90, %81 : vector<8x256xf32>
    %92 = arith.negf %91 : vector<8x256xf32>
    %93 = math.exp %92 : vector<8x256xf32>
    %cst_50 = arith.constant 1.000000e+00 : f32
    %94 = vector.broadcast %cst_50 : f32 to vector<8x256xf32>
    %95 = arith.addf %94, %93 : vector<8x256xf32>
    %96 = arith.divf %94, %95 : vector<8x256xf32>
    %97 = vector.extract_strided_slice %78 {offsets = [0, 512], sizes = [8, 256], strides = [1, 1]} : vector<8x768xf32> to vector<8x256xf32>
    %98 = arith.addf %82, %25 : vector<8x256xf32>
    %99 = arith.mulf %89, %98 : vector<8x256xf32>
    %100 = arith.addf %97, %99 : vector<8x256xf32>
    %101 = math.tanh %100 : vector<8x256xf32>
    %102 = arith.subf %74, %101 : vector<8x256xf32>
    %103 = arith.mulf %96, %102 : vector<8x256xf32>
    %104 = arith.addf %101, %103 : vector<8x256xf32>
    %c2_i32_51 = arith.constant 2 : i32
    %c8_i32_52 = arith.constant 8 : i32
    %105 = arith.muli %c2_i32_51, %c8_i32_52 : i32
    %106 = tpu.assume_multiple %105, 8 : i32
    %107 = arith.index_cast %106 : i32 to index
    %c0_53 = arith.constant 0 : index
    %108 = vector.load %arg9[%107, %c0_53] : memref<64x768xf32, #tpu.memory_space<vmem>>, vector<8x768xf32>
    %109 = arith.truncf %104 : vector<8x256xf32> to vector<8x256xbf16>
    %cst_54 = arith.constant dense<0.000000e+00> : vector<8x256xf32>
    %110 = tpu.matmul %109, %39, %cst_54 {dimension_numbers = #tpu.dot_dimension_numbers<[1], [0], [0], [1], [0, 0, 1, 1], [], []>} : vector<8x256xbf16>, vector<256x256xbf16>, vector<8x256xf32> -> vector<8x256xf32>
    %cst_55 = arith.constant dense<0.000000e+00> : vector<8x256xf32>
    %111 = tpu.matmul %109, %41, %cst_55 {dimension_numbers = #tpu.dot_dimension_numbers<[1], [0], [0], [1], [0, 0, 1, 1], [], []>} : vector<8x256xbf16>, vector<256x256xbf16>, vector<8x256xf32> -> vector<8x256xf32>
    %cst_56 = arith.constant dense<0.000000e+00> : vector<8x256xf32>
    %112 = tpu.matmul %109, %43, %cst_56 {dimension_numbers = #tpu.dot_dimension_numbers<[1], [0], [0], [1], [0, 0, 1, 1], [], []>} : vector<8x256xbf16>, vector<256x256xbf16>, vector<8x256xf32> -> vector<8x256xf32>
    %113 = vector.extract_strided_slice %108 {offsets = [0, 0], sizes = [8, 256], strides = [1, 1]} : vector<8x768xf32> to vector<8x256xf32>
    %114 = arith.addf %113, %110 : vector<8x256xf32>
    %115 = arith.negf %114 : vector<8x256xf32>
    %116 = math.exp %115 : vector<8x256xf32>
    %cst_57 = arith.constant 1.000000e+00 : f32
    %117 = vector.broadcast %cst_57 : f32 to vector<8x256xf32>
    %118 = arith.addf %117, %116 : vector<8x256xf32>
    %119 = arith.divf %117, %118 : vector<8x256xf32>
    %120 = vector.extract_strided_slice %108 {offsets = [0, 256], sizes = [8, 256], strides = [1, 1]} : vector<8x768xf32> to vector<8x256xf32>
    %121 = arith.addf %120, %111 : vector<8x256xf32>
    %122 = arith.negf %121 : vector<8x256xf32>
    %123 = math.exp %122 : vector<8x256xf32>
    %cst_58 = arith.constant 1.000000e+00 : f32
    %124 = vector.broadcast %cst_58 : f32 to vector<8x256xf32>
    %125 = arith.addf %124, %123 : vector<8x256xf32>
    %126 = arith.divf %124, %125 : vector<8x256xf32>
    %127 = vector.extract_strided_slice %108 {offsets = [0, 512], sizes = [8, 256], strides = [1, 1]} : vector<8x768xf32> to vector<8x256xf32>
    %128 = arith.addf %112, %25 : vector<8x256xf32>
    %129 = arith.mulf %119, %128 : vector<8x256xf32>
    %130 = arith.addf %127, %129 : vector<8x256xf32>
    %131 = math.tanh %130 : vector<8x256xf32>
    %132 = arith.subf %104, %131 : vector<8x256xf32>
    %133 = arith.mulf %126, %132 : vector<8x256xf32>
    %134 = arith.addf %131, %133 : vector<8x256xf32>
    %c3_i32_59 = arith.constant 3 : i32
    %c8_i32_60 = arith.constant 8 : i32
    %135 = arith.muli %c3_i32_59, %c8_i32_60 : i32
    %136 = tpu.assume_multiple %135, 8 : i32
    %137 = arith.index_cast %136 : i32 to index
    %c0_61 = arith.constant 0 : index
    %138 = vector.load %arg9[%137, %c0_61] : memref<64x768xf32, #tpu.memory_space<vmem>>, vector<8x768xf32>
    %139 = arith.truncf %134 : vector<8x256xf32> to vector<8x256xbf16>
    %cst_62 = arith.constant dense<0.000000e+00> : vector<8x256xf32>
    %140 = tpu.matmul %139, %39, %cst_62 {dimension_numbers = #tpu.dot_dimension_numbers<[1], [0], [0], [1], [0, 0, 1, 1], [], []>} : vector<8x256xbf16>, vector<256x256xbf16>, vector<8x256xf32> -> vector<8x256xf32>
    %cst_63 = arith.constant dense<0.000000e+00> : vector<8x256xf32>
    %141 = tpu.matmul %139, %41, %cst_63 {dimension_numbers = #tpu.dot_dimension_numbers<[1], [0], [0], [1], [0, 0, 1, 1], [], []>} : vector<8x256xbf16>, vector<256x256xbf16>, vector<8x256xf32> -> vector<8x256xf32>
    %cst_64 = arith.constant dense<0.000000e+00> : vector<8x256xf32>
    %142 = tpu.matmul %139, %43, %cst_64 {dimension_numbers = #tpu.dot_dimension_numbers<[1], [0], [0], [1], [0, 0, 1, 1], [], []>} : vector<8x256xbf16>, vector<256x256xbf16>, vector<8x256xf32> -> vector<8x256xf32>
    %143 = vector.extract_strided_slice %138 {offsets = [0, 0], sizes = [8, 256], strides = [1, 1]} : vector<8x768xf32> to vector<8x256xf32>
    %144 = arith.addf %143, %140 : vector<8x256xf32>
    %145 = arith.negf %144 : vector<8x256xf32>
    %146 = math.exp %145 : vector<8x256xf32>
    %cst_65 = arith.constant 1.000000e+00 : f32
    %147 = vector.broadcast %cst_65 : f32 to vector<8x256xf32>
    %148 = arith.addf %147, %146 : vector<8x256xf32>
    %149 = arith.divf %147, %148 : vector<8x256xf32>
    %150 = vector.extract_strided_slice %138 {offsets = [0, 256], sizes = [8, 256], strides = [1, 1]} : vector<8x768xf32> to vector<8x256xf32>
    %151 = arith.addf %150, %141 : vector<8x256xf32>
    %152 = arith.negf %151 : vector<8x256xf32>
    %153 = math.exp %152 : vector<8x256xf32>
    %cst_66 = arith.constant 1.000000e+00 : f32
    %154 = vector.broadcast %cst_66 : f32 to vector<8x256xf32>
    %155 = arith.addf %154, %153 : vector<8x256xf32>
    %156 = arith.divf %154, %155 : vector<8x256xf32>
    %157 = vector.extract_strided_slice %138 {offsets = [0, 512], sizes = [8, 256], strides = [1, 1]} : vector<8x768xf32> to vector<8x256xf32>
    %158 = arith.addf %142, %25 : vector<8x256xf32>
    %159 = arith.mulf %149, %158 : vector<8x256xf32>
    %160 = arith.addf %157, %159 : vector<8x256xf32>
    %161 = math.tanh %160 : vector<8x256xf32>
    %162 = arith.subf %134, %161 : vector<8x256xf32>
    %163 = arith.mulf %156, %162 : vector<8x256xf32>
    %164 = arith.addf %161, %163 : vector<8x256xf32>
    %c4_i32 = arith.constant 4 : i32
    %c8_i32_67 = arith.constant 8 : i32
    %165 = arith.muli %c4_i32, %c8_i32_67 : i32
    %166 = tpu.assume_multiple %165, 8 : i32
    %167 = arith.index_cast %166 : i32 to index
    %c0_68 = arith.constant 0 : index
    %168 = vector.load %arg9[%167, %c0_68] : memref<64x768xf32, #tpu.memory_space<vmem>>, vector<8x768xf32>
    %169 = arith.truncf %164 : vector<8x256xf32> to vector<8x256xbf16>
    %cst_69 = arith.constant dense<0.000000e+00> : vector<8x256xf32>
    %170 = tpu.matmul %169, %39, %cst_69 {dimension_numbers = #tpu.dot_dimension_numbers<[1], [0], [0], [1], [0, 0, 1, 1], [], []>} : vector<8x256xbf16>, vector<256x256xbf16>, vector<8x256xf32> -> vector<8x256xf32>
    %cst_70 = arith.constant dense<0.000000e+00> : vector<8x256xf32>
    %171 = tpu.matmul %169, %41, %cst_70 {dimension_numbers = #tpu.dot_dimension_numbers<[1], [0], [0], [1], [0, 0, 1, 1], [], []>} : vector<8x256xbf16>, vector<256x256xbf16>, vector<8x256xf32> -> vector<8x256xf32>
    %cst_71 = arith.constant dense<0.000000e+00> : vector<8x256xf32>
    %172 = tpu.matmul %169, %43, %cst_71 {dimension_numbers = #tpu.dot_dimension_numbers<[1], [0], [0], [1], [0, 0, 1, 1], [], []>} : vector<8x256xbf16>, vector<256x256xbf16>, vector<8x256xf32> -> vector<8x256xf32>
    %173 = vector.extract_strided_slice %168 {offsets = [0, 0], sizes = [8, 256], strides = [1, 1]} : vector<8x768xf32> to vector<8x256xf32>
    %174 = arith.addf %173, %170 : vector<8x256xf32>
    %175 = arith.negf %174 : vector<8x256xf32>
    %176 = math.exp %175 : vector<8x256xf32>
    %cst_72 = arith.constant 1.000000e+00 : f32
    %177 = vector.broadcast %cst_72 : f32 to vector<8x256xf32>
    %178 = arith.addf %177, %176 : vector<8x256xf32>
    %179 = arith.divf %177, %178 : vector<8x256xf32>
    %180 = vector.extract_strided_slice %168 {offsets = [0, 256], sizes = [8, 256], strides = [1, 1]} : vector<8x768xf32> to vector<8x256xf32>
    %181 = arith.addf %180, %171 : vector<8x256xf32>
    %182 = arith.negf %181 : vector<8x256xf32>
    %183 = math.exp %182 : vector<8x256xf32>
    %cst_73 = arith.constant 1.000000e+00 : f32
    %184 = vector.broadcast %cst_73 : f32 to vector<8x256xf32>
    %185 = arith.addf %184, %183 : vector<8x256xf32>
    %186 = arith.divf %184, %185 : vector<8x256xf32>
    %187 = vector.extract_strided_slice %168 {offsets = [0, 512], sizes = [8, 256], strides = [1, 1]} : vector<8x768xf32> to vector<8x256xf32>
    %188 = arith.addf %172, %25 : vector<8x256xf32>
    %189 = arith.mulf %179, %188 : vector<8x256xf32>
    %190 = arith.addf %187, %189 : vector<8x256xf32>
    %191 = math.tanh %190 : vector<8x256xf32>
    %192 = arith.subf %164, %191 : vector<8x256xf32>
    %193 = arith.mulf %186, %192 : vector<8x256xf32>
    %194 = arith.addf %191, %193 : vector<8x256xf32>
    %c5_i32 = arith.constant 5 : i32
    %c8_i32_74 = arith.constant 8 : i32
    %195 = arith.muli %c5_i32, %c8_i32_74 : i32
    %196 = tpu.assume_multiple %195, 8 : i32
    %197 = arith.index_cast %196 : i32 to index
    %c0_75 = arith.constant 0 : index
    %198 = vector.load %arg9[%197, %c0_75] : memref<64x768xf32, #tpu.memory_space<vmem>>, vector<8x768xf32>
    %199 = arith.truncf %194 : vector<8x256xf32> to vector<8x256xbf16>
    %cst_76 = arith.constant dense<0.000000e+00> : vector<8x256xf32>
    %200 = tpu.matmul %199, %39, %cst_76 {dimension_numbers = #tpu.dot_dimension_numbers<[1], [0], [0], [1], [0, 0, 1, 1], [], []>} : vector<8x256xbf16>, vector<256x256xbf16>, vector<8x256xf32> -> vector<8x256xf32>
    %cst_77 = arith.constant dense<0.000000e+00> : vector<8x256xf32>
    %201 = tpu.matmul %199, %41, %cst_77 {dimension_numbers = #tpu.dot_dimension_numbers<[1], [0], [0], [1], [0, 0, 1, 1], [], []>} : vector<8x256xbf16>, vector<256x256xbf16>, vector<8x256xf32> -> vector<8x256xf32>
    %cst_78 = arith.constant dense<0.000000e+00> : vector<8x256xf32>
    %202 = tpu.matmul %199, %43, %cst_78 {dimension_numbers = #tpu.dot_dimension_numbers<[1], [0], [0], [1], [0, 0, 1, 1], [], []>} : vector<8x256xbf16>, vector<256x256xbf16>, vector<8x256xf32> -> vector<8x256xf32>
    %203 = vector.extract_strided_slice %198 {offsets = [0, 0], sizes = [8, 256], strides = [1, 1]} : vector<8x768xf32> to vector<8x256xf32>
    %204 = arith.addf %203, %200 : vector<8x256xf32>
    %205 = arith.negf %204 : vector<8x256xf32>
    %206 = math.exp %205 : vector<8x256xf32>
    %cst_79 = arith.constant 1.000000e+00 : f32
    %207 = vector.broadcast %cst_79 : f32 to vector<8x256xf32>
    %208 = arith.addf %207, %206 : vector<8x256xf32>
    %209 = arith.divf %207, %208 : vector<8x256xf32>
    %210 = vector.extract_strided_slice %198 {offsets = [0, 256], sizes = [8, 256], strides = [1, 1]} : vector<8x768xf32> to vector<8x256xf32>
    %211 = arith.addf %210, %201 : vector<8x256xf32>
    %212 = arith.negf %211 : vector<8x256xf32>
    %213 = math.exp %212 : vector<8x256xf32>
    %cst_80 = arith.constant 1.000000e+00 : f32
    %214 = vector.broadcast %cst_80 : f32 to vector<8x256xf32>
    %215 = arith.addf %214, %213 : vector<8x256xf32>
    %216 = arith.divf %214, %215 : vector<8x256xf32>
    %217 = vector.extract_strided_slice %198 {offsets = [0, 512], sizes = [8, 256], strides = [1, 1]} : vector<8x768xf32> to vector<8x256xf32>
    %218 = arith.addf %202, %25 : vector<8x256xf32>
    %219 = arith.mulf %209, %218 : vector<8x256xf32>
    %220 = arith.addf %217, %219 : vector<8x256xf32>
    %221 = math.tanh %220 : vector<8x256xf32>
    %222 = arith.subf %194, %221 : vector<8x256xf32>
    %223 = arith.mulf %216, %222 : vector<8x256xf32>
    %224 = arith.addf %221, %223 : vector<8x256xf32>
    %c6_i32 = arith.constant 6 : i32
    %c8_i32_81 = arith.constant 8 : i32
    %225 = arith.muli %c6_i32, %c8_i32_81 : i32
    %226 = tpu.assume_multiple %225, 8 : i32
    %227 = arith.index_cast %226 : i32 to index
    %c0_82 = arith.constant 0 : index
    %228 = vector.load %arg9[%227, %c0_82] : memref<64x768xf32, #tpu.memory_space<vmem>>, vector<8x768xf32>
    %229 = arith.truncf %224 : vector<8x256xf32> to vector<8x256xbf16>
    %cst_83 = arith.constant dense<0.000000e+00> : vector<8x256xf32>
    %230 = tpu.matmul %229, %39, %cst_83 {dimension_numbers = #tpu.dot_dimension_numbers<[1], [0], [0], [1], [0, 0, 1, 1], [], []>} : vector<8x256xbf16>, vector<256x256xbf16>, vector<8x256xf32> -> vector<8x256xf32>
    %cst_84 = arith.constant dense<0.000000e+00> : vector<8x256xf32>
    %231 = tpu.matmul %229, %41, %cst_84 {dimension_numbers = #tpu.dot_dimension_numbers<[1], [0], [0], [1], [0, 0, 1, 1], [], []>} : vector<8x256xbf16>, vector<256x256xbf16>, vector<8x256xf32> -> vector<8x256xf32>
    %cst_85 = arith.constant dense<0.000000e+00> : vector<8x256xf32>
    %232 = tpu.matmul %229, %43, %cst_85 {dimension_numbers = #tpu.dot_dimension_numbers<[1], [0], [0], [1], [0, 0, 1, 1], [], []>} : vector<8x256xbf16>, vector<256x256xbf16>, vector<8x256xf32> -> vector<8x256xf32>
    %233 = vector.extract_strided_slice %228 {offsets = [0, 0], sizes = [8, 256], strides = [1, 1]} : vector<8x768xf32> to vector<8x256xf32>
    %234 = arith.addf %233, %230 : vector<8x256xf32>
    %235 = arith.negf %234 : vector<8x256xf32>
    %236 = math.exp %235 : vector<8x256xf32>
    %cst_86 = arith.constant 1.000000e+00 : f32
    %237 = vector.broadcast %cst_86 : f32 to vector<8x256xf32>
    %238 = arith.addf %237, %236 : vector<8x256xf32>
    %239 = arith.divf %237, %238 : vector<8x256xf32>
    %240 = vector.extract_strided_slice %228 {offsets = [0, 256], sizes = [8, 256], strides = [1, 1]} : vector<8x768xf32> to vector<8x256xf32>
    %241 = arith.addf %240, %231 : vector<8x256xf32>
    %242 = arith.negf %241 : vector<8x256xf32>
    %243 = math.exp %242 : vector<8x256xf32>
    %cst_87 = arith.constant 1.000000e+00 : f32
    %244 = vector.broadcast %cst_87 : f32 to vector<8x256xf32>
    %245 = arith.addf %244, %243 : vector<8x256xf32>
    %246 = arith.divf %244, %245 : vector<8x256xf32>
    %247 = vector.extract_strided_slice %228 {offsets = [0, 512], sizes = [8, 256], strides = [1, 1]} : vector<8x768xf32> to vector<8x256xf32>
    %248 = arith.addf %232, %25 : vector<8x256xf32>
    %249 = arith.mulf %239, %248 : vector<8x256xf32>
    %250 = arith.addf %247, %249 : vector<8x256xf32>
    %251 = math.tanh %250 : vector<8x256xf32>
    %252 = arith.subf %224, %251 : vector<8x256xf32>
    %253 = arith.mulf %246, %252 : vector<8x256xf32>
    %254 = arith.addf %251, %253 : vector<8x256xf32>
    %c7_i32 = arith.constant 7 : i32
    %c8_i32_88 = arith.constant 8 : i32
    %255 = arith.muli %c7_i32, %c8_i32_88 : i32
    %256 = tpu.assume_multiple %255, 8 : i32
    %257 = arith.index_cast %256 : i32 to index
    %c0_89 = arith.constant 0 : index
    %258 = vector.load %arg9[%257, %c0_89] : memref<64x768xf32, #tpu.memory_space<vmem>>, vector<8x768xf32>
    %259 = arith.truncf %254 : vector<8x256xf32> to vector<8x256xbf16>
    %cst_90 = arith.constant dense<0.000000e+00> : vector<8x256xf32>
    %260 = tpu.matmul %259, %39, %cst_90 {dimension_numbers = #tpu.dot_dimension_numbers<[1], [0], [0], [1], [0, 0, 1, 1], [], []>} : vector<8x256xbf16>, vector<256x256xbf16>, vector<8x256xf32> -> vector<8x256xf32>
    %cst_91 = arith.constant dense<0.000000e+00> : vector<8x256xf32>
    %261 = tpu.matmul %259, %41, %cst_91 {dimension_numbers = #tpu.dot_dimension_numbers<[1], [0], [0], [1], [0, 0, 1, 1], [], []>} : vector<8x256xbf16>, vector<256x256xbf16>, vector<8x256xf32> -> vector<8x256xf32>
    %cst_92 = arith.constant dense<0.000000e+00> : vector<8x256xf32>
    %262 = tpu.matmul %259, %43, %cst_92 {dimension_numbers = #tpu.dot_dimension_numbers<[1], [0], [0], [1], [0, 0, 1, 1], [], []>} : vector<8x256xbf16>, vector<256x256xbf16>, vector<8x256xf32> -> vector<8x256xf32>
    %263 = vector.extract_strided_slice %258 {offsets = [0, 0], sizes = [8, 256], strides = [1, 1]} : vector<8x768xf32> to vector<8x256xf32>
    %264 = arith.addf %263, %260 : vector<8x256xf32>
    %265 = arith.negf %264 : vector<8x256xf32>
    %266 = math.exp %265 : vector<8x256xf32>
    %cst_93 = arith.constant 1.000000e+00 : f32
    %267 = vector.broadcast %cst_93 : f32 to vector<8x256xf32>
    %268 = arith.addf %267, %266 : vector<8x256xf32>
    %269 = arith.divf %267, %268 : vector<8x256xf32>
    %270 = vector.extract_strided_slice %258 {offsets = [0, 256], sizes = [8, 256], strides = [1, 1]} : vector<8x768xf32> to vector<8x256xf32>
    %271 = arith.addf %270, %261 : vector<8x256xf32>
    %272 = arith.negf %271 : vector<8x256xf32>
    %273 = math.exp %272 : vector<8x256xf32>
    %cst_94 = arith.constant 1.000000e+00 : f32
    %274 = vector.broadcast %cst_94 : f32 to vector<8x256xf32>
    %275 = arith.addf %274, %273 : vector<8x256xf32>
    %276 = arith.divf %274, %275 : vector<8x256xf32>
    %277 = vector.extract_strided_slice %258 {offsets = [0, 512], sizes = [8, 256], strides = [1, 1]} : vector<8x768xf32> to vector<8x256xf32>
    %278 = arith.addf %262, %25 : vector<8x256xf32>
    %279 = arith.mulf %269, %278 : vector<8x256xf32>
    %280 = arith.addf %277, %279 : vector<8x256xf32>
    %281 = math.tanh %280 : vector<8x256xf32>
    %282 = arith.subf %254, %281 : vector<8x256xf32>
    %283 = arith.mulf %276, %282 : vector<8x256xf32>
    %284 = arith.addf %281, %283 : vector<8x256xf32>
    %c8_i32_95 = arith.constant 8 : i32
    %c3_i32_96 = arith.constant 3 : i32
    %285 = tpu.memref_slice %arg12[%c3_i32_96] : memref<4x!tpu.dma_semaphore, #tpu.memory_space<semaphore_mem>> -> memref<1x!tpu.dma_semaphore, #tpu.memory_space<semaphore_mem>>
    %286 = tpu.memref_squeeze %285 : memref<1x!tpu.dma_semaphore, #tpu.memory_space<semaphore_mem>> -> memref<!tpu.dma_semaphore, #tpu.memory_space<semaphore_mem>>
    tpu.wait_dma2 semaphore(%286 : memref<!tpu.dma_semaphore, #tpu.memory_space<semaphore_mem>>) src(%arg7 : memref<256x128xbf16, #tpu.memory_space<any>>) dst(%arg11 : memref<256x128xbf16, #tpu.memory_space<vmem>>)
    %287 = arith.truncf %284 : vector<8x256xf32> to vector<8x256xbf16>
    %c0_97 = arith.constant 0 : index
    %c0_98 = arith.constant 0 : index
    %288 = vector.load %arg11[%c0_97, %c0_98] : memref<256x128xbf16, #tpu.memory_space<vmem>>, vector<256x128xbf16>
    %cst_99 = arith.constant dense<0.000000e+00> : vector<8x128xf32>
    %289 = tpu.matmul %287, %288, %cst_99 {dimension_numbers = #tpu.dot_dimension_numbers<[1], [0], [0], [1], [0, 0, 1, 1], [], []>} : vector<8x256xbf16>, vector<256x128xbf16>, vector<8x128xf32> -> vector<8x128xf32>
    %c0_100 = arith.constant 0 : index
    %c0_101 = arith.constant 0 : index
    %290 = vector.load %arg3[%c0_100, %c0_101] : memref<1x128xf32, #tpu.memory_space<vmem>>, vector<1x128xf32>
    %291 = vector.broadcast %290 : vector<1x128xf32> to vector<8x128xf32>
    %292 = arith.addf %289, %291 : vector<8x128xf32>
    %c0_102 = arith.constant 0 : index
    %c0_103 = arith.constant 0 : index
    %293 = vector.load %arg8[%c0_102, %c0_103] : memref<8x128xf32, #tpu.memory_space<vmem>>, vector<8x128xf32>
    tpu.vector_store %arg8[%c0_102, %c0_103], %292 {strides = array<i32>} : memref<8x128xf32, #tpu.memory_space<vmem>>, vector<8x128xf32>,
    return
  }
}

</mosaic_0001>

<bundles_post_ra>
// kernel: tpu_custom_call.1
= control target key start
LH: loop header
LB: loop body
LE: loop exit
PB: predicated region body
PF: predicated region fallthrough
CT: control target
= control target key end

     0   :  { %13 = vsyncpa [#allocation7], 0  ;;  %s5902_s0 = inlined_call_operand.vmem [shape: s32[64,1], index: 0, kind: input, shape index: {}]   ;;  %s5903_s1 = inlined_call_operand.hbm [shape: f32[128,768], index: 1, kind: input, shape index: {}]   ;;  %s5904_s2 = inlined_call_operand.vmem [shape: f32[1,256], index: 2, kind: input, shape index: {}]   ;;  %s5905_s3 = inlined_call_operand.vmem [shape: f32[1,128], index: 3, kind: input, shape index: {}]   ;;  %s5906_s4 = inlined_call_operand.hbm [shape: bf16[256,256], index: 4, kind: input, shape index: {}]   ;;  %s5907_s5 = inlined_call_operand.hbm [shape: bf16[256,256], index: 5, kind: input, shape index: {}]   ;;  %s5908_s6 = inlined_call_operand.hbm [shape: bf16[256,256], index: 6, kind: input, shape index: {}]   ;;  %s5909_s7 = inlined_call_operand.hbm [shape: bf16[256,128], index: 7, kind: input, shape index: {}]   ;;  %s5910_s8 = inlined_call_operand.hbm [shape: f32[8,128], index: 8, kind: output, shape index: {}]  }
   0x1   :  { %14 = vsyncpa [#allocation8], 0  ;;  %s21_s29 = sshll.u32 %s5903_s1, 4  ;;  %s4401_s30 = smov [#allocation6]   ;;  %s22_s29 = int_to_ptr.hbm [resolvable:$true] %s21_s29 }
   0x2   :  { %s23_s9 = sshll.u32 %s4401_s30, 4  ;;  %s4402_s10 = smov 768   ;;  %s24_s9 = int_to_ptr.vmem [resolvable:$true] %s23_s9 }
   0x3   :  { %s4403_s11 = smov 48  }
   0x4   :  { %29 = dma.hbm_to_vmem [thread:$0]  %s22_s29, 12288, %s24_s9, [#allocation7], %s4402_s10, %s4402_s10, %s4403_s11  }
   0x5   :  { %4389 = dma.done.wait [#allocation7], 12288  }
   0x6   :  { %4390 = vsyncadd [#allocation7], 4294955008  ;;  %v5911_v0 = vmov 0   ;;  %v544_v1 = vld [vmem:[%s5904_s2] sm:$0x3]  ;;  %v98_v2 = vld [vmem:[%s5902_s0 + $0x10] sm:$0xff] }
   0x7   :  { %4082 = vset.pattern.permute.xlu1 %v5911_v0  ;;  %4081 = vset.pattern.permute.xlu0 %v5911_v0  ;;  %v96_v3 = vld [vmem:[%s5902_s0] sm:$0xff]  ;;  %v4471_v4 = vperm.slane %v544_v1, 0  ;;  %v4473_v5 = vperm.slane %v544_v1, 1  ;;  %v244_v7 = vld [vmem:[#allocation6 + $0x2d0] sm:$0xff]  ;;  %v245_v8 = vld [vmem:[#allocation6 + $0x2d8] sm:$0xff]  ;;  %s46_s29 = sshll.u32 %s5906_s4, 4  ;;  %s47_s29 = int_to_ptr.hbm [resolvable:$true] %s46_s29 }
   0x8   :  { %4083 = vset.pattern.permute.xlu2 %v5911_v0  ;;  %113 = vperm.xlu1 %4082, %v98_v2   ;;  %v100_v6 = vld [vmem:[%s5902_s0 + $0x20] sm:$0xff]  ;;  %v247_v10 = vld [vmem:[#allocation6 + $0x2e8] sm:$0xff]  ;;  %v240_v13 = vld [vmem:[#allocation6 + $0x2b0] sm:$0xff]  ;;  %s4406_s30 = smov [#allocation3]   ;;  %s61_s12 = sshll.u32 %s5907_s5, 4  ;;  %s62_s12 = int_to_ptr.hbm [resolvable:$true] %s61_s12 }
   0x9   :  { %6089 = vst [vmem:[#allocation26_spill] sm:$0xff] %v4471_v4  ;;  %107 = vperm.xlu0 %4081, %v96_v3   ;;  %119 = vperm.xlu2 %4083, %v100_v6   ;;  %v246_v9 = vld [vmem:[#allocation6 + $0x2e0] sm:$0xff]  ;;  %v239_v12 = vld [vmem:[#allocation6 + $0x2a8] sm:$0xff]  ;;  %v241_v14 = vld [vmem:[#allocation6 + $0x2b8] sm:$0xff]  ;;  %s48_s9 = sshll.u32 %s4406_s30, 4  ;;  %s4407_s13 = smov [#allocation3 + $0x100]   ;;  %s49_s9 = int_to_ptr.vmem [resolvable:$true] %s48_s9 }
   0xa   :  { %6090 = vst [vmem:[#allocation27_spill] sm:$0xff] %v4473_v5  ;;  %250 = vmatpush.msra.mxu0 %v244_v7  ;;  %291 = vmatpush.msra.mxu1 %v245_v8  ;;  %v238_v11 = vld [vmem:[#allocation6 + $0x2a0] sm:$0xff]  ;;  %v232_v15 = vld [vmem:[#allocation6 + $0x270] sm:$0xff]  ;;  %v99_v16 = vld [vmem:[%s5902_s0 + $0x18] sm:$0xff]  ;;  %51 = dma.hbm_to_vmem [thread:$0]  %s47_s29, 4096, %s49_s9, [#allocation5] }
   0xb   :  { %332 = vmatpush.msra.mxu2 %v246_v9  ;;  %373 = vmatpush.msra.mxu3 %v247_v10  ;;  %v97_v17 = vld [vmem:[%s5902_s0 + $0x8] sm:$0xff]  ;;  %v233_v18 = vld [vmem:[#allocation6 + $0x278] sm:$0xff]  ;;  %v234_v19 = vld [vmem:[#allocation6 + $0x280] sm:$0xff]  ;;  %s63_s4 = sshll.u32 %s4407_s13, 4  ;;  %s76_s15 = sshll.u32 %s5908_s6, 4  ;;  %s64_s4 = int_to_ptr.vmem [resolvable:$true] %s63_s4  ;;  %s77_s15 = int_to_ptr.hbm [resolvable:$true] %s76_s15 }
   0xc   :  { %251 = vmatpush.msra.mxu0 %v238_v11  ;;  %292 = vmatpush.msra.mxu1 %v239_v12  ;;  %v235_v20 = vld [vmem:[#allocation6 + $0x288] sm:$0xff]  ;;  %v226_v22 = vld [vmem:[#allocation6 + $0x240] sm:$0xff]  ;;  %v228_v24 = vld [vmem:[#allocation6 + $0x250] sm:$0xff]  ;;  %66 = dma.hbm_to_vmem [thread:$0]  %s62_s12, 4096, %s64_s4, [#allocation5 + $0x1] }
   0xd   :  { %333 = vmatpush.msra.mxu2 %v240_v13  ;;  %374 = vmatpush.msra.mxu3 %v241_v14  ;;  %v101_v21 = vld [vmem:[%s5902_s0 + $0x28] sm:$0xff]  ;;  %v229_v25 = vld [vmem:[#allocation6 + $0x258] sm:$0xff]  ;;  %v220_v26 = vld [vmem:[#allocation6 + $0x210] sm:$0xff]  ;;  %s90_s17 = sshll.u32 %s5909_s7, 4  ;;  %s4408_s18 = smov [#allocation3 + $0x200]   ;;  %s91_s17 = int_to_ptr.hbm [resolvable:$true] %s90_s17 }
   0xe   :  { %252 = vmatpush.msra.mxu0 %v232_v15  ;;  %293 = vmatpush.msra.mxu1 %v233_v18  ;;  %v227_v23 = vld [vmem:[#allocation6 + $0x248] sm:$0xff]  ;;  %v221_v27 = vld [vmem:[#allocation6 + $0x218] sm:$0xff]  ;;  %v222_v28 = vld [vmem:[#allocation6 + $0x220] sm:$0xff]  ;;  %s78_s2 = sshll.u32 %s4408_s18, 4  ;;  %s4409_s6 = smov [#allocation4]   ;;  %s79_s2 = int_to_ptr.vmem [resolvable:$true] %s78_s2 }
   0xf   :  { %334 = vmatpush.msra.mxu2 %v234_v19  ;;  %375 = vmatpush.msra.mxu3 %v235_v20  ;;  %v223_v29 = vld [vmem:[#allocation6 + $0x228] sm:$0xff]  ;;  %v214_v30 = vld [vmem:[#allocation6 + $0x1e0] sm:$0xff]  ;;  %v216_v32 = vld [vmem:[#allocation6 + $0x1f0] sm:$0xff]  ;;  %81 = dma.hbm_to_vmem [thread:$0]  %s77_s15, 4096, %s79_s2, [#allocation5 + $0x2] }
  0x10   :  { %116 = vperm.xlu1 %4082, %v99_v16   ;;  %253 = vmatpush.msra.mxu0 %v226_v22  ;;  %v215_v31 = vld [vmem:[#allocation6 + $0x1e8] sm:$0xff]  ;;  %v103_v33 = vld [vmem:[%s5902_s0 + $0x38] sm:$0xff]  ;;  %v102_v34 = vld [vmem:[%s5902_s0 + $0x30] sm:$0xff]  ;;  %s92_s19 = sshll.u32 %s4409_s6, 4  ;;  %s93_s19 = int_to_ptr.vmem [resolvable:$true] %s92_s19 }
  0x11   :  { %110 = vperm.xlu0 %4081, %v97_v17   ;;  %122 = vperm.xlu2 %4083, %v101_v21   ;;  %v217_v35 = vld [vmem:[#allocation6 + $0x1f8] sm:$0xff]  ;;  %v208_v36 = vld [vmem:[#allocation6 + $0x1b0] sm:$0xff]  ;;  %v210_v38 = vld [vmem:[#allocation6 + $0x1c0] sm:$0xff]  ;;  %95 = dma.hbm_to_vmem [thread:$0]  %s91_s17, 2048, %s93_s19, [#allocation5 + $0x3] }
  0x12   :  { %294 = vmatpush.msra.mxu1 %v227_v23  ;;  %335 = vmatpush.msra.mxu2 %v228_v24  ;;  %v209_v37 = vld [vmem:[#allocation6 + $0x1b8] sm:$0xff]  ;;  %v211_v39 = vld [vmem:[#allocation6 + $0x1c8] sm:$0xff]  ;;  %v202_v40 = vld [vmem:[#allocation6 + $0x180] sm:$0xff] }
  0x13   :  { %376 = vmatpush.msra.mxu3 %v229_v25  ;;  %254 = vmatpush.msra.mxu0 %v220_v26  ;;  %v203_v41 = vld [vmem:[#allocation6 + $0x188] sm:$0xff]  ;;  %v204_v42 = vld [vmem:[#allocation6 + $0x190] sm:$0xff]  ;;  %v205_v43 = vld [vmem:[#allocation6 + $0x198] sm:$0xff] }
  0x14   :  { %295 = vmatpush.msra.mxu1 %v221_v27  ;;  %336 = vmatpush.msra.mxu2 %v222_v28  ;;  %v196_v44 = vld [vmem:[#allocation6 + $0x150] sm:$0xff]  ;;  %v197_v45 = vld [vmem:[#allocation6 + $0x158] sm:$0xff]  ;;  %v198_v46 = vld [vmem:[#allocation6 + $0x160] sm:$0xff]  ;;  %v104_v27 = vlaneseq }
  0x15   :  { %377 = vmatpush.msra.mxu3 %v223_v29  ;;  %255 = vmatpush.msra.mxu0 %v214_v30  ;;  %v199_v47 = vld [vmem:[#allocation6 + $0x168] sm:$0xff]  ;;  %v190_v48 = vld [vmem:[#allocation6 + $0x120] sm:$0xff]  ;;  %v192_v50 = vld [vmem:[#allocation6 + $0x130] sm:$0xff] }
  0x16   :  { %296 = vmatpush.msra.mxu1 %v215_v31  ;;  %337 = vmatpush.msra.mxu2 %v216_v32  ;;  %v191_v49 = vld [vmem:[#allocation6 + $0x128] sm:$0xff]  ;;  %v193_v51 = vld [vmem:[#allocation6 + $0x138] sm:$0xff]  ;;  %v184_v52 = vld [vmem:[#allocation6 + $0xf0] sm:$0xff]  ;;  %v4493_v32 = vand.u32 127, %v104_v27 }
  0x17   :  { %378 = vmatpush.msra.mxu3 %v217_v35  ;;  %256 = vmatpush.msra.mxu0 %v208_v36  ;;  %v185_v53 = vld [vmem:[#allocation6 + $0xf8] sm:$0xff]  ;;  %v186_v54 = vld [vmem:[#allocation6 + $0x100] sm:$0xff]  ;;  %v187_v55 = vld [vmem:[#allocation6 + $0x108] sm:$0xff]  ;;  %v4405_v35 = vmov 1.0  }
  0x18   :  { %128 = vperm.xlu1 %4082, %v103_v33   ;;  %297 = vmatpush.msra.mxu1 %v209_v37  ;;  %v178_v56 = vld [vmem:[#allocation6 + $0xc0] sm:$0xff]  ;;  %v179_v57 = vld [vmem:[#allocation6 + $0xc8] sm:$0xff]  ;;  %v180_v58 = vld [vmem:[#allocation6 + $0xd0] sm:$0xff] }
  0x19   :  { %125 = vperm.xlu0 %4081, %v102_v34   ;;  %338 = vmatpush.msra.mxu2 %v210_v38  ;;  %v181_v59 = vld [vmem:[#allocation6 + $0xd8] sm:$0xff]  ;;  %v172_v60 = vld [vmem:[#allocation6 + $0x90] sm:$0xff]  ;;  %v174_v62 = vld [vmem:[#allocation6 + $0xa0] sm:$0xff] }
  0x1a   :  { %379 = vmatpush.msra.mxu3 %v211_v39  ;;  %257 = vmatpush.msra.mxu0 %v202_v40  ;;  %v173_v61 = vld [vmem:[#allocation6 + $0x98] sm:$0xff]  ;;  %v175_v63 = vld [vmem:[#allocation6 + $0xa8] sm:$0xff]  ;;  %v166_v1 = vld [vmem:[#allocation6 + $0x60] sm:$0xff] }
  0x1b   :  { %298 = vmatpush.msra.mxu1 %v203_v41  ;;  %339 = vmatpush.msra.mxu2 %v204_v42  ;;  %v167_v2 = vld [vmem:[#allocation6 + $0x68] sm:$0xff]  ;;  %v168_v3 = vld [vmem:[#allocation6 + $0x70] sm:$0xff]  ;;  %v169_v6 = vld [vmem:[#allocation6 + $0x78] sm:$0xff] }
  0x1c   :  { %380 = vmatpush.msra.mxu3 %v205_v43  ;;  %258 = vmatpush.msra.mxu0 %v196_v44  ;;  %v160_v7 = vld [vmem:[#allocation6 + $0x30] sm:$0xff]  ;;  %v161_v8 = vld [vmem:[#allocation6 + $0x38] sm:$0xff]  ;;  %v162_v9 = vld [vmem:[#allocation6 + $0x40] sm:$0xff] }
  0x1d   :  { %299 = vmatpush.msra.mxu1 %v197_v45  ;;  %340 = vmatpush.msra.mxu2 %v198_v46  ;;  %v163_v10 = vld [vmem:[#allocation6 + $0x48] sm:$0xff]  ;;  %v154_v11 = vld [vmem:[#allocation6] sm:$0xff]  ;;  %v156_v13 = vld [vmem:[#allocation6 + $0x10] sm:$0xff] }
  0x1e   :  { %381 = vmatpush.msra.mxu3 %v199_v47  ;;  %259 = vmatpush.msra.mxu0 %v190_v48  ;;  %v155_v12 = vld [vmem:[#allocation6 + $0x8] sm:$0xff]  ;;  %v157_v14 = vld [vmem:[#allocation6 + $0x18] sm:$0xff]  ;;  %v248_v15 = vld [vmem:[#allocation6 + $0x2f0] sm:$0xff] }
  0x1f   :  { %300 = vmatpush.msra.mxu1 %v191_v49  ;;  %341 = vmatpush.msra.mxu2 %v192_v50  ;;  %v249_v16 = vld [vmem:[#allocation6 + $0x2f8] sm:$0xff]  ;;  %v242_v17 = vld [vmem:[#allocation6 + $0x2c0] sm:$0xff]  ;;  %v243_v18 = vld [vmem:[#allocation6 + $0x2c8] sm:$0xff] }
  0x20   :  { %382 = vmatpush.msra.mxu3 %v193_v51  ;;  %260 = vmatpush.msra.mxu0 %v184_v52  ;;  %v236_v19 = vld [vmem:[#allocation6 + $0x290] sm:$0xff]  ;;  %v237_v20 = vld [vmem:[#allocation6 + $0x298] sm:$0xff]  ;;  %v230_v21 = vld [vmem:[#allocation6 + $0x260] sm:$0xff] }
  0x21   :  { %301 = vmatpush.msra.mxu1 %v185_v53  ;;  %342 = vmatpush.msra.mxu2 %v186_v54  ;;  %v231_v22 = vld [vmem:[#allocation6 + $0x268] sm:$0xff]  ;;  %v224_v23 = vld [vmem:[#allocation6 + $0x230] sm:$0xff]  ;;  %v225_v24 = vld [vmem:[#allocation6 + $0x238] sm:$0xff] }
  0x22   :  { %383 = vmatpush.msra.mxu3 %v187_v55  ;;  %261 = vmatpush.msra.mxu0 %v178_v56  ;;  %v218_v25 = vld [vmem:[#allocation6 + $0x200] sm:$0xff]  ;;  %v219_v26 = vld [vmem:[#allocation6 + $0x208] sm:$0xff]  ;;  %v212_v28 = vld [vmem:[#allocation6 + $0x1d0] sm:$0xff] }
  0x23   :  { %302 = vmatpush.msra.mxu1 %v179_v57  ;;  %343 = vmatpush.msra.mxu2 %v180_v58  ;;  %v213_v29 = vld [vmem:[#allocation6 + $0x1d8] sm:$0xff]  ;;  %v206_v30 = vld [vmem:[#allocation6 + $0x1a0] sm:$0xff]  ;;  %v207_v31 = vld [vmem:[#allocation6 + $0x1a8] sm:$0xff] }
  0x24   :  { %384 = vmatpush.msra.mxu3 %v181_v59  ;;  %262 = vmatpush.msra.mxu0 %v172_v60  ;;  %v200_v36 = vld [vmem:[#allocation6 + $0x170] sm:$0xff]  ;;  %v201_v37 = vld [vmem:[#allocation6 + $0x178] sm:$0xff]  ;;  %v194_v38 = vld [vmem:[#allocation6 + $0x140] sm:$0xff] }
  0x25   :  { %303 = vmatpush.msra.mxu1 %v173_v61  ;;  %344 = vmatpush.msra.mxu2 %v174_v62  ;;  %v195_v39 = vld [vmem:[#allocation6 + $0x148] sm:$0xff]  ;;  %v188_v42 = vld [vmem:[#allocation6 + $0x110] sm:$0xff]  ;;  %v189_v43 = vld [vmem:[#allocation6 + $0x118] sm:$0xff] }
  0x26   :  { %385 = vmatpush.msra.mxu3 %v175_v63  ;;  %263 = vmatpush.msra.mxu0 %v166_v1  ;;  %v182_v44 = vld [vmem:[#allocation6 + $0xe0] sm:$0xff]  ;;  %v183_v45 = vld [vmem:[#allocation6 + $0xe8] sm:$0xff]  ;;  %v176_v48 = vld [vmem:[#allocation6 + $0xb0] sm:$0xff] }
  0x27   :  { %304 = vmatpush.msra.mxu1 %v167_v2  ;;  %345 = vmatpush.msra.mxu2 %v168_v3  ;;  %v177_v49 = vld [vmem:[#allocation6 + $0xb8] sm:$0xff]  ;;  %v170_v50 = vld [vmem:[#allocation6 + $0x80] sm:$0xff]  ;;  %v171_v51 = vld [vmem:[#allocation6 + $0x88] sm:$0xff] }
  0x28   :  { %386 = vmatpush.msra.mxu3 %v169_v6  ;;  %264 = vmatpush.msra.mxu0 %v160_v7  ;;  %v164_v54 = vld [vmem:[#allocation6 + $0x50] sm:$0xff]  ;;  %v165_v55 = vld [vmem:[#allocation6 + $0x58] sm:$0xff]  ;;  %v158_v56 = vld [vmem:[#allocation6 + $0x20] sm:$0xff] }
  0x29   :  { %305 = vmatpush.msra.mxu1 %v161_v8  ;;  %346 = vmatpush.msra.mxu2 %v162_v9  ;;  %v159_v58 = vld [vmem:[#allocation6 + $0x28] sm:$0xff] }
  0x2a   :  { %387 = vmatpush.msra.mxu3 %v163_v10  ;;  %265 = vmatpush.msra.mxu0 %v154_v11 }
  0x2b   :  { %306 = vmatpush.msra.mxu1 %v155_v12  ;;  %347 = vmatpush.msra.mxu2 %v156_v13 }
  0x2c   :  { %388 = vmatpush.msra.mxu3 %v157_v14  ;;  %414 = vmatpush.msrb.mxu0 %v248_v15 }
  0x2d   :  { %455 = vmatpush.msrb.mxu1 %v249_v16 }
  0x2e   :  { %415 = vmatpush.msrb.mxu0 %v242_v17 }
  0x2f   :  { %456 = vmatpush.msrb.mxu1 %v243_v18 }
  0x30   :  { %416 = vmatpush.msrb.mxu0 %v236_v19 }
  0x31   :  { %457 = vmatpush.msrb.mxu1 %v237_v20 }
  0x32   :  { %417 = vmatpush.msrb.mxu0 %v230_v21 }
  0x33   :  { %458 = vmatpush.msrb.mxu1 %v231_v22 }
  0x34   :  { %418 = vmatpush.msrb.mxu0 %v224_v23 }
  0x35   :  { %459 = vmatpush.msrb.mxu1 %v225_v24 }
  0x36   :  { %419 = vmatpush.msrb.mxu0 %v218_v25 }
  0x37   :  { %460 = vmatpush.msrb.mxu1 %v219_v26 }
  0x38   :  { %420 = vmatpush.msrb.mxu0 %v212_v28 }
  0x39   :  { %461 = vmatpush.msrb.mxu1 %v213_v29 }
  0x3a   :  { %421 = vmatpush.msrb.mxu0 %v206_v30 }
  0x3b   :  { %462 = vmatpush.msrb.mxu1 %v207_v31 }
  0x3c   :  { %422 = vmatpush.msrb.mxu0 %v200_v36 }
  0x3d   :  { %463 = vmatpush.msrb.mxu1 %v201_v37 }
  0x3e   :  { %423 = vmatpush.msrb.mxu0 %v194_v38 }
  0x3f   :  { %464 = vmatpush.msrb.mxu1 %v195_v39 }
  0x40   :  { %424 = vmatpush.msrb.mxu0 %v188_v42 }
  0x41   :  { %465 = vmatpush.msrb.mxu1 %v189_v43 }
  0x42   :  { %425 = vmatpush.msrb.mxu0 %v182_v44 }
  0x43   :  { %466 = vmatpush.msrb.mxu1 %v183_v45 }
  0x44   :  { %426 = vmatpush.msrb.mxu0 %v176_v48 }
  0x45   :  { %467 = vmatpush.msrb.mxu1 %v177_v49 }
  0x46   :  { %427 = vmatpush.msrb.mxu0 %v170_v50 }
  0x47   :  { %468 = vmatpush.msrb.mxu1 %v171_v51 }
  0x48   :  { %428 = vmatpush.msrb.mxu0 %v164_v54 }
  0x49   :  { %469 = vmatpush.msrb.mxu1 %v165_v55 }
  0x4a   :  { %429 = vmatpush.msrb.mxu0 %v158_v56 }
  0x4b   :  { %470 = vmatpush.msrb.mxu1 %v159_v58 }
  0x63   :  { %v120_v57 = vpop.permute.xlu2 %119 }
  0x64   :  { %vm4564_vm4 = vcmp.eq.s32.totalorder %v4493_v32, %v120_v57 }
  0x6b   :  { %v123_v60 = vpop.permute.xlu2 %122 }
  0x6c   :  { %vm4581_vm5 = vcmp.eq.s32.totalorder %v4493_v32, %v123_v60 }
  0x7a   :  { %v114_v46 = vpop.permute.xlu1 %113 }
  0x7b   :  { %v108_v33 = vpop.permute.xlu0 %107  ;;  %vm4530_vm2 = vcmp.eq.s32.totalorder %v4493_v32, %v114_v46 }
  0x7c   :  { %vm4496_vm0 = vcmp.eq.s32.totalorder %v4493_v32, %v108_v33 }
  0x7d   :  { %3427 = vmatmul.msk.f32.vlgmr.msra.gmra.mxu0 %vm4496_vm0, %v4405_v35  ;;  %3435 = vmatmul.msk.f32.vlgmr.msra.gmra.mxu1 %vm4496_vm0, %v4405_v35 }
  0x7e   :  { %3443 = vmatmul.msk.f32.vlgmr.msra.gmra.mxu2 %vm4496_vm0, %v4405_v35  ;;  %3451 = vmatmul.msk.f32.vlgmr.msra.gmra.mxu3 %vm4496_vm0, %v4405_v35 }
  0x82   :  { %v117_v52 = vpop.permute.xlu1 %116 }
  0x83   :  { %v111_v40 = vpop.permute.xlu0 %110  ;;  %vm4547_vm3 = vcmp.eq.s32.totalorder %v4493_v32, %v117_v52 }
  0x84   :  { %vm4513_vm1 = vcmp.eq.s32.totalorder %v4493_v32, %v111_v40 }
  0x85   :  { %3428 = vmatmul.msk.f32.gmra.mxu0 %vm4513_vm1, %v4405_v35  ;;  %3436 = vmatmul.msk.f32.gmra.mxu1 %vm4513_vm1, %v4405_v35 }
  0x86   :  { %3444 = vmatmul.msk.f32.gmra.mxu2 %vm4513_vm1, %v4405_v35  ;;  %3452 = vmatmul.msk.f32.gmra.mxu3 %vm4513_vm1, %v4405_v35 }
  0x8a   :  { %v129_v1 = vpop.permute.xlu1 %128 }
  0x8b   :  { %v126_v62 = vpop.permute.xlu0 %125  ;;  %vm4615_vm7 = vcmp.eq.s32.totalorder %v4493_v32, %v129_v1 }
  0x8c   :  { %vm4598_vm6 = vcmp.eq.s32.totalorder %v4493_v32, %v126_v62 }
  0x8d   :  { %3429 = vmatmul.msk.f32.gmra.mxu0 %vm4530_vm2, %v4405_v35  ;;  %3437 = vmatmul.msk.f32.gmra.mxu1 %vm4530_vm2, %v4405_v35 }
  0x8e   :  { %3445 = vmatmul.msk.f32.gmra.mxu2 %vm4530_vm2, %v4405_v35  ;;  %3453 = vmatmul.msk.f32.gmra.mxu3 %vm4530_vm2, %v4405_v35 }
  0x95   :  { %3430 = vmatmul.msk.f32.gmra.mxu0 %vm4547_vm3, %v4405_v35  ;;  %3438 = vmatmul.msk.f32.gmra.mxu1 %vm4547_vm3, %v4405_v35 }
  0x96   :  { %3446 = vmatmul.msk.f32.gmra.mxu2 %vm4547_vm3, %v4405_v35  ;;  %3454 = vmatmul.msk.f32.gmra.mxu3 %vm4547_vm3, %v4405_v35 }
  0x9d   :  { %3431 = vmatmul.msk.f32.gmra.mxu0 %vm4564_vm4, %v4405_v35  ;;  %3439 = vmatmul.msk.f32.gmra.mxu1 %vm4564_vm4, %v4405_v35 }
  0x9e   :  { %3447 = vmatmul.msk.f32.gmra.mxu2 %vm4564_vm4, %v4405_v35  ;;  %3455 = vmatmul.msk.f32.gmra.mxu3 %vm4564_vm4, %v4405_v35 }
  0xa5   :  { %3432 = vmatmul.msk.f32.gmra.mxu0 %vm4581_vm5, %v4405_v35  ;;  %3440 = vmatmul.msk.f32.gmra.mxu1 %vm4581_vm5, %v4405_v35 }
  0xa6   :  { %3448 = vmatmul.msk.f32.gmra.mxu2 %vm4581_vm5, %v4405_v35  ;;  %3456 = vmatmul.msk.f32.gmra.mxu3 %vm4581_vm5, %v4405_v35 }
  0xad   :  { %3433 = vmatmul.msk.f32.gmra.mxu0 %vm4598_vm6, %v4405_v35  ;;  %3441 = vmatmul.msk.f32.gmra.mxu1 %vm4598_vm6, %v4405_v35 }
  0xae   :  { %3449 = vmatmul.msk.f32.gmra.mxu2 %vm4598_vm6, %v4405_v35  ;;  %3457 = vmatmul.msk.f32.gmra.mxu3 %vm4598_vm6, %v4405_v35 }
  0xb5   :  { %3434 = vmatmul.msk.f32.gmra.mxu0 %vm4615_vm7, %v4405_v35  ;;  %3442 = vmatmul.msk.f32.gmra.mxu1 %vm4615_vm7, %v4405_v35 }
  0xb6   :  { %3450 = vmatmul.msk.f32.gmra.mxu2 %vm4615_vm7, %v4405_v35  ;;  %3458 = vmatmul.msk.f32.gmra.mxu3 %vm4615_vm7, %v4405_v35 }
  0xbd   :  { %3459 = vmatmul.msk.f32.vlgmr.msrb.gmra.mxu0 %vm4496_vm0, %v4405_v35  ;;  %3467 = vmatmul.msk.f32.vlgmr.msrb.gmra.mxu1 %vm4496_vm0, %v4405_v35 }
  0xc5   :  { %3460 = vmatmul.msk.f32.gmra.mxu0 %vm4513_vm1, %v4405_v35  ;;  %3468 = vmatmul.msk.f32.gmra.mxu1 %vm4513_vm1, %v4405_v35 }
  0xcd   :  { %3461 = vmatmul.msk.f32.gmra.mxu0 %vm4530_vm2, %v4405_v35  ;;  %3469 = vmatmul.msk.f32.gmra.mxu1 %vm4530_vm2, %v4405_v35 }
  0xd5   :  { %3462 = vmatmul.msk.f32.gmra.mxu0 %vm4547_vm3, %v4405_v35  ;;  %3470 = vmatmul.msk.f32.gmra.mxu1 %vm4547_vm3, %v4405_v35 }
  0xdd   :  { %3463 = vmatmul.msk.f32.gmra.mxu0 %vm4564_vm4, %v4405_v35  ;;  %3471 = vmatmul.msk.f32.gmra.mxu1 %vm4564_vm4, %v4405_v35 }
  0xe5   :  { %3464 = vmatmul.msk.f32.gmra.mxu0 %vm4581_vm5, %v4405_v35  ;;  %3472 = vmatmul.msk.f32.gmra.mxu1 %vm4581_vm5, %v4405_v35 }
  0xed   :  { %3465 = vmatmul.msk.f32.gmra.mxu0 %vm4598_vm6, %v4405_v35  ;;  %3473 = vmatmul.msk.f32.gmra.mxu1 %vm4598_vm6, %v4405_v35 }
  0xf5   :  { %3466 = vmatmul.msk.f32.gmra.mxu0 %vm4615_vm7, %v4405_v35  ;;  %3474 = vmatmul.msk.f32.gmra.mxu1 %vm4615_vm7, %v4405_v35 }
  0xfa   :  { %v4691_v3 = vpop.f32.mrf.mxu0  ;;  %v4693_v6 = vpop.f32.mrf.mxu1 }
  0xfb   :  { %6107 = vst [vmem:[#allocation28_spill] sm:$0xff] %v4691_v3 }
  0xfc   :  { %6108 = vst [vmem:[#allocation29_spill] sm:$0xff] %v4693_v6 }
 0x101   :  { %v4695_v7 = vpop.f32.mrf.mxu2  ;;  %v4697_v8 = vpop.f32.mrf.mxu3 }
 0x102   :  { %6109 = vst [vmem:[#allocation30_spill] sm:$0xff] %v4695_v7  ;;  %v4699_v9 = vpop.f32.mrf.mxu0  ;;  %v4701_v10 = vpop.f32.mrf.mxu1 }
 0x103   :  { %6110 = vst [vmem:[#allocation31_spill] sm:$0xff] %v4697_v8 }
 0x104   :  { %6111 = vst [vmem:[#allocation32_spill] sm:$0xff] %v4699_v9 }
 0x105   :  { %6112 = vst [vmem:[#allocation33_spill] sm:$0xff] %v4701_v10 }
 0x109   :  { %v4703_v11 = vpop.f32.mrf.mxu2  ;;  %v4705_v12 = vpop.f32.mrf.mxu3 }
 0x10a   :  { %6113 = vst [vmem:[#allocation34_spill] sm:$0xff] %v4703_v11  ;;  %v4707_v13 = vpop.f32.mrf.mxu0  ;;  %v4709_v14 = vpop.f32.mrf.mxu1 }
 0x10b   :  { %6114 = vst [vmem:[#allocation35_spill] sm:$0xff] %v4705_v12 }
 0x10c   :  { %6115 = vst [vmem:[#allocation36_spill] sm:$0xff] %v4707_v13 }
 0x10d   :  { %6116 = vst [vmem:[#allocation37_spill] sm:$0xff] %v4709_v14 }
 0x111   :  { %v4711_v15 = vpop.f32.mrf.mxu2  ;;  %v4713_v16 = vpop.f32.mrf.mxu3 }
 0x112   :  { %6117 = vst [vmem:[#allocation38_spill] sm:$0xff] %v4711_v15  ;;  %v4715_v17 = vpop.f32.mrf.mxu0  ;;  %v4717_v18 = vpop.f32.mrf.mxu1 }
 0x113   :  { %6118 = vst [vmem:[#allocation39_spill] sm:$0xff] %v4713_v16 }
 0x114   :  { %6119 = vst [vmem:[#allocation40_spill] sm:$0xff] %v4715_v17 }
 0x115   :  { %6120 = vst [vmem:[#allocation41_spill] sm:$0xff] %v4717_v18 }
 0x119   :  { %v4719_v19 = vpop.f32.mrf.mxu2  ;;  %v4721_v20 = vpop.f32.mrf.mxu3 }
 0x11a   :  { %6121 = vst [vmem:[#allocation42_spill] sm:$0xff] %v4719_v19  ;;  %v4723_v21 = vpop.f32.mrf.mxu0  ;;  %v4725_v22 = vpop.f32.mrf.mxu1 }
 0x11b   :  { %6122 = vst [vmem:[#allocation43_spill] sm:$0xff] %v4721_v20 }
 0x11c   :  { %6123 = vst [vmem:[#allocation44_spill] sm:$0xff] %v4723_v21 }
 0x11d   :  { %6124 = vst [vmem:[#allocation45_spill] sm:$0xff] %v4725_v22 }
 0x121   :  { %v4727_v23 = vpop.f32.mrf.mxu2  ;;  %v4729_v24 = vpop.f32.mrf.mxu3 }
 0x122   :  { %6125 = vst [vmem:[#allocation46_spill] sm:$0xff] %v4727_v23  ;;  %v4731_v25 = vpop.f32.mrf.mxu0  ;;  %v4733_v26 = vpop.f32.mrf.mxu1 }
 0x123   :  { %6126 = vst [vmem:[#allocation47_spill] sm:$0xff] %v4729_v24 }
 0x124   :  { %6127 = vst [vmem:[#allocation48_spill] sm:$0xff] %v4731_v25 }
 0x125   :  { %6128 = vst [vmem:[#allocation49_spill] sm:$0xff] %v4733_v26 }
 0x129   :  { %v4735_v27 = vpop.f32.mrf.mxu2  ;;  %v4737_v28 = vpop.f32.mrf.mxu3 }
 0x12a   :  { %6129 = vst [vmem:[#allocation50_spill] sm:$0xff] %v4735_v27  ;;  %v4739_v29 = vpop.f32.mrf.mxu0  ;;  %v4741_v30 = vpop.f32.mrf.mxu1 }
 0x12b   :  { %6130 = vst [vmem:[#allocation51_spill] sm:$0xff] %v4737_v28 }
 0x12c   :  { %6131 = vst [vmem:[#allocation52_spill] sm:$0xff] %v4739_v29 }
 0x12d   :  { %6132 = vst [vmem:[#allocation53_spill] sm:$0xff] %v4741_v30 }
 0x131   :  { %v4743_v31 = vpop.f32.mrf.mxu2  ;;  %v4745_v32 = vpop.f32.mrf.mxu3 }
 0x132   :  { %6133 = vst [vmem:[#allocation54_spill] sm:$0xff] %v4743_v31  ;;  %v4747_v33 = vpop.f32.mrf.mxu0  ;;  %v4749_v34 = vpop.f32.mrf.mxu1 }
 0x133   :  { %6134 = vst [vmem:[#allocation55_spill] sm:$0xff] %v4745_v32 }
 0x134   :  { %6135 = vst [vmem:[#allocation56_spill] sm:$0xff] %v4747_v33 }
 0x135   :  { %6136 = vst [vmem:[#allocation57_spill] sm:$0xff] %v4749_v34 }
 0x139   :  { %v4751_v35 = vpop.f32.mrf.mxu2  ;;  %v4753_v36 = vpop.f32.mrf.mxu3 }
 0x13a   :  { %6137 = vst [vmem:[#allocation58_spill] sm:$0xff] %v4751_v35  ;;  %v4755_v37 = vpop.f32.mrf.mxu0  ;;  %v4757_v38 = vpop.f32.mrf.mxu1 }
 0x13b   :  { %6138 = vst [vmem:[#allocation59_spill] sm:$0xff] %v4753_v36 }
 0x13c   :  { %6139 = vst [vmem:[#allocation60_spill] sm:$0xff] %v4755_v37 }
 0x13d   :  { %6140 = vst [vmem:[#allocation61_spill] sm:$0xff] %v4757_v38 }
 0x142   :  { %v4759_v39 = vpop.f32.mrf.mxu0  ;;  %v4761_v40 = vpop.f32.mrf.mxu1 }
 0x143   :  { %6141 = vst [vmem:[#allocation62_spill] sm:$0xff] %v4759_v39 }
 0x144   :  { %6142 = vst [vmem:[#allocation63_spill] sm:$0xff] %v4761_v40 }
 0x14a   :  { %v4763_v41 = vpop.f32.mrf.mxu0  ;;  %v4765_v42 = vpop.f32.mrf.mxu1 }
 0x14b   :  { %6143 = vst [vmem:[#allocation64_spill] sm:$0xff] %v4763_v41 }
 0x14c   :  { %6144 = vst [vmem:[#allocation65_spill] sm:$0xff] %v4765_v42 }
 0x152   :  { %v4767_v43 = vpop.f32.mrf.mxu0  ;;  %v4769_v44 = vpop.f32.mrf.mxu1 }
 0x153   :  { %6145 = vst [vmem:[#allocation66_spill] sm:$0xff] %v4767_v43 }
 0x154   :  { %6146 = vst [vmem:[#allocation67_spill] sm:$0xff] %v4769_v44 }
 0x15a   :  { %v4771_v45 = vpop.f32.mrf.mxu0  ;;  %v4773_v46 = vpop.f32.mrf.mxu1 }
 0x15b   :  { %6147 = vst [vmem:[#allocation68_spill] sm:$0xff] %v4771_v45 }
 0x15c   :  { %6148 = vst [vmem:[#allocation69_spill] sm:$0xff] %v4773_v46 }
 0x162   :  { %v4775_v47 = vpop.f32.mrf.mxu0  ;;  %v4777_v48 = vpop.f32.mrf.mxu1 }
 0x163   :  { %6149 = vst [vmem:[#allocation70_spill] sm:$0xff] %v4775_v47 }
 0x164   :  { %6150 = vst [vmem:[#allocation71_spill] sm:$0xff] %v4777_v48 }
 0x16a   :  { %v4779_v49 = vpop.f32.mrf.mxu0  ;;  %v4781_v50 = vpop.f32.mrf.mxu1 }
 0x16b   :  { %6151 = vst [vmem:[#allocation72_spill] sm:$0xff] %v4779_v49 }
 0x16c   :  { %6152 = vst [vmem:[#allocation73_spill] sm:$0xff] %v4781_v50 }
 0x172   :  { %v4783_v51 = vpop.f32.mrf.mxu0  ;;  %v4785_v52 = vpop.f32.mrf.mxu1 }
 0x173   :  { %6153 = vst [vmem:[#allocation74_spill] sm:$0xff] %v4783_v51 }
 0x174   :  { %6154 = vst [vmem:[#allocation75_spill] sm:$0xff] %v4785_v52 }
 0x175   :  { %4391 = dma.done.wait [#allocation5], 4096 }
 0x176   :  { %4392 = vsyncadd [#allocation5], 4294963200 }
 0x177   :  { %4393 = dma.done.wait [#allocation5 + $0x1], 4096 }
 0x178   :  { %4394 = vsyncadd [#allocation5 + $0x1], 4294963200 }
 0x179   :  { %4395 = dma.done.wait [#allocation5 + $0x2], 4096 }
 0x17a   :  { %4396 = vsyncadd [#allocation5 + $0x2], 4294963200  ;;  %v3533_v53 = vld [vmem:[#allocation3 + $0x70] sm:$0xf]  ;;  %v3974_v54 = vld [vmem:[#allocation3 + $0x74] sm:$0xf0] }
 0x17b   :  { %v3597_v55 = vld [vmem:[#allocation3 + $0xf0] sm:$0xf]  ;;  %v4787_v56 = vor.u32 %v3974_v54, %v3533_v53  ;;  %v3990_v57 = vld [vmem:[#allocation3 + $0xf4] sm:$0xf0]  ;;  %v3525_v58 = vld [vmem:[#allocation3 + $0x60] sm:$0xf] }
 0x17c   :  { %v3972_v59 = vld [vmem:[#allocation3 + $0x64] sm:$0xf0]  ;;  %v4789_v60 = vor.u32 %v3990_v57, %v3597_v55  ;;  %v3589_v61 = vld [vmem:[#allocation3 + $0xe0] sm:$0xf]  ;;  %v3661_v63 = vld [vmem:[#allocation3 + $0x170] sm:$0xf] }
 0x17d   :  { %6155 = vst [vmem:[#allocation76_spill] sm:$0xff] %v4787_v56  ;;  %v3988_v62 = vld [vmem:[#allocation3 + $0xe4] sm:$0xf0]  ;;  %823 = vmatpush.bf16.msrb.mxu2 %v4787_v56  ;;  %v4792_v1 = vor.u32 %v3972_v59, %v3525_v58  ;;  %v4006_v2 = vld [vmem:[#allocation3 + $0x174] sm:$0xf0] }
 0x17e   :  { %6156 = vst [vmem:[#allocation77_spill] sm:$0xff] %v4789_v60  ;;  %v3725_v0 = vld [vmem:[#allocation3 + $0x1f0] sm:$0xf]  ;;  %v4022_v52 = vld [vmem:[#allocation3 + $0x1f4] sm:$0xf0]  ;;  %836 = vmatpush.bf16.msrb.mxu3 %v4789_v60  ;;  %v4795_v51 = vor.u32 %v3988_v62, %v3589_v61  ;;  %v4797_v53 = vor.u32 %v4006_v2, %v3661_v63 }
 0x17f   :  { %6157 = vst [vmem:[#allocation78_spill] sm:$0xff] %v4792_v1  ;;  %v4799_v54 = vor.u32 %v4022_v52, %v3725_v0  ;;  %v3517_v55 = vld [vmem:[#allocation3 + $0x50] sm:$0xf]  ;;  %v3970_v57 = vld [vmem:[#allocation3 + $0x54] sm:$0xf0] }
 0x180   :  { %6158 = vst [vmem:[#allocation79_spill] sm:$0xff] %v4795_v51  ;;  %v3581_v36 = vld [vmem:[#allocation3 + $0xd0] sm:$0xf]  ;;  %v3986_v35 = vld [vmem:[#allocation3 + $0xd4] sm:$0xf0]  ;;  %1035 = vmatpush.bf16.msra.mxu0 %v4797_v53  ;;  %v4806_v61 = vor.u32 %v3970_v57, %v3517_v55 }
 0x181   :  { %6159 = vst [vmem:[#allocation80_spill] sm:$0xff] %v4797_v53  ;;  %v3653_v34 = vld [vmem:[#allocation3 + $0x160] sm:$0xf]  ;;  %v4004_v33 = vld [vmem:[#allocation3 + $0x164] sm:$0xf0]  ;;  %1048 = vmatpush.bf16.msra.mxu1 %v4799_v54  ;;  %824 = vmatpush.bf16.msrb.mxu2 %v4792_v1  ;;  %v4811_v63 = vor.u32 %v3986_v35, %v3581_v36 }
 0x182   :  { %6160 = vst [vmem:[#allocation81_spill] sm:$0xff] %v4799_v54  ;;  %v4803_v58 = vor.u32 %v4004_v33, %v3653_v34  ;;  %v3717_v59 = vld [vmem:[#allocation3 + $0x1e0] sm:$0xf]  ;;  %v4020_v50 = vld [vmem:[#allocation3 + $0x1e4] sm:$0xf0]  ;;  %837 = vmatpush.bf16.msrb.mxu3 %v4795_v51 }
 0x183   :  { %6162 = vst [vmem:[#allocation83_spill] sm:$0xff] %v4806_v61  ;;  %v4808_v0 = vor.u32 %v4020_v50, %v3717_v59  ;;  %v3509_v52 = vld [vmem:[#allocation3 + $0x40] sm:$0xf]  ;;  %v3968_v62 = vld [vmem:[#allocation3 + $0x44] sm:$0xf0] }
 0x184   :  { %6161 = vst [vmem:[#allocation82_spill] sm:$0xff] %v4803_v58  ;;  %v3645_v2 = vld [vmem:[#allocation3 + $0x150] sm:$0xf]  ;;  %v4002_v49 = vld [vmem:[#allocation3 + $0x154] sm:$0xf0]  ;;  %1036 = vmatpush.bf16.msra.mxu0 %v4803_v58  ;;  %v4820_v59 = vor.u32 %v3968_v62, %v3509_v52 }
 0x185   :  { %6163 = vst [vmem:[#allocation84_spill] sm:$0xff] %v4808_v0  ;;  %v3709_v32 = vld [vmem:[#allocation3 + $0x1d0] sm:$0xf]  ;;  %v3573_v31 = vld [vmem:[#allocation3 + $0xc0] sm:$0xf]  ;;  %1049 = vmatpush.bf16.msra.mxu1 %v4808_v0  ;;  %v4815_v55 = vor.u32 %v4002_v49, %v3645_v2  ;;  %825 = vmatpush.bf16.msrb.mxu2 %v4806_v61 }
 0x186   :  { %6164 = vst [vmem:[#allocation85_spill] sm:$0xff] %v4811_v63  ;;  %v3984_v33 = vld [vmem:[#allocation3 + $0xc4] sm:$0xf0]  ;;  %v4018_v34 = vld [vmem:[#allocation3 + $0x1d4] sm:$0xf0]  ;;  %838 = vmatpush.bf16.msrb.mxu3 %v4811_v63 }
 0x187   :  { %6165 = vst [vmem:[#allocation86_spill] sm:$0xff] %v4815_v55  ;;  %v4817_v50 = vor.u32 %v4018_v34, %v3709_v32  ;;  %v3637_v57 = vld [vmem:[#allocation3 + $0x140] sm:$0xf]  ;;  %v4000_v35 = vld [vmem:[#allocation3 + $0x144] sm:$0xf0]  ;;  %v4823_v29 = vor.u32 %v3984_v33, %v3573_v31 }
 0x188   :  { %6167 = vst [vmem:[#allocation88_spill] sm:$0xff] %v4820_v59  ;;  %v3701_v36 = vld [vmem:[#allocation3 + $0x1c0] sm:$0xf]  ;;  %v4016_v30 = vld [vmem:[#allocation3 + $0x1c4] sm:$0xf0]  ;;  %1037 = vmatpush.bf16.msra.mxu0 %v4815_v55  ;;  %v4827_v32 = vor.u32 %v4000_v35, %v3637_v57 }
 0x189   :  { %6166 = vst [vmem:[#allocation87_spill] sm:$0xff] %v4817_v50  ;;  %v3501_v48 = vld [vmem:[#allocation3 + $0x30] sm:$0xf]  ;;  %v3966_v47 = vld [vmem:[#allocation3 + $0x34] sm:$0xf0]  ;;  %1050 = vmatpush.bf16.msra.mxu1 %v4817_v50  ;;  %v4829_v49 = vor.u32 %v4016_v30, %v3701_v36  ;;  %826 = vmatpush.bf16.msrb.mxu2 %v4820_v59 }
 0x18a   :  { %6168 = vst [vmem:[#allocation89_spill] sm:$0xff] %v4823_v29  ;;  %v3565_v28 = vld [vmem:[#allocation3 + $0xb0] sm:$0xf]  ;;  %v3982_v27 = vld [vmem:[#allocation3 + $0xb4] sm:$0xf0]  ;;  %v4832_v62 = vor.u32 %v3966_v47, %v3501_v48  ;;  %839 = vmatpush.bf16.msrb.mxu3 %v4823_v29 }
 0x18b   :  { %6169 = vst [vmem:[#allocation90_spill] sm:$0xff] %v4827_v32  ;;  %v3629_v52 = vld [vmem:[#allocation3 + $0x130] sm:$0xf]  ;;  %v3998_v2 = vld [vmem:[#allocation3 + $0x134] sm:$0xf0]  ;;  %v4835_v34 = vor.u32 %v3982_v27, %v3565_v28 }
 0x18c   :  { %6170 = vst [vmem:[#allocation91_spill] sm:$0xff] %v4829_v49  ;;  %v3693_v31 = vld [vmem:[#allocation3 + $0x1b0] sm:$0xf]  ;;  %v4014_v33 = vld [vmem:[#allocation3 + $0x1b4] sm:$0xf0]  ;;  %1038 = vmatpush.bf16.msra.mxu0 %v4827_v32  ;;  %v4839_v30 = vor.u32 %v3998_v2, %v3629_v52 }
 0x18d   :  { %6171 = vst [vmem:[#allocation92_spill] sm:$0xff] %v4832_v62  ;;  %v3493_v26 = vld [vmem:[#allocation3 + $0x20] sm:$0xf]  ;;  %v3964_v25 = vld [vmem:[#allocation3 + $0x24] sm:$0xf0]  ;;  %1051 = vmatpush.bf16.msra.mxu1 %v4829_v49  ;;  %v4841_v57 = vor.u32 %v4014_v33, %v3693_v31  ;;  %827 = vmatpush.bf16.msrb.mxu2 %v4832_v62 }
 0x18e   :  { %6172 = vst [vmem:[#allocation93_spill] sm:$0xff] %v4835_v34  ;;  %v3557_v46 = vld [vmem:[#allocation3 + $0xa0] sm:$0xf]  ;;  %v3980_v45 = vld [vmem:[#allocation3 + $0xa4] sm:$0xf0]  ;;  %v4844_v48 = vor.u32 %v3964_v25, %v3493_v26  ;;  %840 = vmatpush.bf16.msrb.mxu3 %v4835_v34 }
 0x18f   :  { %6173 = vst [vmem:[#allocation94_spill] sm:$0xff] %v4839_v30  ;;  %v3621_v47 = vld [vmem:[#allocation3 + $0x120] sm:$0xf]  ;;  %v3996_v35 = vld [vmem:[#allocation3 + $0x124] sm:$0xf0]  ;;  %v4847_v36 = vor.u32 %v3980_v45, %v3557_v46 }
 0x190   :  { %6174 = vst [vmem:[#allocation95_spill] sm:$0xff] %v4841_v57  ;;  %v3685_v27 = vld [vmem:[#allocation3 + $0x1a0] sm:$0xf]  ;;  %v4012_v28 = vld [vmem:[#allocation3 + $0x1a4] sm:$0xf0]  ;;  %1039 = vmatpush.bf16.msra.mxu0 %v4839_v30  ;;  %v4851_v52 = vor.u32 %v3996_v35, %v3621_v47 }
 0x191   :  { %6175 = vst [vmem:[#allocation96_spill] sm:$0xff] %v4844_v48  ;;  %v3485_v24 = vld [vmem:[#allocation3 + $0x10] sm:$0xf]  ;;  %v3962_v23 = vld [vmem:[#allocation3 + $0x14] sm:$0xf0]  ;;  %1052 = vmatpush.bf16.msra.mxu1 %v4841_v57  ;;  %v4853_v2 = vor.u32 %v4012_v28, %v3685_v27  ;;  %828 = vmatpush.bf16.msrb.mxu2 %v4844_v48 }
 0x192   :  { %6176 = vst [vmem:[#allocation97_spill] sm:$0xff] %v4847_v36  ;;  %v3549_v22 = vld [vmem:[#allocation3 + $0x90] sm:$0xf]  ;;  %v3978_v21 = vld [vmem:[#allocation3 + $0x94] sm:$0xf0]  ;;  %v4856_v26 = vor.u32 %v3962_v23, %v3485_v24  ;;  %841 = vmatpush.bf16.msrb.mxu3 %v4847_v36 }
 0x193   :  { %6177 = vst [vmem:[#allocation98_spill] sm:$0xff] %v4851_v52  ;;  %v3613_v25 = vld [vmem:[#allocation3 + $0x110] sm:$0xf]  ;;  %v3994_v31 = vld [vmem:[#allocation3 + $0x114] sm:$0xf0]  ;;  %v4859_v33 = vor.u32 %v3978_v21, %v3549_v22 }
 0x194   :  { %6178 = vst [vmem:[#allocation99_spill] sm:$0xff] %v4853_v2  ;;  %v3677_v45 = vld [vmem:[#allocation3 + $0x190] sm:$0xf]  ;;  %v4010_v46 = vld [vmem:[#allocation3 + $0x194] sm:$0xf0]  ;;  %1040 = vmatpush.bf16.msra.mxu0 %v4851_v52  ;;  %v4863_v24 = vor.u32 %v3994_v31, %v3613_v25 }
 0x195   :  { %6179 = vst [vmem:[#allocation100_spill] sm:$0xff] %v4856_v26  ;;  %v3477_v44 = vld [vmem:[#allocation3] sm:$0xf]  ;;  %v3960_v43 = vld [vmem:[#allocation3 + $0x4] sm:$0xf0]  ;;  %1053 = vmatpush.bf16.msra.mxu1 %v4853_v2  ;;  %v4865_v28 = vor.u32 %v4010_v46, %v3677_v45  ;;  %829 = vmatpush.bf16.msrb.mxu2 %v4856_v26 }
 0x196   :  { %6180 = vst [vmem:[#allocation101_spill] sm:$0xff] %v4859_v33  ;;  %v3541_v20 = vld [vmem:[#allocation3 + $0x80] sm:$0xf]  ;;  %v3976_v19 = vld [vmem:[#allocation3 + $0x84] sm:$0xf0]  ;;  %v4868_v21 = vor.u32 %v3960_v43, %v3477_v44  ;;  %842 = vmatpush.bf16.msrb.mxu3 %v4859_v33 }
 0x197   :  { %v3973_v47 = vld [vmem:[#allocation3 + $0x74] sm:$0xf]  ;;  %v3535_v35 = vld [vmem:[#allocation3 + $0x78] sm:$0xf0]  ;;  %6181 = vst [vmem:[#allocation102_spill] sm:$0xff] %v4863_v24  ;;  %v4871_v42 = vor.u32 %v3976_v19, %v3541_v20 }
 0x198   :  { %v3989_v27 = vld [vmem:[#allocation3 + $0xf4] sm:$0xf]  ;;  %v3599_v23 = vld [vmem:[#allocation3 + $0xf8] sm:$0xf0]  ;;  %6182 = vst [vmem:[#allocation103_spill] sm:$0xff] %v4865_v28  ;;  %v4873_v41 = vor.u32 %v3973_v47, %v3535_v35  ;;  %1041 = vmatpush.bf16.msra.mxu0 %v4863_v24 }
 0x199   :  { %6183 = vst [vmem:[#allocation104_spill] sm:$0xff] %v4868_v21  ;;  %v3971_v22 = vld [vmem:[#allocation3 + $0x64] sm:$0xf]  ;;  %v3605_v18 = vld [vmem:[#allocation3 + $0x100] sm:$0xf]  ;;  %v4875_v25 = vor.u32 %v3989_v27, %v3599_v23  ;;  %1054 = vmatpush.bf16.msra.mxu1 %v4865_v28  ;;  %830 = vmatpush.bf16.msrb.mxu2 %v4868_v21 }
 0x19a   :  { %v3992_v17 = vld [vmem:[#allocation3 + $0x104] sm:$0xf0]  ;;  %6184 = vst [vmem:[#allocation105_spill] sm:$0xff] %v4871_v42  ;;  %v3527_v16 = vld [vmem:[#allocation3 + $0x68] sm:$0xf0]  ;;  %843 = vmatpush.bf16.msrb.mxu3 %v4871_v42 }
 0x19b   :  { %6185 = vst [vmem:[#allocation106_spill] sm:$0xff] %v4873_v41  ;;  %v3793_v15 = vld [vmem:[#allocation3 + $0x270] sm:$0xf]  ;;  %v4038_v14 = vld [vmem:[#allocation3 + $0x274] sm:$0xf0]  ;;  %v4879_v44 = vor.u32 %v3992_v17, %v3605_v18  ;;  %v4886_v47 = vor.u32 %v3971_v22, %v3527_v16 }
 0x19c   :  { %6186 = vst [vmem:[#allocation107_spill] sm:$0xff] %v4875_v25  ;;  %v3987_v31 = vld [vmem:[#allocation3 + $0xe4] sm:$0xf]  ;;  %v3669_v45 = vld [vmem:[#allocation3 + $0x180] sm:$0xf]  ;;  %v4882_v20 = vor.u32 %v4038_v14, %v3793_v15  ;;  %v6193_v15 = vmov 0  }
 0x19d   :  { %v4008_v46 = vld [vmem:[#allocation3 + $0x184] sm:$0xf0]  ;;  %v3591_v43 = vld [vmem:[#allocation3 + $0xe8] sm:$0xf0]  ;;  %6187 = vst [vmem:[#allocation108_spill] sm:$0xff] %v4879_v44  ;;  %849 = vmatpush.bf16.msra.mxu2 %v4873_v41  ;;  %1042 = vmatpush.bf16.msra.mxu0 %v4879_v44 }
 0x19e   :  { %v3857_v13 = vld [vmem:[#allocation3 + $0x2f0] sm:$0xf]  ;;  %v4054_v19 = vld [vmem:[#allocation3 + $0x2f4] sm:$0xf0]  ;;  %6188 = vst [vmem:[#allocation109_spill] sm:$0xff] %v4882_v20  ;;  %v4888_v35 = vor.u32 %v4008_v46, %v3669_v45  ;;  %862 = vmatpush.bf16.msra.mxu3 %v4875_v25  ;;  %v4891_v17 = vor.u32 %v3987_v31, %v3591_v43  ;;  %831 = vmatmul.bf16.vlgmr.msrb.gmra.mxu2 %v6193_v15 }
 0x19f   :  { %6189 = vst [vmem:[#allocation110_spill] sm:$0xff] %v4886_v47  ;;  %v3785_v27 = vld [vmem:[#allocation3 + $0x260] sm:$0xf]  ;;  %v4036_v23 = vld [vmem:[#allocation3 + $0x264] sm:$0xf0]  ;;  %v4893_v18 = vor.u32 %v4054_v19, %v3857_v13  ;;  %844 = vmatmul.bf16.vlgmr.msrb.gmra.mxu3 %v6193_v15 }
 0x1a0   :  { %6190 = vst [vmem:[#allocation111_spill] sm:$0xff] %v4888_v35  ;;  %v3969_v40 = vld [vmem:[#allocation3 + $0x54] sm:$0xf]  ;;  %v3519_v39 = vld [vmem:[#allocation3 + $0x58] sm:$0xf0]  ;;  %v4899_v45 = vor.u32 %v4036_v23, %v3785_v27  ;;  %1055 = vmatpush.bf16.msra.mxu1 %v4888_v35  ;;  %1043 = vmatmul.bf16.vlgmr.msra.gmra.mxu0 %v6193_v15 }
 0x1a1   :  { %6191 = vst [vmem:[#allocation112_spill] sm:$0xff] %v4891_v17  ;;  %v3985_v14 = vld [vmem:[#allocation3 + $0xd4] sm:$0xf]  ;;  %v3583_v12 = vld [vmem:[#allocation3 + $0xd8] sm:$0xf0]  ;;  %1327 = vmatpush.bf16.msrb.mxu0 %v4882_v20  ;;  %850 = vmatpush.bf16.msra.mxu2 %v4886_v47  ;;  %v4903_v13 = vor.u32 %v3969_v40, %v3519_v39 }
 0x1a2   :  { %6192 = vst [vmem:[#allocation113_spill] sm:$0xff] %v4893_v18  ;;  %v3849_v16 = vld [vmem:[#allocation3 + $0x2e0] sm:$0xf]  ;;  %v4052_v22 = vld [vmem:[#allocation3 + $0x2e4] sm:$0xf0]  ;;  %863 = vmatpush.bf16.msra.mxu3 %v4891_v17  ;;  %v4907_v43 = vor.u32 %v3985_v14, %v3583_v12 }
 0x1a3   :  { %6194 = vst [vmem:[#allocation114_spill] sm:$0xff] %v4899_v45  ;;  %v3777_v31 = vld [vmem:[#allocation3 + $0x250] sm:$0xf]  ;;  %v4034_v46 = vld [vmem:[#allocation3 + $0x254] sm:$0xf0]  ;;  %v4909_v19 = vor.u32 %v4052_v22, %v3849_v16  ;;  %1056 = vmatmul.bf16.vlgmr.msra.gmra.mxu1 %v6193_v15 }
 0x1a4   :  { %6195 = vst [vmem:[#allocation115_spill] sm:$0xff] %v4903_v13  ;;  %1340 = vmatpush.bf16.msrb.mxu1 %v4893_v18  ;;  %v3967_v11 = vld [vmem:[#allocation3 + $0x44] sm:$0xf]  ;;  %v3511_v10 = vld [vmem:[#allocation3 + $0x48] sm:$0xf0]  ;;  %v4913_v39 = vor.u32 %v4034_v46, %v3777_v31 }
 0x1a5   :  { %6196 = vst [vmem:[#allocation116_spill] sm:$0xff] %v4907_v43  ;;  %v3983_v27 = vld [vmem:[#allocation3 + $0xc4] sm:$0xf]  ;;  %v3575_v23 = vld [vmem:[#allocation3 + $0xc8] sm:$0xf0]  ;;  %1328 = vmatpush.bf16.msrb.mxu0 %v4899_v45  ;;  %851 = vmatpush.bf16.msra.mxu2 %v4903_v13  ;;  %v4917_v12 = vor.u32 %v3967_v11, %v3511_v10 }
 0x1a6   :  { %6197 = vst [vmem:[#allocation117_spill] sm:$0xff] %v4909_v19  ;;  %v3841_v9 = vld [vmem:[#allocation3 + $0x2d0] sm:$0xf]  ;;  %v4050_v38 = vld [vmem:[#allocation3 + $0x2d4] sm:$0xf0]  ;;  %864 = vmatpush.bf16.msra.mxu3 %v4907_v43  ;;  %v4921_v16 = vor.u32 %v3983_v27, %v3575_v23 }
 0x1a7   :  { %6198 = vst [vmem:[#allocation118_spill] sm:$0xff] %v4913_v39  ;;  %v3769_v40 = vld [vmem:[#allocation3 + $0x240] sm:$0xf]  ;;  %v4032_v14 = vld [vmem:[#allocation3 + $0x244] sm:$0xf0]  ;;  %v4923_v22 = vor.u32 %v4050_v38, %v3841_v9 }
 0x1a8   :  { %6199 = vst [vmem:[#allocation119_spill] sm:$0xff] %v4917_v12  ;;  %1341 = vmatpush.bf16.msrb.mxu1 %v4909_v19  ;;  %v3965_v18 = vld [vmem:[#allocation3 + $0x34] sm:$0xf]  ;;  %v3503_v5 = vld [vmem:[#allocation3 + $0x38] sm:$0xf0]  ;;  %v4926_v10 = vor.u32 %v4032_v14, %v3769_v40 }
 0x1a9   :  { %6200 = vst [vmem:[#allocation120_spill] sm:$0xff] %v4921_v16  ;;  %v3981_v31 = vld [vmem:[#allocation3 + $0xb4] sm:$0xf]  ;;  %v3567_v46 = vld [vmem:[#allocation3 + $0xb8] sm:$0xf0]  ;;  %1329 = vmatpush.bf16.msrb.mxu0 %v4913_v39  ;;  %852 = vmatpush.bf16.msra.mxu2 %v4917_v12  ;;  %v4929_v11 = vor.u32 %v3965_v18, %v3503_v5 }
 0x1aa   :  { %6201 = vst [vmem:[#allocation121_spill] sm:$0xff] %v4923_v22  ;;  %v3833_v8 = vld [vmem:[#allocation3 + $0x2c0] sm:$0xf]  ;;  %v4048_v45 = vld [vmem:[#allocation3 + $0x2c4] sm:$0xf0]  ;;  %865 = vmatpush.bf16.msra.mxu3 %v4921_v16  ;;  %v4933_v9 = vor.u32 %v3981_v31, %v3567_v46 }
 0x1ab   :  { %6202 = vst [vmem:[#allocation122_spill] sm:$0xff] %v4926_v10  ;;  %v3761_v20 = vld [vmem:[#allocation3 + $0x230] sm:$0xf]  ;;  %v4030_v19 = vld [vmem:[#allocation3 + $0x234] sm:$0xf0]  ;;  %v4935_v38 = vor.u32 %v4048_v45, %v3833_v8 }
 0x1ac   :  { %6203 = vst [vmem:[#allocation123_spill] sm:$0xff] %v4929_v11  ;;  %1342 = vmatpush.bf16.msrb.mxu1 %v4923_v22  ;;  %v3963_v27 = vld [vmem:[#allocation3 + $0x24] sm:$0xf]  ;;  %v3495_v23 = vld [vmem:[#allocation3 + $0x28] sm:$0xf0]  ;;  %v4938_v5 = vor.u32 %v4030_v19, %v3761_v20 }
 0x1ad   :  { %6204 = vst [vmem:[#allocation124_spill] sm:$0xff] %v4933_v9  ;;  %v3979_v6 = vld [vmem:[#allocation3 + $0xa4] sm:$0xf]  ;;  %v3559_v39 = vld [vmem:[#allocation3 + $0xa8] sm:$0xf0]  ;;  %1330 = vmatpush.bf16.msrb.mxu0 %v4926_v10  ;;  %853 = vmatpush.bf16.msra.mxu2 %v4929_v11  ;;  %v4941_v18 = vor.u32 %v3963_v27, %v3495_v23 }
 0x1ae   :  { %6205 = vst [vmem:[#allocation125_spill] sm:$0xff] %v4935_v38  ;;  %v3825_v40 = vld [vmem:[#allocation3 + $0x2b0] sm:$0xf]  ;;  %v4046_v14 = vld [vmem:[#allocation3 + $0x2b4] sm:$0xf0]  ;;  %866 = vmatpush.bf16.msra.mxu3 %v4933_v9  ;;  %v4945_v8 = vor.u32 %v3979_v6, %v3559_v39 }
 0x1af   :  { %6206 = vst [vmem:[#allocation126_spill] sm:$0xff] %v4938_v5  ;;  %v3753_v37 = vld [vmem:[#allocation3 + $0x220] sm:$0xf]  ;;  %v4028_v22 = vld [vmem:[#allocation3 + $0x224] sm:$0xf0]  ;;  %v4947_v45 = vor.u32 %v4046_v14, %v3825_v40 }
 0x1b0   :  { %6207 = vst [vmem:[#allocation127_spill] sm:$0xff] %v4941_v18  ;;  %1343 = vmatpush.bf16.msrb.mxu1 %v4935_v38  ;;  %v3961_v31 = vld [vmem:[#allocation3 + $0x14] sm:$0xf]  ;;  %v3487_v46 = vld [vmem:[#allocation3 + $0x18] sm:$0xf0]  ;;  %v4950_v27 = vor.u32 %v4028_v22, %v3753_v37 }
 0x1b1   :  { %6208 = vst [vmem:[#allocation128_spill] sm:$0xff] %v4945_v8  ;;  %v3977_v4 = vld [vmem:[#allocation3 + $0x94] sm:$0xf]  ;;  %v3551_v10 = vld [vmem:[#allocation3 + $0x98] sm:$0xf0]  ;;  %1331 = vmatpush.bf16.msrb.mxu0 %v4938_v5  ;;  %854 = vmatpush.bf16.msra.mxu2 %v4941_v18  ;;  %v4953_v23 = vor.u32 %v3961_v31, %v3487_v46 }
 0x1b2   :  { %6209 = vst [vmem:[#allocation129_spill] sm:$0xff] %v4947_v45  ;;  %v3817_v20 = vld [vmem:[#allocation3 + $0x2a0] sm:$0xf]  ;;  %v4044_v19 = vld [vmem:[#allocation3 + $0x2a4] sm:$0xf0]  ;;  %867 = vmatpush.bf16.msra.mxu3 %v4945_v8  ;;  %v4957_v39 = vor.u32 %v3977_v4, %v3551_v10 }
 0x1b3   :  { %6210 = vst [vmem:[#allocation130_spill] sm:$0xff] %v4950_v27  ;;  %v3959_v3 = vld [vmem:[#allocation3 + $0x4] sm:$0xf]  ;;  %v3745_v38 = vld [vmem:[#allocation3 + $0x210] sm:$0xf]  ;;  %v4959_v40 = vor.u32 %v4044_v19, %v3817_v20 }
 0x1b4   :  { %6211 = vst [vmem:[#allocation131_spill] sm:$0xff] %v4953_v23  ;;  %v4026_v6 = vld [vmem:[#allocation3 + $0x214] sm:$0xf0]  ;;  %1344 = vmatpush.bf16.msrb.mxu1 %v4947_v45  ;;  %v3479_v14 = vld [vmem:[#allocation3 + $0x8] sm:$0xf0] }
 0x1b5   :  { %6212 = vst [vmem:[#allocation132_spill] sm:$0xff] %v4957_v39  ;;  %v3975_v7 = vld [vmem:[#allocation3 + $0x84] sm:$0xf]  ;;  %v3543_v5 = vld [vmem:[#allocation3 + $0x88] sm:$0xf0]  ;;  %1332 = vmatpush.bf16.msrb.mxu0 %v4950_v27  ;;  %v4962_v46 = vor.u32 %v4026_v6, %v3745_v38  ;;  %855 = vmatpush.bf16.msra.mxu2 %v4953_v23  ;;  %v4965_v45 = vor.u32 %v3959_v3, %v3479_v14 }
 0x1b6   :  { %6213 = vst [vmem:[#allocation133_spill] sm:$0xff] %v4959_v40  ;;  %v4005_v37 = vld [vmem:[#allocation3 + $0x174] sm:$0xf]  ;;  %v3663_v22 = vld [vmem:[#allocation3 + $0x178] sm:$0xf0]  ;;  %868 = vmatpush.bf16.msra.mxu3 %v4957_v39  ;;  %v4969_v20 = vor.u32 %v3975_v7, %v3543_v5 }
 0x1b7   :  { %v4021_v9 = vld [vmem:[#allocation3 + $0x1f4] sm:$0xf]  ;;  %v3727_v31 = vld [vmem:[#allocation3 + $0x1f8] sm:$0xf0]  ;;  %v3809_v18 = vld [vmem:[#allocation3 + $0x290] sm:$0xf]  ;;  %v4971_v19 = vor.u32 %v4005_v37, %v3663_v22 }
 0x1b8   :  { %v4042_v11 = vld [vmem:[#allocation3 + $0x294] sm:$0xf0]  ;;  %6214 = vst [vmem:[#allocation134_spill] sm:$0xff] %v4965_v45  ;;  %v3737_v4 = vld [vmem:[#allocation3 + $0x200] sm:$0xf]  ;;  %1345 = vmatpush.bf16.msrb.mxu1 %v4959_v40  ;;  %v4973_v27 = vor.u32 %v4021_v9, %v3727_v31 }
 0x1b9   :  { %v4024_v10 = vld [vmem:[#allocation3 + $0x204] sm:$0xf0]  ;;  %6215 = vst [vmem:[#allocation135_spill] sm:$0xff] %v4969_v20  ;;  %v4975_v38 = vor.u32 %v4042_v11, %v3809_v18  ;;  %v4003_v6 = vld [vmem:[#allocation3 + $0x164] sm:$0xf]  ;;  %1333 = vmatpush.bf16.msrb.mxu0 %v4962_v46  ;;  %856 = vmatpush.bf16.msra.mxu2 %v4965_v45 }
 0x1ba   :  { %6216 = vst [vmem:[#allocation136_spill] sm:$0xff] %v4971_v19  ;;  %v3655_v8 = vld [vmem:[#allocation3 + $0x168] sm:$0xf0]  ;;  %v4019_v16 = vld [vmem:[#allocation3 + $0x1e4] sm:$0xf]  ;;  %v4978_v14 = vor.u32 %v4024_v10, %v3737_v4  ;;  %869 = vmatpush.bf16.msra.mxu3 %v4969_v20 }
 0x1bb   :  { %6217 = vst [vmem:[#allocation137_spill] sm:$0xff] %v4973_v27  ;;  %v3719_v3 = vld [vmem:[#allocation3 + $0x1e8] sm:$0xf0]  ;;  %v3801_v23 = vld [vmem:[#allocation3 + $0x280] sm:$0xf]  ;;  %v4983_v7 = vor.u32 %v4003_v6, %v3655_v8 }
 0x1bc   :  { %6218 = vst [vmem:[#allocation138_spill] sm:$0xff] %v4975_v38  ;;  %v4040_v39 = vld [vmem:[#allocation3 + $0x284] sm:$0xf0]  ;;  %1346 = vmatpush.bf16.msrb.mxu1 %v4975_v38  ;;  %v4987_v11 = vor.u32 %v4019_v16, %v3719_v3  ;;  %v4001_v5 = vld [vmem:[#allocation3 + $0x154] sm:$0xf]  ;;  %857 = vmatmul.bf16.vlgmr.msra.gmra.mxu2 %v6193_v15 }
 0x1bd   :  { %6219 = vst [vmem:[#allocation139_spill] sm:$0xff] %v4978_v14  ;;  %1061 = vmatpush.bf16.msrb.mxu2 %v4971_v19  ;;  %v4989_v9 = vor.u32 %v4040_v39, %v3801_v23  ;;  %v3647_v18 = vld [vmem:[#allocation3 + $0x158] sm:$0xf0]  ;;  %1334 = vmatpush.bf16.msrb.mxu0 %v4978_v14  ;;  %v4017_v37 = vld [vmem:[#allocation3 + $0x1d4] sm:$0xf] }
 0x1be   :  { %6220 = vst [vmem:[#allocation140_spill] sm:$0xff] %v4983_v7  ;;  %1074 = vmatpush.bf16.msrb.mxu3 %v4973_v27  ;;  %v3711_v22 = vld [vmem:[#allocation3 + $0x1d8] sm:$0xf0]  ;;  %v4996_v8 = vor.u32 %v4001_v5, %v3647_v18  ;;  %v3999_v23 = vld [vmem:[#allocation3 + $0x144] sm:$0xf] }
 0x1bf   :  { %6221 = vst [vmem:[#allocation141_spill] sm:$0xff] %v4987_v11  ;;  %870 = vmatmul.bf16.vlgmr.msra.gmra.mxu3 %v6193_v15  ;;  %v5000_v16 = vor.u32 %v4017_v37, %v3711_v22  ;;  %v3639_v39 = vld [vmem:[#allocation3 + $0x148] sm:$0xf0]  ;;  %v4015_v31 = vld [vmem:[#allocation3 + $0x1c4] sm:$0xf] }
 0x1c0   :  { %6222 = vst [vmem:[#allocation142_spill] sm:$0xff] %v4989_v9  ;;  %1347 = vmatpush.bf16.msrb.mxu1 %v4989_v9  ;;  %1335 = vmatmul.bf16.vlgmr.msrb.gmra.mxu0 %v6193_v15  ;;  %v3703_v4 = vld [vmem:[#allocation3 + $0x1c8] sm:$0xf0]  ;;  %v5007_v10 = vor.u32 %v3999_v23, %v3639_v39  ;;  %v3997_v3 = vld [vmem:[#allocation3 + $0x134] sm:$0xf] }
 0x1c1   :  { %1402 = vmatpush.bf16.msra.mxu0 %v4787_v56  ;;  %1062 = vmatpush.bf16.msrb.mxu2 %v4983_v7  ;;  %6223 = vst [vmem:[#allocation143_spill] sm:$0xff] %v4996_v8  ;;  %v5010_v6 = vor.u32 %v4015_v31, %v3703_v4  ;;  %v3631_v5 = vld [vmem:[#allocation3 + $0x138] sm:$0xf0]  ;;  %v4013_v18 = vld [vmem:[#allocation3 + $0x1b4] sm:$0xf] }
 0x1c2   :  { %1075 = vmatpush.bf16.msrb.mxu3 %v4987_v11  ;;  %6224 = vst [vmem:[#allocation144_spill] sm:$0xff] %v5000_v16  ;;  %v3695_v37 = vld [vmem:[#allocation3 + $0x1b8] sm:$0xf0]  ;;  %v5015_v22 = vor.u32 %v3997_v3, %v3631_v5  ;;  %v3995_v39 = vld [vmem:[#allocation3 + $0x124] sm:$0xf] }
 0x1c3   :  { %1348 = vmatmul.bf16.vlgmr.msrb.gmra.mxu1 %v6193_v15  ;;  %6225 = vst [vmem:[#allocation145_spill] sm:$0xff] %v5007_v10  ;;  %v5018_v23 = vor.u32 %v4013_v18, %v3695_v37  ;;  %v4011_v31 = vld [vmem:[#allocation3 + $0x1a4] sm:$0xf]  ;;  %v3687_v4 = vld [vmem:[#allocation3 + $0x1a8] sm:$0xf0] }
 0x1c4   :  { %1415 = vmatpush.bf16.msra.mxu1 %v4789_v60  ;;  %6226 = vst [vmem:[#allocation146_spill] sm:$0xff] %v5010_v6  ;;  %v3623_v60 = vld [vmem:[#allocation3 + $0x128] sm:$0xf0]  ;;  %v5026_v3 = vor.u32 %v4011_v31, %v3687_v4  ;;  %v3993_v5 = vld [vmem:[#allocation3 + $0x114] sm:$0xf] }
 0x1c5   :  { %1403 = vmatpush.bf16.msra.mxu0 %v4792_v1  ;;  %1063 = vmatpush.bf16.msrb.mxu2 %v4996_v8  ;;  %6227 = vst [vmem:[#allocation147_spill] sm:$0xff] %v5015_v22  ;;  %v3615_v9 = vld [vmem:[#allocation3 + $0x118] sm:$0xf0]  ;;  %v4009_v18 = vld [vmem:[#allocation3 + $0x194] sm:$0xf] }
 0x1c6   :  { %1076 = vmatpush.bf16.msrb.mxu3 %v5000_v16  ;;  %6228 = vst [vmem:[#allocation148_spill] sm:$0xff] %v5018_v23  ;;  %v3679_v37 = vld [vmem:[#allocation3 + $0x198] sm:$0xf0]  ;;  %v3607_v38 = vld [vmem:[#allocation3 + $0x108] sm:$0xf0] }
 0x1c7   :  { %6230 = vst [vmem:[#allocation150_spill] sm:$0xff] %v5026_v3  ;;  %v4007_v31 = vld [vmem:[#allocation3 + $0x184] sm:$0xf]  ;;  %v3671_v4 = vld [vmem:[#allocation3 + $0x188] sm:$0xf0] }
 0x1c8   :  { %1416 = vmatpush.bf16.msra.mxu1 %v4795_v51  ;;  %v5023_v51 = vor.u32 %v3995_v39, %v3623_v60  ;;  %v5034_v60 = vor.u32 %v4009_v18, %v3679_v37  ;;  %v3991_v39 = vld [vmem:[#allocation3 + $0x104] sm:$0xf]  ;;  %v4037_v40 = vld [vmem:[#allocation3 + $0x274] sm:$0xf]  ;;  %v3787_v1 = vld [vmem:[#allocation3 + $0x268] sm:$0xf0] }
 0x1c9   :  { %1404 = vmatpush.bf16.msra.mxu0 %v4806_v61  ;;  %1064 = vmatpush.bf16.msrb.mxu2 %v5007_v10  ;;  %v4053_v61 = vld [vmem:[#allocation3 + $0x2f4] sm:$0xf]  ;;  %v3851_v56 = vld [vmem:[#allocation3 + $0x2e8] sm:$0xf0] }
 0x1ca   :  { %1077 = vmatpush.bf16.msrb.mxu3 %v5010_v6  ;;  %6229 = vst [vmem:[#allocation149_spill] sm:$0xff] %v5023_v51 }
 0x1cb   :  { %6232 = vst [vmem:[#allocation152_spill] sm:$0xff] %v5034_v60 }
 0x1cc   :  { %1417 = vmatpush.bf16.msra.mxu1 %v4811_v63  ;;  %v5031_v63 = vor.u32 %v3993_v5, %v3615_v9  ;;  %v5039_v9 = vor.u32 %v3991_v39, %v3607_v38  ;;  %v5042_v5 = vor.u32 %v4007_v31, %v3671_v4  ;;  %v3843_v39 = vld [vmem:[#allocation3 + $0x2d8] sm:$0xf0]  ;;  %v4047_v31 = vld [vmem:[#allocation3 + $0x2c4] sm:$0xf]  ;;  %v3835_v4 = vld [vmem:[#allocation3 + $0x2c8] sm:$0xf0] }
 0x1cd   :  { %1405 = vmatpush.bf16.msra.mxu0 %v4820_v59  ;;  %1065 = vmatpush.bf16.msrb.mxu2 %v5015_v22  ;;  %v3795_v59 = vld [vmem:[#allocation3 + $0x278] sm:$0xf0] }
 0x1ce   :  { %1078 = vmatpush.bf16.msrb.mxu3 %v5018_v23  ;;  %6231 = vst [vmem:[#allocation151_spill] sm:$0xff] %v5031_v63  ;;  %v5044_v18 = vor.u32 %v4037_v40, %v3795_v59  ;;  %v3779_v59 = vld [vmem:[#allocation3 + $0x258] sm:$0xf0]  ;;  %v4049_v40 = vld [vmem:[#allocation3 + $0x2d4] sm:$0xf] }
 0x1cf   :  { %6233 = vst [vmem:[#allocation153_spill] sm:$0xff] %v5039_v9 }
 0x1d0   :  { %1418 = vmatpush.bf16.msra.mxu1 %v4823_v29  ;;  %v3859_v29 = vld [vmem:[#allocation3 + $0x2f8] sm:$0xf0]  ;;  %6234 = vst [vmem:[#allocation154_spill] sm:$0xff] %v5042_v5 }
 0x1d1   :  { %1406 = vmatpush.bf16.msra.mxu0 %v4832_v62  ;;  %1066 = vmatpush.bf16.msrb.mxu2 %v5023_v51  ;;  %v5046_v37 = vor.u32 %v4053_v61, %v3859_v29  ;;  %v4035_v62 = vld [vmem:[#allocation3 + $0x264] sm:$0xf]  ;;  %v4033_v61 = vld [vmem:[#allocation3 + $0x254] sm:$0xf] }
 0x1d2   :  { %1079 = vmatpush.bf16.msrb.mxu3 %v5026_v3  ;;  %v5053_v38 = vor.u32 %v4035_v62, %v3787_v1  ;;  %v5064_v1 = vor.u32 %v4033_v61, %v3779_v59  ;;  %v4031_v62 = vld [vmem:[#allocation3 + $0x244] sm:$0xf]  ;;  %v5076_v61 = vor.u32 %v4047_v31, %v3835_v4  ;;  %v4029_v59 = vld [vmem:[#allocation3 + $0x234] sm:$0xf]  ;;  %v3819_v4 = vld [vmem:[#allocation3 + $0x2a8] sm:$0xf0] }
 0x1d3   :  { %v4043_v31 = vld [vmem:[#allocation3 + $0x2a4] sm:$0xf] }
 0x1d4   :  { %1419 = vmatpush.bf16.msra.mxu1 %v4835_v34  ;;  %v4051_v34 = vld [vmem:[#allocation3 + $0x2e4] sm:$0xf]  ;;  %6235 = vst [vmem:[#allocation155_spill] sm:$0xff] %v5076_v61 }
 0x1d5   :  { %1407 = vmatpush.bf16.msra.mxu0 %v4844_v48  ;;  %1067 = vmatpush.bf16.msrb.mxu2 %v5031_v63  ;;  %v5056_v29 = vor.u32 %v4051_v34, %v3851_v56  ;;  %v5067_v56 = vor.u32 %v4049_v40, %v3843_v39  ;;  %v3771_v34 = vld [vmem:[#allocation3 + $0x248] sm:$0xf0]  ;;  %v3763_v40 = vld [vmem:[#allocation3 + $0x238] sm:$0xf0]  ;;  %v4045_v39 = vld [vmem:[#allocation3 + $0x2b4] sm:$0xf] }
 0x1d6   :  { %1080 = vmatpush.bf16.msrb.mxu3 %v5034_v60 }
 0x1d8   :  { %1420 = vmatpush.bf16.msra.mxu1 %v4847_v36  ;;  %v3827_v36 = vld [vmem:[#allocation3 + $0x2b8] sm:$0xf0] }
 0x1d9   :  { %1408 = vmatpush.bf16.msra.mxu0 %v4856_v26  ;;  %1068 = vmatpush.bf16.msrb.mxu2 %v5039_v9 }
 0x1da   :  { %1081 = vmatpush.bf16.msrb.mxu3 %v5042_v5 }
 0x1dc   :  { %1421 = vmatpush.bf16.msra.mxu1 %v4859_v33  ;;  %1069 = vmatmul.bf16.vlgmr.msrb.gmra.mxu2 %v6193_v15  ;;  %v5073_v33 = vor.u32 %v4031_v62, %v3771_v34  ;;  %v5084_v62 = vor.u32 %v4045_v39, %v3827_v36  ;;  %v4027_v34 = vld [vmem:[#allocation3 + $0x224] sm:$0xf]  ;;  %v4041_v36 = vld [vmem:[#allocation3 + $0x294] sm:$0xf]  ;;  %v3811_v39 = vld [vmem:[#allocation3 + $0x298] sm:$0xf0] }
 0x1dd   :  { %1353 = vmatpush.bf16.msra.mxu2 %v5044_v18  ;;  %1409 = vmatpush.bf16.msra.mxu0 %v4868_v21 }
 0x1de   :  { %1366 = vmatpush.bf16.msra.mxu3 %v5046_v37  ;;  %6236 = vst [vmem:[#allocation156_spill] sm:$0xff] %v5084_v62 }
 0x1df   :  { %1082 = vmatmul.bf16.vlgmr.msrb.gmra.mxu3 %v6193_v15 }
 0x1e0   :  { %1422 = vmatpush.bf16.msra.mxu1 %v4871_v42  ;;  %v3755_v42 = vld [vmem:[#allocation3 + $0x228] sm:$0xf0] }
 0x1e1   :  { %1454 = vmatpush.bf16.msrb.mxu0 %v4797_v53  ;;  %1354 = vmatpush.bf16.msra.mxu2 %v5053_v38 }
 0x1e2   :  { %1367 = vmatpush.bf16.msra.mxu3 %v5056_v29 }
 0x1e4   :  { %1467 = vmatpush.bf16.msrb.mxu1 %v4799_v54  ;;  %v5081_v54 = vor.u32 %v4029_v59, %v3763_v40  ;;  %v5092_v59 = vor.u32 %v4043_v31, %v3819_v4  ;;  %v4025_v40 = vld [vmem:[#allocation3 + $0x214] sm:$0xf]  ;;  %v4039_v31 = vld [vmem:[#allocation3 + $0x284] sm:$0xf]  ;;  %v3803_v4 = vld [vmem:[#allocation3 + $0x288] sm:$0xf0] }
 0x1e5   :  { %1455 = vmatpush.bf16.msrb.mxu0 %v4803_v58  ;;  %1355 = vmatpush.bf16.msra.mxu2 %v5064_v1 }
 0x1e6   :  { %1368 = vmatpush.bf16.msra.mxu3 %v5067_v56 }
 0x1e8   :  { %1468 = vmatpush.bf16.msrb.mxu1 %v4808_v0  ;;  %v5089_v0 = vor.u32 %v4027_v34, %v3755_v42  ;;  %v5100_v42 = vor.u32 %v4041_v36, %v3811_v39  ;;  %v4023_v34 = vld [vmem:[#allocation3 + $0x204] sm:$0xf]  ;;  %v6241_v36 = vld [vmem:[#allocation124_spill] sm:$0xff]  ;;  %v6242_v39 = vld [vmem:[#allocation127_spill] sm:$0xff] }
 0x1e9   :  { %1456 = vmatpush.bf16.msrb.mxu0 %v4815_v55  ;;  %1356 = vmatpush.bf16.msra.mxu2 %v5073_v33 }
 0x1ea   :  { %1369 = vmatpush.bf16.msra.mxu3 %v5076_v61  ;;  %v3747_v61 = vld [vmem:[#allocation3 + $0x218] sm:$0xf0] }
 0x1ec   :  { %1469 = vmatpush.bf16.msrb.mxu1 %v4817_v50  ;;  %v5097_v50 = vor.u32 %v4025_v40, %v3747_v61  ;;  %v5108_v61 = vor.u32 %v4039_v31, %v3803_v4  ;;  %v6240_v40 = vld [vmem:[#allocation123_spill] sm:$0xff]  ;;  %v6245_v31 = vld [vmem:[#allocation132_spill] sm:$0xff] }
 0x1ed   :  { %1457 = vmatpush.bf16.msrb.mxu0 %v4827_v32  ;;  %1357 = vmatpush.bf16.msra.mxu2 %v5081_v54 }
 0x1ee   :  { %1370 = vmatpush.bf16.msra.mxu3 %v5084_v62  ;;  %v3739_v62 = vld [vmem:[#allocation3 + $0x208] sm:$0xf0]  ;;  %6238 = vst [vmem:[#allocation158_spill] sm:$0xff] %v5108_v61 }
 0x1f0   :  { %1470 = vmatpush.bf16.msrb.mxu1 %v4829_v49  ;;  %v5105_v49 = vor.u32 %v4023_v34, %v3739_v62  ;;  %v6239_v62 = vld [vmem:[#allocation120_spill] sm:$0xff]  ;;  %v6244_v34 = vld [vmem:[#allocation131_spill] sm:$0xff] }
 0x1f1   :  { %1458 = vmatpush.bf16.msrb.mxu0 %v4839_v30  ;;  %1358 = vmatpush.bf16.msra.mxu2 %v5089_v0 }
 0x1f2   :  { %1371 = vmatpush.bf16.msra.mxu3 %v5092_v59  ;;  %6237 = vst [vmem:[#allocation157_spill] sm:$0xff] %v5105_v49 }
 0x1f4   :  { %1471 = vmatpush.bf16.msrb.mxu1 %v4841_v57 }
 0x1f5   :  { %1459 = vmatpush.bf16.msrb.mxu0 %v4851_v52  ;;  %1359 = vmatpush.bf16.msra.mxu2 %v5097_v50 }
 0x1f6   :  { %1372 = vmatpush.bf16.msra.mxu3 %v5100_v42 }
 0x1f8   :  { %1472 = vmatpush.bf16.msrb.mxu1 %v4853_v2 }
 0x1f9   :  { %1460 = vmatpush.bf16.msrb.mxu0 %v4863_v24  ;;  %1360 = vmatpush.bf16.msra.mxu2 %v5105_v49 }
 0x1fa   :  { %1373 = vmatpush.bf16.msra.mxu3 %v5108_v61 }
 0x1fc   :  { %1473 = vmatpush.bf16.msrb.mxu1 %v4865_v28  ;;  %1361 = vmatmul.bf16.vlgmr.msra.gmra.mxu2 %v6193_v15 }
 0x1fd   :  { %1428 = vmatpush.bf16.msrb.mxu2 %v4873_v41  ;;  %1461 = vmatpush.bf16.msrb.mxu0 %v4879_v44 }
 0x1fe   :  { %1441 = vmatpush.bf16.msrb.mxu3 %v4875_v25 }
 0x1ff   :  { %1374 = vmatmul.bf16.vlgmr.msra.gmra.mxu3 %v6193_v15  ;;  %v6243_v15 = vld [vmem:[#allocation128_spill] sm:$0xff] }
 0x200   :  { %1474 = vmatpush.bf16.msrb.mxu1 %v4888_v35 }
 0x201   :  { %1429 = vmatpush.bf16.msrb.mxu2 %v4886_v47 }
 0x202   :  { %1442 = vmatpush.bf16.msrb.mxu3 %v4891_v17 }
 0x205   :  { %1430 = vmatpush.bf16.msrb.mxu2 %v4903_v13 }
 0x206   :  { %1443 = vmatpush.bf16.msrb.mxu3 %v4907_v43 }
 0x209   :  { %1431 = vmatpush.bf16.msrb.mxu2 %v4917_v12 }
 0x20a   :  { %1444 = vmatpush.bf16.msrb.mxu3 %v6239_v62 }
 0x20d   :  { %1432 = vmatpush.bf16.msrb.mxu2 %v6240_v40 }
 0x20e   :  { %1445 = vmatpush.bf16.msrb.mxu3 %v6241_v36 }
 0x211   :  { %1433 = vmatpush.bf16.msrb.mxu2 %v6242_v39 }
 0x212   :  { %1446 = vmatpush.bf16.msrb.mxu3 %v6243_v15 }
 0x215   :  { %1434 = vmatpush.bf16.msrb.mxu2 %v6244_v34 }
 0x216   :  { %1447 = vmatpush.bf16.msrb.mxu3 %v6245_v31  ;;  %v6247_v31 = vld [vmem:[#allocation28_spill] sm:$0xff] }
 0x219   :  { %1435 = vmatpush.bf16.msrb.mxu2 %v4965_v45 }
 0x21a   :  { %1448 = vmatpush.bf16.msrb.mxu3 %v4969_v20  ;;  %v6246_v20 = vld [vmem:[#allocation30_spill] sm:$0xff] }
 0x21d   :  { %1480 = vmatpush.bf16.msra.mxu2 %v4971_v19  ;;  %v1044_v4 = vpop.f32.mrf.mxu0 }
 0x21e   :  { %1493 = vmatpush.bf16.msra.mxu3 %v4973_v27 }
 0x220   :  { %v1057_v35 = vpop.f32.mrf.mxu1 }
 0x221   :  { %1481 = vmatpush.bf16.msra.mxu2 %v4983_v7  ;;  %v832_v28 = vpop.f32.mrf.mxu2  ;;  %v1058_v2 = vadd.f32 %v1057_v35, %v1044_v4 }
 0x222   :  { %1494 = vmatpush.bf16.msra.mxu3 %v4987_v11  ;;  %v845_v57 = vpop.f32.mrf.mxu3 }
 0x223   :  { %v846_v27 = vadd.f32 %v845_v57, %v832_v28  ;;  %v1127_v11 = vadd.f32 %v1058_v2, %v6246_v20 }
 0x225   :  { %1482 = vmatpush.bf16.msra.mxu2 %v4996_v8  ;;  %v3733_v15 = vmul.f32 -1.442695, %v1127_v11  ;;  %v1046_v36 = vpop.f32.mrf.mxu0 }
 0x226   :  { %1495 = vmatpush.bf16.msra.mxu3 %v5000_v16  ;;  %v1087_v16 = vadd.f32 %v846_v27, %v6247_v31 }
 0x227   :  { %4084 = vpow2.f32 %v3733_v15 }
 0x228   :  { %v1059_v62 = vpop.f32.mrf.mxu1 }
 0x229   :  { %1483 = vmatpush.bf16.msra.mxu2 %v5007_v10  ;;  %v834_v35 = vpop.f32.mrf.mxu2 }
 0x22a   :  { %1496 = vmatpush.bf16.msra.mxu3 %v5010_v6  ;;  %v3731_v6 = vmul.f32 -1.442695, %v1087_v16  ;;  %v847_v57 = vpop.f32.mrf.mxu3  ;;  %v6248_v35 = vld [vmem:[#allocation26_spill] sm:$0xff] }
 0x22c   :  { %4086 = vpow2.f32 %v3731_v6 }
 0x22d   :  { %1484 = vmatpush.bf16.msra.mxu2 %v5015_v22  ;;  %v4085_v2 = vpop.eup %4084 }
 0x22e   :  { %1497 = vmatpush.bf16.msra.mxu3 %v5018_v23  ;;  %v1135_v28 = vadd.f32 1.0, %v4085_v2 }
 0x230   :  { %4088 = vrcp.f32 %v1135_v28  ;;  %vm1142_vm12 = vweird.f32 %v1135_v28  ;;  %v1148_v61 = vand.u32 2147483648, %v1135_v28 }
 0x231   :  { %1485 = vmatpush.bf16.msra.mxu2 %v5023_v51 }
 0x232   :  { %1498 = vmatpush.bf16.msra.mxu3 %v5026_v3  ;;  %v4087_v27 = vpop.eup %4086 }
 0x233   :  { %v1095_v20 = vadd.f32 1.0, %v4087_v27 }
 0x235   :  { %1486 = vmatpush.bf16.msra.mxu2 %v5031_v63  ;;  %4090 = vrcp.f32 %v1095_v20  ;;  %v1108_v15 = vand.u32 2147483648, %v1095_v20  ;;  %vm1102_vm8 = vweird.f32 %v1095_v20  ;;  %v1106_v31 = vand.u32 2147483647, %v1095_v20  ;;  %v6249_v63 = vld [vmem:[#allocation60_spill] sm:$0xff] }
 0x236   :  { %1499 = vmatpush.bf16.msra.mxu3 %v5034_v60  ;;  %v4089_v11 = vpop.eup %4088 }
 0x237   :  { %v1138_v36 = vmul.f32 %v4089_v11, %v1135_v28  ;;  %v1109_v2 = vor.u32 1.1754944e-38, %v1108_v15  ;;  %vm1107_vm11 = vcmp.eq.f32.partialorder %v1106_v31, 8.507059e+37  ;;  %vm1143_vm13 = vweird.f32 %v4089_v11 }
 0x238   :  { %vm1144_vm14 = vmor %vm1142_vm12, %vm1143_vm13 }
 0x239   :  { %1487 = vmatpush.bf16.msra.mxu2 %v5039_v9  ;;  %v1139_v3 = vsub.f32 1.0, %v1138_v36  ;;  %v1146_v36 = vand.u32 2147483647, %v1135_v28 }
 0x23a   :  { %1500 = vmatpush.bf16.msra.mxu3 %v5042_v5 }
 0x23b   :  { %v4091_v16 = vpop.eup %4090  ;;  %v1140_v44 = vmul.f32 %v4089_v11, %v1139_v3  ;;  %vm1147_vm15 = vcmp.eq.f32.partialorder %v1146_v36, 8.507059e+37 }
 0x23c   :  { %v1098_v62 = vmul.f32 %v4091_v16, %v1095_v20  ;;  %vm1103_vm9 = vweird.f32 %v4091_v16 }
 0x23d   :  { %v1336_v4 = vpop.f32.mrf.mxu0  ;;  %vm1104_vm10 = vmor %vm1102_vm8, %vm1103_vm9 }
 0x23e   :  { %v1099_v6 = vsub.f32 1.0, %v1098_v62  ;;  %v1337_v57 = vadd.f32 %v1336_v4, %v6248_v35 }
 0x23f   :  { %v858_v27 = vpop.f32.mrf.mxu2 }
 0x240   :  { %v1100_v60 = vmul.f32 %v4091_v16, %v1099_v6  ;;  %v1349_v5 = vpop.f32.mrf.mxu1  ;;  %v1141_v6 = vadd.f32 %v4089_v11, %v1140_v44  ;;  %v6251_v44 = vld [vmem:[#allocation109_spill] sm:$0xff] }
 0x241   :  { %v1350_v43 = vadd.f32 %v1349_v5, %v1337_v57  ;;  %v1149_v5 = vor.u32 1.1754944e-38, %v1148_v61  ;;  %v6252_v61 = vld [vmem:[#allocation114_spill] sm:$0xff] }
 0x242   :  { %v1101_v23 = vadd.f32 %v4091_v16, %v1100_v60  ;;  %v871_v17 = vpop.f32.mrf.mxu3  ;;  %v1145_v57 = vsel %vm1144_vm14, %v4089_v11, %v1141_v6  ;;  %v6254_v6 = vld [vmem:[#allocation118_spill] sm:$0xff] }
 0x243   :  { %v872_v60 = vadd.f32 %v871_v17, %v858_v27 }
 0x244   :  { %v1105_v9 = vsel %vm1104_vm10, %v4091_v16, %v1101_v23  ;;  %v6250_v23 = vld [vmem:[#allocation29_spill] sm:$0xff] }
 0x245   :  { %v1110_v25 = vsel %vm1107_vm11, %v1109_v2, %v1105_v9  ;;  %v1338_v20 = vpop.f32.mrf.mxu0  ;;  %v1088_v3 = vadd.f32 %v872_v60, %v6250_v23 }
 0x246   :  { %v1379_v62 = vmul.f32 %v1350_v43, %v1110_v25  ;;  %v1150_v43 = vsel %vm1147_vm15, %v1149_v5, %v1145_v57  ;;  %v6256_v57 = vld [vmem:[#allocation126_spill] sm:$0xff] }
 0x247   :  { %v860_v35 = vpop.f32.mrf.mxu2  ;;  %v3732_v16 = vmul.f32 -1.442695, %v1088_v3 }
 0x248   :  { %v1381_v4 = vadd.f32 %v1379_v62, %v6249_v63  ;;  %v1351_v15 = vpop.f32.mrf.mxu1  ;;  %v6253_v62 = vld [vmem:[#allocation31_spill] sm:$0xff] }
 0x249   :  { %v6255_v15 = vld [vmem:[#allocation122_spill] sm:$0xff] }
 0x24a   :  { %4092 = vtanh.f32 %v1381_v4  ;;  %v873_v31 = vpop.f32.mrf.mxu3 }
 0x24b   :  { %4094 = vpow2.f32 %v3732_v16 }
 0x250   :  { %v4093_v25 = vpop.eup %4092 }
 0x251   :  { %v1385_v9 = vsub.f32 0.0, %v4093_v25  ;;  %v4095_v17 = vpop.eup %4094 }
 0x252   :  { %v1096_v11 = vadd.f32 1.0, %v4095_v17 }
 0x253   :  { %v1387_v2 = vmul.f32 %v1385_v9, %v1150_v43  ;;  %v6257_v43 = vld [vmem:[#allocation130_spill] sm:$0xff] }
 0x254   :  { %4096 = vrcp.f32 %v1096_v11  ;;  %vm1117_vm0 = vweird.f32 %v1096_v11  ;;  %v1123_v17 = vand.u32 2147483648, %v1096_v11 }
 0x255   :  { %v5156_v20 = vadd.f32 %v4093_v25, %v1387_v2 }
 0x257   :  { %v1400_v63 = vpack.c.bf16 %v5156_v20, %v5156_v20 }
 0x259   :  { %1410 = vmatmul.bf16.vlgmr.msra.gmra.mxu0 %v1400_v63  ;;  %1436 = vmatmul.bf16.vlgmr.msrb.gmra.mxu2 %v1400_v63 }
 0x25a   :  { %1586 = vmatpush.bf16.msra.mxu0 %v6251_v44  ;;  %1612 = vmatpush.bf16.msrb.mxu2 %v5044_v18  ;;  %v4097_v5 = vpop.eup %4096 }
 0x25b   :  { %v1113_v3 = vmul.f32 %v4097_v5, %v1096_v11  ;;  %vm1118_vm1 = vweird.f32 %v4097_v5 }
 0x25c   :  { %vm1119_vm2 = vmor %vm1117_vm0, %vm1118_vm1 }
 0x25d   :  { %v1114_v9 = vsub.f32 1.0, %v1113_v3 }
 0x25e   :  { %1587 = vmatpush.bf16.msra.mxu0 %v6252_v61  ;;  %1613 = vmatpush.bf16.msrb.mxu2 %v5053_v38 }
 0x25f   :  { %v1070_v28 = vpop.f32.mrf.mxu2  ;;  %v1115_v16 = vmul.f32 %v4097_v5, %v1114_v9 }
 0x262   :  { %v1083_v35 = vpop.f32.mrf.mxu3  ;;  %1588 = vmatpush.bf16.msra.mxu0 %v6254_v6  ;;  %1614 = vmatpush.bf16.msrb.mxu2 %v5064_v1 }
 0x263   :  { %v1084_v27 = vadd.f32 %v1083_v35, %v1070_v28  ;;  %v6258_v28 = vld [vmem:[#allocation76_spill] sm:$0xff]  ;;  %v1116_v35 = vadd.f32 %v4097_v5, %v1115_v16  ;;  %v6261_v16 = vld [vmem:[#allocation83_spill] sm:$0xff] }
 0x265   :  { %v1128_v4 = vadd.f32 %v1084_v27, %v6253_v62  ;;  %v1121_v27 = vand.u32 2147483647, %v1096_v11  ;;  %v1120_v3 = vsel %vm1119_vm2, %v4097_v5, %v1116_v35 }
 0x266   :  { %1589 = vmatpush.bf16.msra.mxu0 %v6255_v15  ;;  %1615 = vmatpush.bf16.msrb.mxu2 %v5073_v33 }
 0x267   :  { %v3734_v36 = vmul.f32 -1.442695, %v1128_v4  ;;  %v1072_v60 = vpop.f32.mrf.mxu2  ;;  %vm1122_vm3 = vcmp.eq.f32.partialorder %v1121_v27, 8.507059e+37 }
 0x268   :  { %v6259_v60 = vld [vmem:[#allocation78_spill] sm:$0xff] }
 0x269   :  { %4098 = vpow2.f32 %v3734_v36  ;;  %1462 = vmatmul.bf16.vlgmr.msrb.gmra.mxu0 %v1400_v63  ;;  %1488 = vmatmul.bf16.vlgmr.msra.gmra.mxu2 %v1400_v63  ;;  %v1124_v36 = vor.u32 1.1754944e-38, %v1123_v17 }
 0x26a   :  { %v1085_v31 = vpop.f32.mrf.mxu3  ;;  %1590 = vmatpush.bf16.msra.mxu0 %v6256_v57  ;;  %1616 = vmatpush.bf16.msrb.mxu2 %v5081_v54 }
 0x26b   :  { %v6260_v31 = vld [vmem:[#allocation27_spill] sm:$0xff] }
 0x26e   :  { %1591 = vmatpush.bf16.msra.mxu0 %v6257_v43  ;;  %1617 = vmatpush.bf16.msrb.mxu2 %v5089_v0 }
 0x26f   :  { %v4099_v23 = vpop.eup %4098 }
 0x270   :  { %v1136_v25 = vadd.f32 1.0, %v4099_v23 }
 0x272   :  { %4100 = vrcp.f32 %v1136_v25  ;;  %1592 = vmatpush.bf16.msra.mxu0 %v4962_v46  ;;  %1618 = vmatpush.bf16.msrb.mxu2 %v5097_v50  ;;  %vm1157_vm4 = vweird.f32 %v1136_v25  ;;  %v1163_v5 = vand.u32 2147483648, %v1136_v25 }
 0x276   :  { %1593 = vmatpush.bf16.msra.mxu0 %v4978_v14  ;;  %1619 = vmatpush.bf16.msrb.mxu2 %v5105_v49  ;;  %v6262_v14 = vld [vmem:[#allocation61_spill] sm:$0xff] }
 0x278   :  { %v4101_v2 = vpop.eup %4100 }
 0x279   :  { %v1153_v62 = vmul.f32 %v4101_v2, %v1136_v25  ;;  %1594 = vmatmul.bf16.vlgmr.msra.gmra.mxu0 %v1400_v63  ;;  %1620 = vmatmul.bf16.vlgmr.msrb.gmra.mxu2 %v1400_v63  ;;  %vm1158_vm5 = vweird.f32 %v4101_v2 }
 0x27a   :  { %1661 = vmatpush.bf16.msrb.mxu0 %v6258_v28  ;;  %1687 = vmatpush.bf16.msra.mxu2 %v4873_v41  ;;  %v1125_v41 = vsel %vm1122_vm3, %v1124_v36, %v1120_v3  ;;  %vm1159_vm6 = vmor %vm1157_vm4, %vm1158_vm5  ;;  %v6266_v3 = vld [vmem:[#allocation117_spill] sm:$0xff] }
 0x27b   :  { %v1154_v28 = vsub.f32 1.0, %v1153_v62  ;;  %v1161_v62 = vand.u32 2147483647, %v1136_v25 }
 0x27d   :  { %v1155_v11 = vmul.f32 %v4101_v2, %v1154_v28  ;;  %vm1162_vm7 = vcmp.eq.f32.partialorder %v1161_v62, 8.507059e+37  ;;  %v6274_v62 = vld [vmem:[#allocation151_spill] sm:$0xff] }
 0x27e   :  { %1662 = vmatpush.bf16.msrb.mxu0 %v6259_v60  ;;  %1688 = vmatpush.bf16.msra.mxu2 %v4886_v47  ;;  %v6263_v47 = vld [vmem:[#allocation88_spill] sm:$0xff] }
 0x27f   :  { %v1362_v4 = vpop.f32.mrf.mxu2  ;;  %v1156_v27 = vadd.f32 %v4101_v2, %v1155_v11  ;;  %v6269_v11 = vld [vmem:[#allocation155_spill] sm:$0xff] }
 0x280   :  { %v1363_v23 = vadd.f32 %v1362_v4, %v6260_v31  ;;  %v6264_v4 = vld [vmem:[#allocation92_spill] sm:$0xff] }
 0x282   :  { %v1375_v9 = vpop.f32.mrf.mxu3  ;;  %1663 = vmatpush.bf16.msrb.mxu0 %v6261_v16  ;;  %1689 = vmatpush.bf16.msra.mxu2 %v4903_v13 }
 0x283   :  { %v1376_v49 = vadd.f32 %v1375_v9, %v1363_v23  ;;  %v6267_v9 = vld [vmem:[#allocation121_spill] sm:$0xff] }
 0x285   :  { %v1380_v63 = vmul.f32 %v1376_v49, %v1125_v41  ;;  %v1164_v41 = vor.u32 1.1754944e-38, %v1163_v5  ;;  %v1160_v49 = vsel %vm1159_vm6, %v4101_v2, %v1156_v27  ;;  %v6265_v2 = vld [vmem:[#allocation113_spill] sm:$0xff]  ;;  %v6271_v5 = vld [vmem:[#allocation156_spill] sm:$0xff]  ;;  %v6273_v27 = vld [vmem:[#allocation138_spill] sm:$0xff] }
 0x286   :  { %1664 = vmatpush.bf16.msrb.mxu0 %v6263_v47  ;;  %1690 = vmatpush.bf16.msra.mxu2 %v4917_v12  ;;  %v6313_v12 = vld [vmem:[#allocation34_spill] sm:$0xff] }
 0x287   :  { %v1382_v17 = vadd.f32 %v1380_v63, %v6262_v14  ;;  %v1364_v60 = vpop.f32.mrf.mxu2  ;;  %v1165_v36 = vsel %vm1162_vm7, %v1164_v41, %v1160_v49  ;;  %v6268_v63 = vld [vmem:[#allocation125_spill] sm:$0xff]  ;;  %v6275_v41 = vld [vmem:[#allocation142_spill] sm:$0xff] }
 0x288   :  { %v6276_v49 = vld [vmem:[#allocation158_spill] sm:$0xff] }
 0x289   :  { %4102 = vtanh.f32 %v1382_v17  ;;  %v6270_v17 = vld [vmem:[#allocation129_spill] sm:$0xff] }
 0x28a   :  { %v1377_v35 = vpop.f32.mrf.mxu3  ;;  %1665 = vmatpush.bf16.msrb.mxu0 %v6264_v4  ;;  %1691 = vmatpush.bf16.msra.mxu2 %v6240_v40 }
 0x28b   :  { %v6272_v35 = vld [vmem:[#allocation133_spill] sm:$0xff] }
 0x28e   :  { %1666 = vmatpush.bf16.msrb.mxu0 %v4844_v48  ;;  %1692 = vmatpush.bf16.msra.mxu2 %v6242_v39 }
 0x28f   :  { %v4103_v14 = vpop.eup %4102 }
 0x290   :  { %v1386_v28 = vsub.f32 0.0, %v4103_v14 }
 0x292   :  { %v1388_v60 = vmul.f32 %v1386_v28, %v1165_v36  ;;  %1667 = vmatpush.bf16.msrb.mxu0 %v4856_v26  ;;  %1693 = vmatpush.bf16.msra.mxu2 %v6244_v34  ;;  %v6278_v28 = vld [vmem:[#allocation107_spill] sm:$0xff]  ;;  %v6279_v36 = vld [vmem:[#allocation108_spill] sm:$0xff] }
 0x294   :  { %v5191_v23 = vadd.f32 %v4103_v14, %v1388_v60  ;;  %v6277_v14 = vld [vmem:[#allocation77_spill] sm:$0xff] }
 0x295   :  { %v6280_v60 = vld [vmem:[#allocation153_spill] sm:$0xff] }
 0x296   :  { %v1401_v25 = vpack.c.bf16 %v5191_v23, %v5191_v23  ;;  %1668 = vmatpush.bf16.msrb.mxu0 %v4868_v21  ;;  %1694 = vmatpush.bf16.msra.mxu2 %v4965_v45  ;;  %v6298_v45 = vld [vmem:[#allocation141_spill] sm:$0xff] }
 0x298   :  { %1423 = vmatmul.bf16.vlgmr.msra.gmra.mxu1 %v1401_v25  ;;  %1449 = vmatmul.bf16.vlgmr.msrb.gmra.mxu3 %v1401_v25 }
 0x299   :  { %1599 = vmatpush.bf16.msra.mxu1 %v6265_v2  ;;  %1625 = vmatpush.bf16.msrb.mxu3 %v5046_v37 }
 0x29a   :  { %1713 = vmatpush.bf16.msra.mxu0 %v4797_v53  ;;  %1739 = vmatpush.bf16.msrb.mxu2 %v4971_v19  ;;  %v6296_v19 = vld [vmem:[#allocation137_spill] sm:$0xff]  ;;  %v6297_v53 = vld [vmem:[#allocation84_spill] sm:$0xff] }
 0x29d   :  { %1600 = vmatpush.bf16.msra.mxu1 %v6266_v3  ;;  %1626 = vmatpush.bf16.msrb.mxu3 %v5056_v29 }
 0x29e   :  { %1714 = vmatpush.bf16.msra.mxu0 %v4803_v58  ;;  %1740 = vmatpush.bf16.msrb.mxu2 %v4983_v7  ;;  %v6294_v7 = vld [vmem:[#allocation135_spill] sm:$0xff]  ;;  %v6295_v58 = vld [vmem:[#allocation81_spill] sm:$0xff] }
 0x2a1   :  { %1601 = vmatpush.bf16.msra.mxu1 %v6267_v9  ;;  %1627 = vmatpush.bf16.msrb.mxu3 %v5067_v56 }
 0x2a2   :  { %1715 = vmatpush.bf16.msra.mxu0 %v4815_v55  ;;  %1741 = vmatpush.bf16.msrb.mxu2 %v4996_v8  ;;  %v6292_v8 = vld [vmem:[#allocation132_spill] sm:$0xff]  ;;  %v6293_v55 = vld [vmem:[#allocation105_spill] sm:$0xff] }
 0x2a5   :  { %1602 = vmatpush.bf16.msra.mxu1 %v6268_v63  ;;  %1628 = vmatpush.bf16.msrb.mxu3 %v6269_v11 }
 0x2a6   :  { %1716 = vmatpush.bf16.msra.mxu0 %v4827_v32  ;;  %1742 = vmatpush.bf16.msrb.mxu2 %v5007_v10  ;;  %v6287_v10 = vld [vmem:[#allocation93_spill] sm:$0xff]  ;;  %v6288_v32 = vld [vmem:[#allocation124_spill] sm:$0xff] }
 0x2a8   :  { %1475 = vmatmul.bf16.vlgmr.msrb.gmra.mxu1 %v1401_v25  ;;  %1501 = vmatmul.bf16.vlgmr.msra.gmra.mxu3 %v1401_v25 }
 0x2a9   :  { %1603 = vmatpush.bf16.msra.mxu1 %v6270_v17  ;;  %1629 = vmatpush.bf16.msrb.mxu3 %v6271_v5 }
 0x2aa   :  { %1717 = vmatpush.bf16.msra.mxu0 %v4839_v30  ;;  %1743 = vmatpush.bf16.msrb.mxu2 %v5015_v22  ;;  %v6285_v22 = vld [vmem:[#allocation89_spill] sm:$0xff]  ;;  %v6286_v30 = vld [vmem:[#allocation120_spill] sm:$0xff] }
 0x2ad   :  { %1604 = vmatpush.bf16.msra.mxu1 %v6272_v35  ;;  %1630 = vmatpush.bf16.msrb.mxu3 %v5092_v59 }
 0x2ae   :  { %1718 = vmatpush.bf16.msra.mxu0 %v4851_v52  ;;  %1744 = vmatpush.bf16.msrb.mxu2 %v5023_v51  ;;  %v6281_v51 = vld [vmem:[#allocation79_spill] sm:$0xff]  ;;  %v6282_v52 = vld [vmem:[#allocation112_spill] sm:$0xff] }
 0x2b1   :  { %1605 = vmatpush.bf16.msra.mxu1 %v6273_v27  ;;  %1631 = vmatpush.bf16.msrb.mxu3 %v5100_v42 }
 0x2b2   :  { %1719 = vmatpush.bf16.msra.mxu0 %v4863_v24  ;;  %1745 = vmatpush.bf16.msrb.mxu2 %v6274_v62  ;;  %v6283_v24 = vld [vmem:[#allocation85_spill] sm:$0xff]  ;;  %v6284_v62 = vld [vmem:[#allocation116_spill] sm:$0xff] }
 0x2b5   :  { %1606 = vmatpush.bf16.msra.mxu1 %v6275_v41  ;;  %1632 = vmatpush.bf16.msrb.mxu3 %v6276_v49 }
 0x2b6   :  { %1720 = vmatpush.bf16.msra.mxu0 %v6279_v36  ;;  %1746 = vmatpush.bf16.msrb.mxu2 %v6280_v60  ;;  %v6289_v36 = vld [vmem:[#allocation97_spill] sm:$0xff]  ;;  %v6290_v60 = vld [vmem:[#allocation128_spill] sm:$0xff] }
 0x2b8   :  { %1607 = vmatmul.bf16.vlgmr.msra.gmra.mxu1 %v1401_v25  ;;  %1633 = vmatmul.bf16.vlgmr.msrb.gmra.mxu3 %v1401_v25  ;;  %v6291_v25 = vld [vmem:[#allocation101_spill] sm:$0xff] }
 0x2b9   :  { %1674 = vmatpush.bf16.msrb.mxu1 %v6277_v14  ;;  %1700 = vmatpush.bf16.msra.mxu3 %v6278_v28 }
 0x2bd   :  { %1675 = vmatpush.bf16.msrb.mxu1 %v6281_v51  ;;  %1701 = vmatpush.bf16.msra.mxu3 %v6282_v52 }
 0x2c1   :  { %1676 = vmatpush.bf16.msrb.mxu1 %v6283_v24  ;;  %1702 = vmatpush.bf16.msra.mxu3 %v6284_v62 }
 0x2c5   :  { %1677 = vmatpush.bf16.msrb.mxu1 %v6285_v22  ;;  %1703 = vmatpush.bf16.msra.mxu3 %v6286_v30 }
 0x2c9   :  { %1678 = vmatpush.bf16.msrb.mxu1 %v6287_v10  ;;  %1704 = vmatpush.bf16.msra.mxu3 %v6288_v32  ;;  %v6307_v32 = vld [vmem:[#allocation103_spill] sm:$0xff] }
 0x2cd   :  { %1679 = vmatpush.bf16.msrb.mxu1 %v6289_v36  ;;  %1705 = vmatpush.bf16.msra.mxu3 %v6290_v60  ;;  %v6299_v36 = vld [vmem:[#allocation87_spill] sm:$0xff]  ;;  %v6300_v60 = vld [vmem:[#allocation144_spill] sm:$0xff] }
 0x2d1   :  { %1680 = vmatpush.bf16.msrb.mxu1 %v6291_v25  ;;  %1706 = vmatpush.bf16.msra.mxu3 %v6292_v8  ;;  %v6301_v25 = vld [vmem:[#allocation91_spill] sm:$0xff]  ;;  %v6302_v8 = vld [vmem:[#allocation146_spill] sm:$0xff] }
 0x2d5   :  { %1681 = vmatpush.bf16.msrb.mxu1 %v6293_v55  ;;  %1707 = vmatpush.bf16.msra.mxu3 %v6294_v7  ;;  %v6303_v7 = vld [vmem:[#allocation95_spill] sm:$0xff] }
 0x2d6   :  { %v1411_v21 = vpop.f32.mrf.mxu0 }
 0x2d9   :  { %1726 = vmatpush.bf16.msra.mxu1 %v6295_v58  ;;  %1752 = vmatpush.bf16.msrb.mxu3 %v6296_v19  ;;  %v6304_v58 = vld [vmem:[#allocation148_spill] sm:$0xff]  ;;  %v6305_v19 = vld [vmem:[#allocation99_spill] sm:$0xff] }
 0x2dc   :  { %v1437_v55 = vpop.f32.mrf.mxu2 }
 0x2dd   :  { %1727 = vmatpush.bf16.msra.mxu1 %v6297_v53  ;;  %1753 = vmatpush.bf16.msrb.mxu3 %v6298_v45  ;;  %v6306_v53 = vld [vmem:[#allocation150_spill] sm:$0xff] }
 0x2de   :  { %v1413_v34 = vpop.f32.mrf.mxu0 }
 0x2e1   :  { %1728 = vmatpush.bf16.msra.mxu1 %v6299_v36  ;;  %1754 = vmatpush.bf16.msrb.mxu3 %v6300_v60  ;;  %v6308_v36 = vld [vmem:[#allocation152_spill] sm:$0xff]  ;;  %v6309_v60 = vld [vmem:[#allocation111_spill] sm:$0xff] }
 0x2e4   :  { %v1439_v45 = vpop.f32.mrf.mxu2 }
 0x2e5   :  { %1729 = vmatpush.bf16.msra.mxu1 %v6301_v25  ;;  %1755 = vmatpush.bf16.msrb.mxu3 %v6302_v8  ;;  %v6310_v25 = vld [vmem:[#allocation154_spill] sm:$0xff]  ;;  %v6311_v45 = vld [vmem:[#allocation32_spill] sm:$0xff] }
 0x2e6   :  { %v1463_v26 = vpop.f32.mrf.mxu0 }
 0x2e9   :  { %1730 = vmatpush.bf16.msra.mxu1 %v6303_v7  ;;  %1756 = vmatpush.bf16.msrb.mxu3 %v6304_v58 }
 0x2ec   :  { %v1489_v8 = vpop.f32.mrf.mxu2 }
 0x2ed   :  { %1731 = vmatpush.bf16.msra.mxu1 %v6305_v19  ;;  %1757 = vmatpush.bf16.msrb.mxu3 %v6306_v53 }
 0x2ee   :  { %v1465_v34 = vpop.f32.mrf.mxu0 }
 0x2f1   :  { %1732 = vmatpush.bf16.msra.mxu1 %v6307_v32  ;;  %1758 = vmatpush.bf16.msrb.mxu3 %v6308_v36 }
 0x2f4   :  { %v1491_v10 = vpop.f32.mrf.mxu2 }
 0x2f5   :  { %1733 = vmatpush.bf16.msra.mxu1 %v6309_v60  ;;  %1759 = vmatpush.bf16.msrb.mxu3 %v6310_v25  ;;  %v6312_v60 = vld [vmem:[#allocation33_spill] sm:$0xff] }
 0x2f6   :  { %v1595_v7 = vpop.f32.mrf.mxu0 }
 0x2fc   :  { %v5263_v39 = vpop.f32.mrf.mxu2 }
 0x2fe   :  { %v1597_v58 = vpop.f32.mrf.mxu0 }
 0x304   :  { %v1623_v19 = vpop.f32.mrf.mxu2 }
 0x315   :  { %v1424_v48 = vpop.f32.mrf.mxu1 }
 0x316   :  { %v1425_v53 = vadd.f32 %v1424_v48, %v1411_v21 }
 0x318   :  { %v1506_v30 = vadd.f32 %v1425_v53, %v6311_v45 }
 0x31a   :  { %v3863_v22 = vmul.f32 -1.442695, %v1506_v30 }
 0x31b   :  { %v1450_v32 = vpop.f32.mrf.mxu3 }
 0x31c   :  { %4104 = vpow2.f32 %v3863_v22  ;;  %v1451_v36 = vadd.f32 %v1450_v32, %v1437_v55 }
 0x31d   :  { %v1426_v40 = vpop.f32.mrf.mxu1 }
 0x31e   :  { %v1507_v4 = vadd.f32 %v1451_v36, %v6312_v60 }
 0x320   :  { %v3864_v25 = vmul.f32 -1.442695, %v1507_v4  ;;  %v6314_v4 = vld [vmem:[#allocation35_spill] sm:$0xff] }
 0x322   :  { %v4105_v62 = vpop.eup %4104  ;;  %4106 = vpow2.f32 %v3864_v25 }
 0x323   :  { %v1514_v10 = vadd.f32 1.0, %v4105_v62  ;;  %v1452_v34 = vpop.f32.mrf.mxu3 }
 0x325   :  { %4108 = vrcp.f32 %v1514_v10  ;;  %v1476_v24 = vpop.f32.mrf.mxu1  ;;  %vm1521_vm9 = vweird.f32 %v1514_v10  ;;  %v1525_v34 = vand.u32 2147483647, %v1514_v10 }
 0x326   :  { %v1477_v58 = vadd.f32 %v1476_v24, %v1463_v26  ;;  %v1527_v26 = vand.u32 2147483648, %v1514_v10 }
 0x327   :  { %vm1526_vm11 = vcmp.eq.f32.partialorder %v1525_v34, 8.507059e+37 }
 0x328   :  { %v4107_v19 = vpop.eup %4106  ;;  %v1546_v48 = vadd.f32 %v1477_v58, %v6313_v12 }
 0x329   :  { %v1515_v21 = vadd.f32 1.0, %v4107_v19 }
 0x32a   :  { %v3865_v53 = vmul.f32 -1.442695, %v1546_v48 }
 0x32b   :  { %v4109_v30 = vpop.eup %4108  ;;  %4110 = vrcp.f32 %v1515_v21  ;;  %v1502_v22 = vpop.f32.mrf.mxu3  ;;  %vm1536_vm13 = vweird.f32 %v1515_v21 }
 0x32c   :  { %4112 = vpow2.f32 %v3865_v53  ;;  %v1503_v55 = vadd.f32 %v1502_v22, %v1489_v8  ;;  %v1517_v32 = vmul.f32 %v4109_v30, %v1514_v10  ;;  %vm1522_vm8 = vweird.f32 %v4109_v30  ;;  %v6315_v8 = vld [vmem:[#allocation26_spill] sm:$0xff] }
 0x32d   :  { %v1478_v40 = vpop.f32.mrf.mxu1  ;;  %vm1523_vm10 = vmor %vm1521_vm9, %vm1522_vm8  ;;  %v1596_v53 = vadd.f32 %v1595_v7, %v6315_v8  ;;  %v1542_v10 = vand.u32 2147483648, %v1515_v21 }
 0x32e   :  { %v1547_v36 = vadd.f32 %v1503_v55, %v6314_v4  ;;  %v1518_v60 = vsub.f32 1.0, %v1517_v32  ;;  %v1528_v55 = vor.u32 1.1754944e-38, %v1527_v26 }
 0x330   :  { %v3866_v62 = vmul.f32 -1.442695, %v1547_v36  ;;  %v1519_v25 = vmul.f32 %v4109_v30, %v1518_v60 }
 0x331   :  { %v4111_v45 = vpop.eup %4110 }
 0x332   :  { %v4113_v24 = vpop.eup %4112  ;;  %4114 = vpow2.f32 %v3866_v62  ;;  %v1520_v12 = vadd.f32 %v4109_v30, %v1519_v25  ;;  %v1532_v58 = vmul.f32 %v4111_v45, %v1515_v21  ;;  %vm1537_vm12 = vweird.f32 %v4111_v45 }
 0x333   :  { %v1554_v19 = vadd.f32 1.0, %v4113_v24  ;;  %v1504_v48 = vpop.f32.mrf.mxu3  ;;  %v1540_v24 = vand.u32 2147483647, %v1515_v21  ;;  %vm1538_vm14 = vmor %vm1536_vm13, %vm1537_vm12 }
 0x334   :  { %v1524_v22 = vsel %vm1523_vm10, %v4109_v30, %v1520_v12  ;;  %v1533_v40 = vsub.f32 1.0, %v1532_v58  ;;  %v6316_v48 = vld [vmem:[#allocation62_spill] sm:$0xff]  ;;  %v1622_v30 = vadd.f32 %v5263_v39, %v6260_v31  ;;  %v1543_v58 = vor.u32 1.1754944e-38, %v1542_v10 }
 0x335   :  { %4116 = vrcp.f32 %v1554_v19  ;;  %v1608_v32 = vpop.f32.mrf.mxu1  ;;  %v1529_v60 = vsel %vm1526_vm11, %v1528_v55, %v1524_v22  ;;  %vm1541_vm15 = vcmp.eq.f32.partialorder %v1540_v24, 8.507059e+37  ;;  %v1567_v55 = vand.u32 2147483648, %v1554_v19 }
 0x336   :  { %v1609_v4 = vadd.f32 %v1608_v32, %v1596_v53  ;;  %v1534_v36 = vmul.f32 %v4111_v45, %v1533_v40  ;;  %vm1561_vm1 = vweird.f32 %v1554_v19 }
 0x338   :  { %v4115_v47 = vpop.eup %4114  ;;  %v1638_v62 = vmul.f32 %v1609_v4, %v1529_v60  ;;  %v1535_v25 = vadd.f32 %v4111_v45, %v1534_v36  ;;  %v1565_v4 = vand.u32 2147483647, %v1554_v19  ;;  %v6317_v60 = vld [vmem:[#allocation63_spill] sm:$0xff] }
 0x339   :  { %v1555_v52 = vadd.f32 1.0, %v4115_v47 }
 0x33a   :  { %v1640_v51 = vadd.f32 %v1638_v62, %v6316_v48  ;;  %v1539_v26 = vsel %vm1538_vm14, %v4111_v45, %v1535_v25  ;;  %vm1566_vm3 = vcmp.eq.f32.partialorder %v1565_v4, 8.507059e+37 }
 0x33b   :  { %v4117_v7 = vpop.eup %4116  ;;  %4118 = vrcp.f32 %v1555_v52  ;;  %v1634_v12 = vpop.f32.mrf.mxu3  ;;  %v1544_v47 = vsel %vm1541_vm15, %v1543_v58, %v1539_v26  ;;  %v1582_v26 = vand.u32 2147483648, %v1555_v52  ;;  %vm1576_vm5 = vweird.f32 %v1555_v52 }
 0x33c   :  { %v1557_v34 = vmul.f32 %v4117_v7, %v1554_v19  ;;  %4120 = vtanh.f32 %v1640_v51  ;;  %v1635_v53 = vadd.f32 %v1634_v12, %v1622_v30  ;;  %vm1562_vm0 = vweird.f32 %v4117_v7 }
 0x33d   :  { %v1610_v22 = vpop.f32.mrf.mxu1  ;;  %vm1563_vm2 = vmor %vm1561_vm1, %vm1562_vm0  ;;  %v1568_v51 = vor.u32 1.1754944e-38, %v1567_v55 }
 0x33e   :  { %v1558_v40 = vsub.f32 1.0, %v1557_v34  ;;  %v1639_v21 = vmul.f32 %v1635_v53, %v1544_v47  ;;  %v1580_v53 = vand.u32 2147483647, %v1555_v52  ;;  %v1583_v47 = vor.u32 1.1754944e-38, %v1582_v26  ;;  %v6330_v26 = vld [vmem:[#allocation92_spill] sm:$0xff] }
 0x340   :  { %v1559_v32 = vmul.f32 %v4117_v7, %v1558_v40  ;;  %v1641_v62 = vadd.f32 %v1639_v21, %v6317_v60  ;;  %vm1581_vm7 = vcmp.eq.f32.partialorder %v1580_v53, 8.507059e+37  ;;  %v6320_v60 = vld [vmem:[#allocation76_spill] sm:$0xff] }
 0x341   :  { %v4119_v36 = vpop.eup %4118  ;;  %v6334_v53 = vld [vmem:[#allocation96_spill] sm:$0xff] }
 0x342   :  { %v4121_v39 = vpop.eup %4120  ;;  %v1572_v45 = vmul.f32 %v4119_v36, %v1555_v52  ;;  %v1560_v25 = vadd.f32 %v4117_v7, %v1559_v32  ;;  %4122 = vtanh.f32 %v1641_v62  ;;  %vm1577_vm4 = vweird.f32 %v4119_v36  ;;  %v6321_v62 = vld [vmem:[#allocation106_spill] sm:$0xff] }
 0x343   :  { %v1644_v10 = vsub.f32 %v5156_v20, %v4121_v39  ;;  %v1636_v24 = vpop.f32.mrf.mxu3  ;;  %vm1578_vm6 = vmor %vm1576_vm5, %vm1577_vm4 }
 0x344   :  { %v1573_v48 = vsub.f32 1.0, %v1572_v45  ;;  %v1564_v30 = vsel %vm1563_vm2, %v4117_v7, %v1560_v25  ;;  %v6323_v45 = vld [vmem:[#allocation110_spill] sm:$0xff]  ;;  %v6324_v25 = vld [vmem:[#allocation79_spill] sm:$0xff] }
 0x345   :  { %v1569_v12 = vsel %vm1566_vm3, %v1568_v51, %v1564_v30  ;;  %v6325_v51 = vld [vmem:[#allocation112_spill] sm:$0xff]  ;;  %v6327_v24 = vld [vmem:[#allocation119_spill] sm:$0xff] }
 0x346   :  { %v1574_v34 = vmul.f32 %v4119_v36, %v1573_v48  ;;  %v1646_v58 = vmul.f32 %v1644_v10, %v1569_v12  ;;  %v6326_v10 = vld [vmem:[#allocation88_spill] sm:$0xff]  ;;  %v6328_v48 = vld [vmem:[#allocation85_spill] sm:$0xff]  ;;  %v6331_v12 = vld [vmem:[#allocation123_spill] sm:$0xff] }
 0x347   :  { %v6329_v30 = vld [vmem:[#allocation116_spill] sm:$0xff] }
 0x348   :  { %v5275_v22 = vadd.f32 %v4121_v39, %v1646_v58  ;;  %v1575_v19 = vadd.f32 %v4119_v36, %v1574_v34  ;;  %v4123_v40 = vpop.eup %4122  ;;  %v6322_v39 = vld [vmem:[#allocation78_spill] sm:$0xff]  ;;  %v6332_v34 = vld [vmem:[#allocation89_spill] sm:$0xff]  ;;  %v6333_v58 = vld [vmem:[#allocation120_spill] sm:$0xff] }
 0x349   :  { %v1645_v7 = vsub.f32 %v5191_v23, %v4123_v40  ;;  %v6318_v23 = vld [vmem:[#allocation139_spill] sm:$0xff] }
 0x34a   :  { %v1659_v20 = vpack.c.bf16 %v5275_v22, %v5275_v22  ;;  %v1579_v55 = vsel %vm1578_vm6, %v4119_v36, %v1575_v19  ;;  %v6319_v36 = vld [vmem:[#allocation157_spill] sm:$0xff]  ;;  %v6335_v19 = vld [vmem:[#allocation127_spill] sm:$0xff] }
 0x34b   :  { %v1584_v21 = vsel %vm1581_vm7, %v1583_v47, %v1579_v55  ;;  %v6337_v47 = vld [vmem:[#allocation124_spill] sm:$0xff]  ;;  %v6339_v55 = vld [vmem:[#allocation131_spill] sm:$0xff] }
 0x34c   :  { %v1647_v32 = vmul.f32 %v1645_v7, %v1584_v21  ;;  %1669 = vmatmul.bf16.vlgmr.msrb.gmra.mxu0 %v1659_v20  ;;  %1695 = vmatmul.bf16.vlgmr.msra.gmra.mxu2 %v1659_v20  ;;  %v6340_v7 = vld [vmem:[#allocation97_spill] sm:$0xff]  ;;  %v6341_v21 = vld [vmem:[#allocation128_spill] sm:$0xff] }
 0x34d   :  { %1845 = vmatpush.bf16.msrb.mxu0 %v6251_v44  ;;  %1871 = vmatpush.bf16.msra.mxu2 %v5044_v18 }
 0x34e   :  { %v5282_v52 = vadd.f32 %v4123_v40, %v1647_v32  ;;  %v6336_v40 = vld [vmem:[#allocation93_spill] sm:$0xff]  ;;  %v6342_v32 = vld [vmem:[#allocation104_spill] sm:$0xff] }
 0x350   :  { %v1660_v4 = vpack.c.bf16 %v5282_v52, %v5282_v52 }
 0x351   :  { %1846 = vmatpush.bf16.msrb.mxu0 %v6252_v61  ;;  %1872 = vmatpush.bf16.msra.mxu2 %v5053_v38 }
 0x352   :  { %1682 = vmatmul.bf16.vlgmr.msrb.gmra.mxu1 %v1660_v4  ;;  %1708 = vmatmul.bf16.vlgmr.msra.gmra.mxu3 %v1660_v4 }
 0x353   :  { %1858 = vmatpush.bf16.msrb.mxu1 %v6265_v2  ;;  %1884 = vmatpush.bf16.msra.mxu3 %v5046_v37 }
 0x355   :  { %1847 = vmatpush.bf16.msrb.mxu0 %v6254_v6  ;;  %1873 = vmatpush.bf16.msra.mxu2 %v5064_v1 }
 0x357   :  { %1859 = vmatpush.bf16.msrb.mxu1 %v6266_v3  ;;  %1885 = vmatpush.bf16.msra.mxu3 %v5056_v29 }
 0x359   :  { %1848 = vmatpush.bf16.msrb.mxu0 %v6255_v15  ;;  %1874 = vmatpush.bf16.msra.mxu2 %v5073_v33 }
 0x35b   :  { %1860 = vmatpush.bf16.msrb.mxu1 %v6267_v9  ;;  %1886 = vmatpush.bf16.msra.mxu3 %v5067_v56 }
 0x35c   :  { %1721 = vmatmul.bf16.vlgmr.msra.gmra.mxu0 %v1659_v20  ;;  %1747 = vmatmul.bf16.vlgmr.msrb.gmra.mxu2 %v1659_v20 }
 0x35d   :  { %1849 = vmatpush.bf16.msrb.mxu0 %v6256_v57  ;;  %1875 = vmatpush.bf16.msra.mxu2 %v5081_v54 }
 0x35f   :  { %1861 = vmatpush.bf16.msrb.mxu1 %v6268_v63  ;;  %1887 = vmatpush.bf16.msra.mxu3 %v6269_v11 }
 0x361   :  { %1850 = vmatpush.bf16.msrb.mxu0 %v6257_v43  ;;  %1876 = vmatpush.bf16.msra.mxu2 %v5089_v0 }
 0x362   :  { %1734 = vmatmul.bf16.vlgmr.msra.gmra.mxu1 %v1660_v4  ;;  %1760 = vmatmul.bf16.vlgmr.msrb.gmra.mxu3 %v1660_v4 }
 0x363   :  { %1862 = vmatpush.bf16.msrb.mxu1 %v6270_v17  ;;  %1888 = vmatpush.bf16.msra.mxu3 %v6271_v5 }
 0x365   :  { %1851 = vmatpush.bf16.msrb.mxu0 %v4962_v46  ;;  %1877 = vmatpush.bf16.msra.mxu2 %v5097_v50 }
 0x367   :  { %1863 = vmatpush.bf16.msrb.mxu1 %v6272_v35  ;;  %1889 = vmatpush.bf16.msra.mxu3 %v5092_v59 }
 0x369   :  { %1852 = vmatpush.bf16.msrb.mxu0 %v6318_v23  ;;  %1878 = vmatpush.bf16.msra.mxu2 %v6319_v36 }
 0x36b   :  { %1864 = vmatpush.bf16.msrb.mxu1 %v6273_v27  ;;  %1890 = vmatpush.bf16.msra.mxu3 %v5100_v42 }
 0x36c   :  { %1853 = vmatmul.bf16.vlgmr.msrb.gmra.mxu0 %v1659_v20  ;;  %1879 = vmatmul.bf16.vlgmr.msra.gmra.mxu2 %v1659_v20  ;;  %v6338_v20 = vld [vmem:[#allocation100_spill] sm:$0xff] }
 0x36d   :  { %1920 = vmatpush.bf16.msra.mxu0 %v6320_v60  ;;  %1946 = vmatpush.bf16.msrb.mxu2 %v6321_v62 }
 0x36f   :  { %1865 = vmatpush.bf16.msrb.mxu1 %v6275_v41  ;;  %1891 = vmatpush.bf16.msra.mxu3 %v6276_v49 }
 0x371   :  { %1921 = vmatpush.bf16.msra.mxu0 %v6322_v39  ;;  %1947 = vmatpush.bf16.msrb.mxu2 %v6323_v45 }
 0x372   :  { %1866 = vmatmul.bf16.vlgmr.msrb.gmra.mxu1 %v1660_v4  ;;  %1892 = vmatmul.bf16.vlgmr.msra.gmra.mxu3 %v1660_v4  ;;  %v6343_v4 = vld [vmem:[#allocation134_spill] sm:$0xff] }
 0x373   :  { %1933 = vmatpush.bf16.msra.mxu1 %v6277_v14  ;;  %1959 = vmatpush.bf16.msrb.mxu3 %v6278_v28 }
 0x375   :  { %1922 = vmatpush.bf16.msra.mxu0 %v6261_v16  ;;  %1948 = vmatpush.bf16.msrb.mxu2 %v4903_v13 }
 0x377   :  { %1934 = vmatpush.bf16.msra.mxu1 %v6324_v25  ;;  %1960 = vmatpush.bf16.msrb.mxu3 %v6325_v51 }
 0x379   :  { %1923 = vmatpush.bf16.msra.mxu0 %v6326_v10  ;;  %1949 = vmatpush.bf16.msrb.mxu2 %v6327_v24 }
 0x37b   :  { %1935 = vmatpush.bf16.msra.mxu1 %v6328_v48  ;;  %1961 = vmatpush.bf16.msrb.mxu3 %v6329_v30 }
 0x37d   :  { %1924 = vmatpush.bf16.msra.mxu0 %v6330_v26  ;;  %1950 = vmatpush.bf16.msrb.mxu2 %v6331_v12 }
 0x37f   :  { %1936 = vmatpush.bf16.msra.mxu1 %v6332_v34  ;;  %1962 = vmatpush.bf16.msrb.mxu3 %v6333_v58  ;;  %v6344_v58 = vld [vmem:[#allocation80_spill] sm:$0xff] }
 0x381   :  { %1925 = vmatpush.bf16.msra.mxu0 %v6334_v53  ;;  %1951 = vmatpush.bf16.msrb.mxu2 %v6335_v19  ;;  %v6345_v53 = vld [vmem:[#allocation136_spill] sm:$0xff]  ;;  %v6346_v19 = vld [vmem:[#allocation101_spill] sm:$0xff] }
 0x383   :  { %1937 = vmatpush.bf16.msra.mxu1 %v6336_v40  ;;  %1963 = vmatpush.bf16.msrb.mxu3 %v6337_v47  ;;  %v6347_v40 = vld [vmem:[#allocation132_spill] sm:$0xff]  ;;  %v6348_v47 = vld [vmem:[#allocation82_spill] sm:$0xff] }
 0x385   :  { %1926 = vmatpush.bf16.msra.mxu0 %v6338_v20  ;;  %1952 = vmatpush.bf16.msrb.mxu2 %v6339_v55  ;;  %v6349_v20 = vld [vmem:[#allocation140_spill] sm:$0xff]  ;;  %v6350_v55 = vld [vmem:[#allocation105_spill] sm:$0xff] }
 0x387   :  { %1938 = vmatpush.bf16.msra.mxu1 %v6340_v7  ;;  %1964 = vmatpush.bf16.msrb.mxu3 %v6341_v21  ;;  %v6351_v7 = vld [vmem:[#allocation135_spill] sm:$0xff]  ;;  %v6352_v21 = vld [vmem:[#allocation81_spill] sm:$0xff] }
 0x389   :  { %1927 = vmatpush.bf16.msra.mxu0 %v6342_v32  ;;  %1953 = vmatpush.bf16.msrb.mxu2 %v6343_v4  ;;  %v6353_v32 = vld [vmem:[#allocation137_spill] sm:$0xff]  ;;  %v6354_v4 = vld [vmem:[#allocation86_spill] sm:$0xff] }
 0x38b   :  { %1939 = vmatpush.bf16.msra.mxu1 %v6346_v19  ;;  %1965 = vmatpush.bf16.msrb.mxu3 %v6347_v40  ;;  %v6357_v19 = vld [vmem:[#allocation141_spill] sm:$0xff]  ;;  %v6358_v40 = vld [vmem:[#allocation90_spill] sm:$0xff] }
 0x38d   :  { %1972 = vmatpush.bf16.msrb.mxu0 %v6344_v58  ;;  %1998 = vmatpush.bf16.msra.mxu2 %v6345_v53  ;;  %v6355_v58 = vld [vmem:[#allocation143_spill] sm:$0xff]  ;;  %v6356_v53 = vld [vmem:[#allocation84_spill] sm:$0xff] }
 0x38f   :  { %1940 = vmatpush.bf16.msra.mxu1 %v6350_v55  ;;  %1966 = vmatpush.bf16.msrb.mxu3 %v6351_v7  ;;  %v6361_v55 = vld [vmem:[#allocation144_spill] sm:$0xff]  ;;  %v6362_v7 = vld [vmem:[#allocation94_spill] sm:$0xff] }
 0x391   :  { %1973 = vmatpush.bf16.msrb.mxu0 %v6348_v47  ;;  %1999 = vmatpush.bf16.msra.mxu2 %v6349_v20  ;;  %v6359_v47 = vld [vmem:[#allocation145_spill] sm:$0xff]  ;;  %v6360_v20 = vld [vmem:[#allocation87_spill] sm:$0xff] }
 0x393   :  { %1985 = vmatpush.bf16.msrb.mxu1 %v6352_v21  ;;  %2011 = vmatpush.bf16.msra.mxu3 %v6353_v32  ;;  %v6363_v21 = vld [vmem:[#allocation147_spill] sm:$0xff] }
 0x394   :  { %v6364_v32 = vld [vmem:[#allocation91_spill] sm:$0xff] }
 0x395   :  { %1974 = vmatpush.bf16.msrb.mxu0 %v6354_v4  ;;  %2000 = vmatpush.bf16.msra.mxu2 %v6355_v58  ;;  %v6365_v4 = vld [vmem:[#allocation146_spill] sm:$0xff] }
 0x396   :  { %v6366_v58 = vld [vmem:[#allocation98_spill] sm:$0xff] }
 0x397   :  { %1986 = vmatpush.bf16.msrb.mxu1 %v6356_v53  ;;  %2012 = vmatpush.bf16.msra.mxu3 %v6357_v19  ;;  %v6367_v53 = vld [vmem:[#allocation149_spill] sm:$0xff]  ;;  %v6368_v19 = vld [vmem:[#allocation95_spill] sm:$0xff] }
 0x399   :  { %1975 = vmatpush.bf16.msrb.mxu0 %v6358_v40  ;;  %2001 = vmatpush.bf16.msra.mxu2 %v6359_v47  ;;  %v6369_v40 = vld [vmem:[#allocation148_spill] sm:$0xff]  ;;  %v6370_v47 = vld [vmem:[#allocation102_spill] sm:$0xff] }
 0x39b   :  { %1987 = vmatpush.bf16.msrb.mxu1 %v6360_v20  ;;  %2013 = vmatpush.bf16.msra.mxu3 %v6361_v55  ;;  %v6371_v20 = vld [vmem:[#allocation151_spill] sm:$0xff] }
 0x39c   :  { %v6372_v55 = vld [vmem:[#allocation99_spill] sm:$0xff] }
 0x39d   :  { %1976 = vmatpush.bf16.msrb.mxu0 %v6362_v7  ;;  %2002 = vmatpush.bf16.msra.mxu2 %v6363_v21  ;;  %v6373_v7 = vld [vmem:[#allocation150_spill] sm:$0xff]  ;;  %v6374_v21 = vld [vmem:[#allocation108_spill] sm:$0xff] }
 0x39f   :  { %1988 = vmatpush.bf16.msrb.mxu1 %v6364_v32  ;;  %2014 = vmatpush.bf16.msra.mxu3 %v6365_v4  ;;  %v6375_v32 = vld [vmem:[#allocation153_spill] sm:$0xff]  ;;  %v6376_v4 = vld [vmem:[#allocation103_spill] sm:$0xff] }
 0x3a1   :  { %1977 = vmatpush.bf16.msrb.mxu0 %v6366_v58  ;;  %2003 = vmatpush.bf16.msra.mxu2 %v6367_v53  ;;  %v6377_v58 = vld [vmem:[#allocation152_spill] sm:$0xff]  ;;  %v6378_v53 = vld [vmem:[#allocation111_spill] sm:$0xff] }
 0x3a3   :  { %1989 = vmatpush.bf16.msrb.mxu1 %v6368_v19  ;;  %2015 = vmatpush.bf16.msra.mxu3 %v6369_v40  ;;  %v6379_v19 = vld [vmem:[#allocation154_spill] sm:$0xff] }
 0x3a5   :  { %1978 = vmatpush.bf16.msrb.mxu0 %v6370_v47  ;;  %2004 = vmatpush.bf16.msra.mxu2 %v6371_v20 }
 0x3a7   :  { %1990 = vmatpush.bf16.msrb.mxu1 %v6372_v55  ;;  %2016 = vmatpush.bf16.msra.mxu3 %v6373_v7  ;;  %v6380_v55 = vld [vmem:[#allocation36_spill] sm:$0xff] }
 0x3a9   :  { %1979 = vmatpush.bf16.msrb.mxu0 %v6374_v21  ;;  %2005 = vmatpush.bf16.msra.mxu2 %v6375_v32 }
 0x3ab   :  { %1991 = vmatpush.bf16.msrb.mxu1 %v6376_v4  ;;  %2017 = vmatpush.bf16.msra.mxu3 %v6377_v58  ;;  %v6381_v4 = vld [vmem:[#allocation37_spill] sm:$0xff] }
 0x3af   :  { %1992 = vmatpush.bf16.msrb.mxu1 %v6378_v53  ;;  %2018 = vmatpush.bf16.msra.mxu3 %v6379_v19 }
 0x3c9   :  { %v1670_v40 = vpop.f32.mrf.mxu0 }
 0x3cf   :  { %v1683_v47 = vpop.f32.mrf.mxu1  ;;  %v1696_v34 = vpop.f32.mrf.mxu2 }
 0x3d0   :  { %v1684_v20 = vadd.f32 %v1683_v47, %v1670_v40 }
 0x3d1   :  { %v1672_v12 = vpop.f32.mrf.mxu0 }
 0x3d2   :  { %v1765_v26 = vadd.f32 %v1684_v20, %v6380_v55 }
 0x3d4   :  { %v3867_v7 = vmul.f32 -1.442695, %v1765_v26  ;;  %v6382_v26 = vld [vmem:[#allocation38_spill] sm:$0xff] }
 0x3d5   :  { %v1709_v30 = vpop.f32.mrf.mxu3 }
 0x3d6   :  { %4124 = vpow2.f32 %v3867_v7  ;;  %v1710_v21 = vadd.f32 %v1709_v30, %v1696_v34 }
 0x3d7   :  { %v1685_v32 = vpop.f32.mrf.mxu1  ;;  %v1698_v48 = vpop.f32.mrf.mxu2 }
 0x3d8   :  { %v1766_v24 = vadd.f32 %v1710_v21, %v6381_v4 }
 0x3d9   :  { %v1722_v58 = vpop.f32.mrf.mxu0 }
 0x3da   :  { %v3868_v10 = vmul.f32 -1.442695, %v1766_v24 }
 0x3dc   :  { %v4125_v53 = vpop.eup %4124  ;;  %4126 = vpow2.f32 %v3868_v10 }
 0x3dd   :  { %v1773_v19 = vadd.f32 1.0, %v4125_v53  ;;  %v1711_v51 = vpop.f32.mrf.mxu3  ;;  %v6383_v53 = vld [vmem:[#allocation39_spill] sm:$0xff] }
 0x3df   :  { %4128 = vrcp.f32 %v1773_v19  ;;  %v1735_v25 = vpop.f32.mrf.mxu1  ;;  %v1748_v40 = vpop.f32.mrf.mxu2  ;;  %vm1780_vm9 = vweird.f32 %v1773_v19 }
 0x3e0   :  { %v1736_v12 = vadd.f32 %v1735_v25, %v1722_v58 }
 0x3e1   :  { %v1724_v47 = vpop.f32.mrf.mxu0 }
 0x3e2   :  { %v4127_v20 = vpop.eup %4126  ;;  %v1805_v55 = vadd.f32 %v1736_v12, %v6382_v26  ;;  %v1786_v12 = vand.u32 2147483648, %v1773_v19  ;;  %v1784_v26 = vand.u32 2147483647, %v1773_v19 }
 0x3e3   :  { %v1774_v7 = vadd.f32 1.0, %v4127_v20 }
 0x3e4   :  { %v3869_v30 = vmul.f32 -1.442695, %v1805_v55  ;;  %vm1785_vm11 = vcmp.eq.f32.partialorder %v1784_v26, 8.507059e+37 }
 0x3e5   :  { %v4129_v34 = vpop.eup %4128  ;;  %4130 = vrcp.f32 %v1774_v7  ;;  %v1761_v48 = vpop.f32.mrf.mxu3  ;;  %vm1795_vm13 = vweird.f32 %v1774_v7  ;;  %v1799_v49 = vand.u32 2147483647, %v1774_v7 }
 0x3e6   :  { %4132 = vpow2.f32 %v3869_v30  ;;  %v1762_v21 = vadd.f32 %v1761_v48, %v1748_v40  ;;  %v1776_v24 = vmul.f32 %v4129_v34, %v1773_v19  ;;  %vm1781_vm8 = vweird.f32 %v4129_v34 }
 0x3e7   :  { %v1737_v32 = vpop.f32.mrf.mxu1  ;;  %v1750_v10 = vpop.f32.mrf.mxu2  ;;  %vm1782_vm10 = vmor %vm1780_vm9, %vm1781_vm8  ;;  %vm1800_vm15 = vcmp.eq.f32.partialorder %v1799_v49, 8.507059e+37 }
 0x3e8   :  { %v1806_v51 = vadd.f32 %v1762_v21, %v6383_v53  ;;  %v1777_v4 = vsub.f32 1.0, %v1776_v24  ;;  %v1787_v24 = vor.u32 1.1754944e-38, %v1786_v12 }
 0x3e9   :  { %v1854_v13 = vpop.f32.mrf.mxu0 }
 0x3ea   :  { %v3870_v16 = vmul.f32 -1.442695, %v1806_v51  ;;  %v1778_v25 = vmul.f32 %v4129_v34, %v1777_v4  ;;  %v1855_v48 = vadd.f32 %v1854_v13, %v6315_v8  ;;  %v6384_v13 = vld [vmem:[#allocation64_spill] sm:$0xff] }
 0x3eb   :  { %v4131_v58 = vpop.eup %4130 }
 0x3ec   :  { %v4133_v47 = vpop.eup %4132  ;;  %4134 = vpow2.f32 %v3870_v16  ;;  %v1779_v20 = vadd.f32 %v4129_v34, %v1778_v25  ;;  %v1791_v55 = vmul.f32 %v4131_v58, %v1774_v7  ;;  %vm1796_vm12 = vweird.f32 %v4131_v58 }
 0x3ed   :  { %v1813_v30 = vadd.f32 1.0, %v4133_v47  ;;  %v1763_v40 = vpop.f32.mrf.mxu3  ;;  %v1801_v47 = vand.u32 2147483648, %v1774_v7  ;;  %vm1797_vm14 = vmor %vm1795_vm13, %vm1796_vm12 }
 0x3ee   :  { %v1783_v32 = vsel %vm1782_vm10, %v4129_v34, %v1779_v20  ;;  %v1792_v21 = vsub.f32 1.0, %v1791_v55 }
 0x3ef   :  { %4136 = vrcp.f32 %v1813_v30  ;;  %v1867_v10 = vpop.f32.mrf.mxu1  ;;  %v1880_v53 = vpop.f32.mrf.mxu2  ;;  %v1788_v28 = vsel %vm1785_vm11, %v1787_v24, %v1783_v32  ;;  %vm1820_vm1 = vweird.f32 %v1813_v30 }
 0x3f0   :  { %v1868_v51 = vadd.f32 %v1867_v10, %v1855_v48  ;;  %v1793_v4 = vmul.f32 %v4131_v58, %v1792_v21  ;;  %v1881_v12 = vadd.f32 %v1880_v53, %v6260_v31 }
 0x3f1   :  { %v1856_v14 = vpop.f32.mrf.mxu0 }
 0x3f2   :  { %v4135_v16 = vpop.eup %4134  ;;  %v1897_v19 = vmul.f32 %v1868_v51, %v1788_v28  ;;  %v1794_v25 = vadd.f32 %v4131_v58, %v1793_v4  ;;  %v1802_v14 = vor.u32 1.1754944e-38, %v1801_v47  ;;  %v1826_v51 = vand.u32 2147483648, %v1813_v30 }
 0x3f3   :  { %v1814_v40 = vadd.f32 1.0, %v4135_v16  ;;  %v1824_v16 = vand.u32 2147483647, %v1813_v30 }
 0x3f4   :  { %v1899_v34 = vadd.f32 %v1897_v19, %v6384_v13  ;;  %v1798_v26 = vsel %vm1797_vm14, %v4131_v58, %v1794_v25  ;;  %v6385_v13 = vld [vmem:[#allocation65_spill] sm:$0xff]  ;;  %v1827_v47 = vor.u32 1.1754944e-38, %v1826_v51 }
 0x3f5   :  { %v4137_v20 = vpop.eup %4136  ;;  %4138 = vrcp.f32 %v1814_v40  ;;  %v1893_v55 = vpop.f32.mrf.mxu3  ;;  %v1803_v10 = vsel %vm1800_vm15, %v1802_v14, %v1798_v26  ;;  %vm1825_vm3 = vcmp.eq.f32.partialorder %v1824_v16, 8.507059e+37  ;;  %vm1835_vm5 = vweird.f32 %v1814_v40  ;;  %v6387_v16 = vld [vmem:[#allocation77_spill] sm:$0xff] }
 0x3f6   :  { %v1816_v48 = vmul.f32 %v4137_v20, %v1813_v30  ;;  %4140 = vtanh.f32 %v1899_v34  ;;  %v1894_v32 = vadd.f32 %v1893_v55, %v1881_v12  ;;  %vm1821_vm0 = vweird.f32 %v4137_v20 }
 0x3f7   :  { %v1869_v28 = vpop.f32.mrf.mxu1  ;;  %v1882_v21 = vpop.f32.mrf.mxu2  ;;  %vm1822_vm2 = vmor %vm1820_vm1, %vm1821_vm0  ;;  %v1841_v55 = vand.u32 2147483648, %v1814_v40 }
 0x3f8   :  { %v1817_v24 = vsub.f32 1.0, %v1816_v48  ;;  %v1898_v7 = vmul.f32 %v1894_v32, %v1803_v10  ;;  %v1839_v28 = vand.u32 2147483647, %v1814_v40 }
 0x3f9   :  { %v1842_v10 = vor.u32 1.1754944e-38, %v1841_v55  ;;  %v6398_v55 = vld [vmem:[#allocation123_spill] sm:$0xff] }
 0x3fa   :  { %v1818_v4 = vmul.f32 %v4137_v20, %v1817_v24  ;;  %v1900_v8 = vadd.f32 %v1898_v7, %v6385_v13  ;;  %vm1840_vm7 = vcmp.eq.f32.partialorder %v1839_v28, 8.507059e+37  ;;  %v6389_v13 = vld [vmem:[#allocation83_spill] sm:$0xff] }
 0x3fb   :  { %v4139_v19 = vpop.eup %4138  ;;  %v6402_v28 = vld [vmem:[#allocation127_spill] sm:$0xff] }
 0x3fc   :  { %v4141_v53 = vpop.eup %4140  ;;  %v1831_v58 = vmul.f32 %v4139_v19, %v1814_v40  ;;  %v1819_v25 = vadd.f32 %v4137_v20, %v1818_v4  ;;  %4142 = vtanh.f32 %v1900_v8  ;;  %vm1836_vm4 = vweird.f32 %v4139_v19 }
 0x3fd   :  { %v1903_v49 = vsub.f32 %v5275_v22, %v4141_v53  ;;  %v1895_v34 = vpop.f32.mrf.mxu3  ;;  %vm1837_vm6 = vmor %vm1835_vm5, %vm1836_vm4 }
 0x3fe   :  { %v1832_v12 = vsub.f32 1.0, %v1831_v58  ;;  %v1823_v26 = vsel %vm1822_vm2, %v4137_v20, %v1819_v25  ;;  %v6391_v58 = vld [vmem:[#allocation79_spill] sm:$0xff]  ;;  %v6392_v25 = vld [vmem:[#allocation112_spill] sm:$0xff]  ;;  %v6395_v34 = vld [vmem:[#allocation85_spill] sm:$0xff] }
 0x3ff   :  { %v1828_v48 = vsel %vm1825_vm3, %v1827_v47, %v1823_v26  ;;  %v6393_v47 = vld [vmem:[#allocation88_spill] sm:$0xff] }
 0x400   :  { %v1833_v14 = vmul.f32 %v4139_v19, %v1832_v12  ;;  %v1905_v32 = vmul.f32 %v1903_v49, %v1828_v48  ;;  %v6394_v49 = vld [vmem:[#allocation119_spill] sm:$0xff]  ;;  %v6396_v12 = vld [vmem:[#allocation116_spill] sm:$0xff]  ;;  %v6399_v48 = vld [vmem:[#allocation89_spill] sm:$0xff] }
 0x401   :  { %v6397_v26 = vld [vmem:[#allocation92_spill] sm:$0xff] }
 0x402   :  { %v5389_v21 = vadd.f32 %v4141_v53, %v1905_v32  ;;  %v1834_v30 = vadd.f32 %v4139_v19, %v1833_v14  ;;  %v4143_v24 = vpop.eup %4142  ;;  %v6390_v53 = vld [vmem:[#allocation115_spill] sm:$0xff]  ;;  %v6400_v14 = vld [vmem:[#allocation120_spill] sm:$0xff] }
 0x403   :  { %v1904_v20 = vsub.f32 %v5282_v52, %v4143_v24  ;;  %v6386_v52 = vld [vmem:[#allocation158_spill] sm:$0xff]  ;;  %v6401_v32 = vld [vmem:[#allocation96_spill] sm:$0xff] }
 0x404   :  { %v1918_v8 = vpack.c.bf16 %v5389_v21, %v5389_v21  ;;  %v1838_v22 = vsel %vm1837_vm6, %v4139_v19, %v1834_v30  ;;  %v6388_v19 = vld [vmem:[#allocation107_spill] sm:$0xff]  ;;  %v6403_v30 = vld [vmem:[#allocation93_spill] sm:$0xff] }
 0x405   :  { %v1843_v51 = vsel %vm1840_vm7, %v1842_v10, %v1838_v22  ;;  %v6405_v10 = vld [vmem:[#allocation100_spill] sm:$0xff]  ;;  %v6407_v22 = vld [vmem:[#allocation97_spill] sm:$0xff] }
 0x406   :  { %v1906_v7 = vmul.f32 %v1904_v20, %v1843_v51  ;;  %1928 = vmatmul.bf16.vlgmr.msra.gmra.mxu0 %v1918_v8  ;;  %1954 = vmatmul.bf16.vlgmr.msrb.gmra.mxu2 %v1918_v8  ;;  %v6408_v20 = vld [vmem:[#allocation128_spill] sm:$0xff] }
 0x407   :  { %2104 = vmatpush.bf16.msra.mxu0 %v6251_v44  ;;  %2130 = vmatpush.bf16.msrb.mxu2 %v5044_v18  ;;  %v6409_v51 = vld [vmem:[#allocation104_spill] sm:$0xff] }
 0x408   :  { %v5396_v40 = vadd.f32 %v4143_v24, %v1906_v7  ;;  %v6404_v24 = vld [vmem:[#allocation124_spill] sm:$0xff]  ;;  %v6410_v7 = vld [vmem:[#allocation134_spill] sm:$0xff] }
 0x40a   :  { %v1919_v4 = vpack.c.bf16 %v5396_v40, %v5396_v40 }
 0x40b   :  { %2105 = vmatpush.bf16.msra.mxu0 %v6252_v61  ;;  %2131 = vmatpush.bf16.msrb.mxu2 %v5053_v38 }
 0x40c   :  { %1941 = vmatmul.bf16.vlgmr.msra.gmra.mxu1 %v1919_v4  ;;  %1967 = vmatmul.bf16.vlgmr.msrb.gmra.mxu3 %v1919_v4 }
 0x40d   :  { %2117 = vmatpush.bf16.msra.mxu1 %v6265_v2  ;;  %2143 = vmatpush.bf16.msrb.mxu3 %v5046_v37 }
 0x40f   :  { %2106 = vmatpush.bf16.msra.mxu0 %v6254_v6  ;;  %2132 = vmatpush.bf16.msrb.mxu2 %v5064_v1 }
 0x411   :  { %2118 = vmatpush.bf16.msra.mxu1 %v6266_v3  ;;  %2144 = vmatpush.bf16.msrb.mxu3 %v5056_v29 }
 0x413   :  { %2107 = vmatpush.bf16.msra.mxu0 %v6255_v15  ;;  %2133 = vmatpush.bf16.msrb.mxu2 %v5073_v33 }
 0x415   :  { %2119 = vmatpush.bf16.msra.mxu1 %v6267_v9  ;;  %2145 = vmatpush.bf16.msrb.mxu3 %v5067_v56 }
 0x416   :  { %1980 = vmatmul.bf16.vlgmr.msrb.gmra.mxu0 %v1918_v8  ;;  %2006 = vmatmul.bf16.vlgmr.msra.gmra.mxu2 %v1918_v8 }
 0x417   :  { %2108 = vmatpush.bf16.msra.mxu0 %v6256_v57  ;;  %2134 = vmatpush.bf16.msrb.mxu2 %v5081_v54 }
 0x419   :  { %2120 = vmatpush.bf16.msra.mxu1 %v6268_v63  ;;  %2146 = vmatpush.bf16.msrb.mxu3 %v6269_v11 }
 0x41b   :  { %2109 = vmatpush.bf16.msra.mxu0 %v6257_v43  ;;  %2135 = vmatpush.bf16.msrb.mxu2 %v5089_v0 }
 0x41c   :  { %1993 = vmatmul.bf16.vlgmr.msrb.gmra.mxu1 %v1919_v4  ;;  %2019 = vmatmul.bf16.vlgmr.msra.gmra.mxu3 %v1919_v4 }
 0x41d   :  { %2121 = vmatpush.bf16.msra.mxu1 %v6270_v17  ;;  %2147 = vmatpush.bf16.msrb.mxu3 %v6271_v5 }
 0x41f   :  { %2110 = vmatpush.bf16.msra.mxu0 %v4962_v46  ;;  %2136 = vmatpush.bf16.msrb.mxu2 %v5097_v50 }
 0x421   :  { %2122 = vmatpush.bf16.msra.mxu1 %v6272_v35  ;;  %2148 = vmatpush.bf16.msrb.mxu3 %v5092_v59 }
 0x423   :  { %2111 = vmatpush.bf16.msra.mxu0 %v6318_v23  ;;  %2137 = vmatpush.bf16.msrb.mxu2 %v6319_v36 }
 0x425   :  { %2123 = vmatpush.bf16.msra.mxu1 %v6273_v27  ;;  %2149 = vmatpush.bf16.msrb.mxu3 %v5100_v42 }
 0x426   :  { %2112 = vmatmul.bf16.vlgmr.msra.gmra.mxu0 %v1918_v8  ;;  %2138 = vmatmul.bf16.vlgmr.msrb.gmra.mxu2 %v1918_v8  ;;  %v6406_v8 = vld [vmem:[#allocation131_spill] sm:$0xff] }
 0x427   :  { %2179 = vmatpush.bf16.msrb.mxu0 %v6320_v60  ;;  %2205 = vmatpush.bf16.msra.mxu2 %v6321_v62 }
 0x429   :  { %2124 = vmatpush.bf16.msra.mxu1 %v6275_v41  ;;  %2150 = vmatpush.bf16.msrb.mxu3 %v6386_v52 }
 0x42b   :  { %2180 = vmatpush.bf16.msrb.mxu0 %v6322_v39  ;;  %2206 = vmatpush.bf16.msra.mxu2 %v6323_v45 }
 0x42c   :  { %2125 = vmatmul.bf16.vlgmr.msra.gmra.mxu1 %v1919_v4  ;;  %2151 = vmatmul.bf16.vlgmr.msrb.gmra.mxu3 %v1919_v4  ;;  %v6411_v4 = vld [vmem:[#allocation80_spill] sm:$0xff] }
 0x42d   :  { %2192 = vmatpush.bf16.msrb.mxu1 %v6387_v16  ;;  %2218 = vmatpush.bf16.msra.mxu3 %v6388_v19 }
 0x42f   :  { %2181 = vmatpush.bf16.msrb.mxu0 %v6389_v13  ;;  %2207 = vmatpush.bf16.msra.mxu2 %v6390_v53 }
 0x431   :  { %2193 = vmatpush.bf16.msrb.mxu1 %v6391_v58  ;;  %2219 = vmatpush.bf16.msra.mxu3 %v6392_v25 }
 0x433   :  { %2182 = vmatpush.bf16.msrb.mxu0 %v6393_v47  ;;  %2208 = vmatpush.bf16.msra.mxu2 %v6394_v49 }
 0x435   :  { %2194 = vmatpush.bf16.msrb.mxu1 %v6395_v34  ;;  %2220 = vmatpush.bf16.msra.mxu3 %v6396_v12 }
 0x437   :  { %2183 = vmatpush.bf16.msrb.mxu0 %v6397_v26  ;;  %2209 = vmatpush.bf16.msra.mxu2 %v6398_v55 }
 0x439   :  { %2195 = vmatpush.bf16.msrb.mxu1 %v6399_v48  ;;  %2221 = vmatpush.bf16.msra.mxu3 %v6400_v14 }
 0x43b   :  { %2184 = vmatpush.bf16.msrb.mxu0 %v6401_v32  ;;  %2210 = vmatpush.bf16.msra.mxu2 %v6402_v28  ;;  %v6412_v32 = vld [vmem:[#allocation136_spill] sm:$0xff]  ;;  %v6413_v28 = vld [vmem:[#allocation101_spill] sm:$0xff] }
 0x43d   :  { %2196 = vmatpush.bf16.msrb.mxu1 %v6403_v30  ;;  %2222 = vmatpush.bf16.msra.mxu3 %v6404_v24  ;;  %v6414_v30 = vld [vmem:[#allocation132_spill] sm:$0xff]  ;;  %v6415_v24 = vld [vmem:[#allocation82_spill] sm:$0xff] }
 0x43f   :  { %2185 = vmatpush.bf16.msrb.mxu0 %v6405_v10  ;;  %2211 = vmatpush.bf16.msra.mxu2 %v6406_v8  ;;  %v6416_v10 = vld [vmem:[#allocation140_spill] sm:$0xff]  ;;  %v6417_v8 = vld [vmem:[#allocation105_spill] sm:$0xff] }
 0x441   :  { %2197 = vmatpush.bf16.msrb.mxu1 %v6407_v22  ;;  %2223 = vmatpush.bf16.msra.mxu3 %v6408_v20  ;;  %v6418_v22 = vld [vmem:[#allocation135_spill] sm:$0xff]  ;;  %v6419_v20 = vld [vmem:[#allocation81_spill] sm:$0xff] }
 0x443   :  { %2186 = vmatpush.bf16.msrb.mxu0 %v6409_v51  ;;  %2212 = vmatpush.bf16.msra.mxu2 %v6410_v7  ;;  %v6420_v51 = vld [vmem:[#allocation137_spill] sm:$0xff]  ;;  %v6421_v7 = vld [vmem:[#allocation86_spill] sm:$0xff] }
 0x445   :  { %2198 = vmatpush.bf16.msrb.mxu1 %v6413_v28  ;;  %2224 = vmatpush.bf16.msra.mxu3 %v6414_v30  ;;  %v6424_v28 = vld [vmem:[#allocation141_spill] sm:$0xff]  ;;  %v6425_v30 = vld [vmem:[#allocation90_spill] sm:$0xff] }
 0x447   :  { %2231 = vmatpush.bf16.msra.mxu0 %v6411_v4  ;;  %2257 = vmatpush.bf16.msrb.mxu2 %v6412_v32  ;;  %v6422_v4 = vld [vmem:[#allocation143_spill] sm:$0xff]  ;;  %v6423_v32 = vld [vmem:[#allocation84_spill] sm:$0xff] }
 0x449   :  { %2199 = vmatpush.bf16.msrb.mxu1 %v6417_v8  ;;  %2225 = vmatpush.bf16.msra.mxu3 %v6418_v22  ;;  %v6428_v8 = vld [vmem:[#allocation144_spill] sm:$0xff]  ;;  %v6429_v22 = vld [vmem:[#allocation94_spill] sm:$0xff] }
 0x44b   :  { %2232 = vmatpush.bf16.msra.mxu0 %v6415_v24  ;;  %2258 = vmatpush.bf16.msrb.mxu2 %v6416_v10  ;;  %v6426_v24 = vld [vmem:[#allocation145_spill] sm:$0xff]  ;;  %v6427_v10 = vld [vmem:[#allocation87_spill] sm:$0xff] }
 0x44d   :  { %2244 = vmatpush.bf16.msra.mxu1 %v6419_v20  ;;  %2270 = vmatpush.bf16.msrb.mxu3 %v6420_v51  ;;  %v6430_v20 = vld [vmem:[#allocation147_spill] sm:$0xff] }
 0x44e   :  { %v6431_v51 = vld [vmem:[#allocation91_spill] sm:$0xff] }
 0x44f   :  { %2233 = vmatpush.bf16.msra.mxu0 %v6421_v7  ;;  %2259 = vmatpush.bf16.msrb.mxu2 %v6422_v4  ;;  %v6432_v7 = vld [vmem:[#allocation146_spill] sm:$0xff] }
 0x450   :  { %v6433_v4 = vld [vmem:[#allocation98_spill] sm:$0xff] }
 0x451   :  { %2245 = vmatpush.bf16.msra.mxu1 %v6423_v32  ;;  %2271 = vmatpush.bf16.msrb.mxu3 %v6424_v28  ;;  %v6434_v32 = vld [vmem:[#allocation149_spill] sm:$0xff]  ;;  %v6435_v28 = vld [vmem:[#allocation95_spill] sm:$0xff] }
 0x453   :  { %2234 = vmatpush.bf16.msra.mxu0 %v6425_v30  ;;  %2260 = vmatpush.bf16.msrb.mxu2 %v6426_v24  ;;  %v6436_v30 = vld [vmem:[#allocation148_spill] sm:$0xff]  ;;  %v6437_v24 = vld [vmem:[#allocation102_spill] sm:$0xff] }
 0x455   :  { %2246 = vmatpush.bf16.msra.mxu1 %v6427_v10  ;;  %2272 = vmatpush.bf16.msrb.mxu3 %v6428_v8  ;;  %v6438_v10 = vld [vmem:[#allocation151_spill] sm:$0xff] }
 0x456   :  { %v6439_v8 = vld [vmem:[#allocation99_spill] sm:$0xff] }
 0x457   :  { %2235 = vmatpush.bf16.msra.mxu0 %v6429_v22  ;;  %2261 = vmatpush.bf16.msrb.mxu2 %v6430_v20  ;;  %v6440_v22 = vld [vmem:[#allocation150_spill] sm:$0xff]  ;;  %v6441_v20 = vld [vmem:[#allocation108_spill] sm:$0xff] }
 0x459   :  { %2247 = vmatpush.bf16.msra.mxu1 %v6431_v51  ;;  %2273 = vmatpush.bf16.msrb.mxu3 %v6432_v7  ;;  %v6442_v51 = vld [vmem:[#allocation153_spill] sm:$0xff]  ;;  %v6443_v7 = vld [vmem:[#allocation103_spill] sm:$0xff] }
 0x45b   :  { %2236 = vmatpush.bf16.msra.mxu0 %v6433_v4  ;;  %2262 = vmatpush.bf16.msrb.mxu2 %v6434_v32  ;;  %v6444_v4 = vld [vmem:[#allocation152_spill] sm:$0xff]  ;;  %v6445_v32 = vld [vmem:[#allocation111_spill] sm:$0xff] }
 0x45d   :  { %2248 = vmatpush.bf16.msra.mxu1 %v6435_v28  ;;  %2274 = vmatpush.bf16.msrb.mxu3 %v6436_v30  ;;  %v6446_v28 = vld [vmem:[#allocation154_spill] sm:$0xff] }
 0x45f   :  { %2237 = vmatpush.bf16.msra.mxu0 %v6437_v24  ;;  %2263 = vmatpush.bf16.msrb.mxu2 %v6438_v10 }
 0x461   :  { %2249 = vmatpush.bf16.msra.mxu1 %v6439_v8  ;;  %2275 = vmatpush.bf16.msrb.mxu3 %v6440_v22  ;;  %v6447_v8 = vld [vmem:[#allocation40_spill] sm:$0xff] }
 0x463   :  { %2238 = vmatpush.bf16.msra.mxu0 %v6441_v20  ;;  %2264 = vmatpush.bf16.msrb.mxu2 %v6442_v51 }
 0x465   :  { %2250 = vmatpush.bf16.msra.mxu1 %v6443_v7  ;;  %2276 = vmatpush.bf16.msrb.mxu3 %v6444_v4  ;;  %v6448_v7 = vld [vmem:[#allocation41_spill] sm:$0xff] }
 0x469   :  { %2251 = vmatpush.bf16.msra.mxu1 %v6445_v32  ;;  %2277 = vmatpush.bf16.msrb.mxu3 %v6446_v28 }
 0x483   :  { %v1929_v30 = vpop.f32.mrf.mxu0 }
 0x489   :  { %v1942_v24 = vpop.f32.mrf.mxu1  ;;  %v1955_v14 = vpop.f32.mrf.mxu2 }
 0x48a   :  { %v1943_v10 = vadd.f32 %v1942_v24, %v1929_v30 }
 0x48b   :  { %v1931_v48 = vpop.f32.mrf.mxu0 }
 0x48c   :  { %v2024_v55 = vadd.f32 %v1943_v10, %v6447_v8 }
 0x48e   :  { %v3871_v22 = vmul.f32 -1.442695, %v2024_v55  ;;  %v6449_v55 = vld [vmem:[#allocation42_spill] sm:$0xff] }
 0x48f   :  { %v1968_v26 = vpop.f32.mrf.mxu3 }
 0x490   :  { %4144 = vpow2.f32 %v3871_v22  ;;  %v1969_v20 = vadd.f32 %v1968_v26, %v1955_v14 }
 0x491   :  { %v1944_v51 = vpop.f32.mrf.mxu1  ;;  %v1957_v12 = vpop.f32.mrf.mxu2 }
 0x492   :  { %v2025_v34 = vadd.f32 %v1969_v20, %v6448_v7 }
 0x493   :  { %v1981_v4 = vpop.f32.mrf.mxu0 }
 0x494   :  { %v3872_v49 = vmul.f32 -1.442695, %v2025_v34 }
 0x496   :  { %v4145_v32 = vpop.eup %4144  ;;  %4146 = vpow2.f32 %v3872_v49 }
 0x497   :  { %v2032_v28 = vadd.f32 1.0, %v4145_v32  ;;  %v1970_v47 = vpop.f32.mrf.mxu3  ;;  %v6450_v32 = vld [vmem:[#allocation43_spill] sm:$0xff] }
 0x499   :  { %4148 = vrcp.f32 %v2032_v28  ;;  %v1994_v25 = vpop.f32.mrf.mxu1  ;;  %v2007_v30 = vpop.f32.mrf.mxu2  ;;  %vm2039_vm9 = vweird.f32 %v2032_v28 }
 0x49a   :  { %v1995_v48 = vadd.f32 %v1994_v25, %v1981_v4 }
 0x49b   :  { %v1983_v24 = vpop.f32.mrf.mxu0 }
 0x49c   :  { %v4147_v10 = vpop.eup %4146  ;;  %v2064_v8 = vadd.f32 %v1995_v48, %v6449_v55  ;;  %v2045_v48 = vand.u32 2147483648, %v2032_v28  ;;  %v2043_v55 = vand.u32 2147483647, %v2032_v28 }
 0x49d   :  { %v2033_v22 = vadd.f32 1.0, %v4147_v10 }
 0x49e   :  { %v3873_v26 = vmul.f32 -1.442695, %v2064_v8  ;;  %vm2044_vm11 = vcmp.eq.f32.partialorder %v2043_v55, 8.507059e+37 }
 0x49f   :  { %v4149_v14 = vpop.eup %4148  ;;  %4150 = vrcp.f32 %v2033_v22  ;;  %v2020_v12 = vpop.f32.mrf.mxu3  ;;  %vm2054_vm13 = vweird.f32 %v2033_v22  ;;  %v2058_v52 = vand.u32 2147483647, %v2033_v22 }
 0x4a0   :  { %4152 = vpow2.f32 %v3873_v26  ;;  %v2021_v20 = vadd.f32 %v2020_v12, %v2007_v30  ;;  %v2035_v34 = vmul.f32 %v4149_v14, %v2032_v28  ;;  %vm2040_vm8 = vweird.f32 %v4149_v14  ;;  %v6451_v12 = vld [vmem:[#allocation26_spill] sm:$0xff] }
 0x4a1   :  { %v1996_v51 = vpop.f32.mrf.mxu1  ;;  %v2009_v49 = vpop.f32.mrf.mxu2  ;;  %vm2041_vm10 = vmor %vm2039_vm9, %vm2040_vm8  ;;  %vm2059_vm15 = vcmp.eq.f32.partialorder %v2058_v52, 8.507059e+37 }
 0x4a2   :  { %v2065_v47 = vadd.f32 %v2021_v20, %v6450_v32  ;;  %v2036_v7 = vsub.f32 1.0, %v2035_v34  ;;  %v2046_v34 = vor.u32 1.1754944e-38, %v2045_v48 }
 0x4a3   :  { %v2113_v58 = vpop.f32.mrf.mxu0 }
 0x4a4   :  { %v3874_v53 = vmul.f32 -1.442695, %v2065_v47  ;;  %v2037_v25 = vmul.f32 %v4149_v14, %v2036_v7  ;;  %v2114_v51 = vadd.f32 %v2113_v58, %v6451_v12  ;;  %v6452_v58 = vld [vmem:[#allocation66_spill] sm:$0xff] }
 0x4a5   :  { %v4151_v4 = vpop.eup %4150 }
 0x4a6   :  { %v4153_v24 = vpop.eup %4152  ;;  %4154 = vpow2.f32 %v3874_v53  ;;  %v2038_v10 = vadd.f32 %v4149_v14, %v2037_v25  ;;  %v2050_v8 = vmul.f32 %v4151_v4, %v2033_v22  ;;  %vm2055_vm12 = vweird.f32 %v4151_v4 }
 0x4a7   :  { %v2072_v26 = vadd.f32 1.0, %v4153_v24  ;;  %v2022_v30 = vpop.f32.mrf.mxu3  ;;  %v2060_v24 = vand.u32 2147483648, %v2033_v22  ;;  %vm2056_vm14 = vmor %vm2054_vm13, %vm2055_vm12 }
 0x4a8   :  { %v2042_v49 = vsel %vm2041_vm10, %v4149_v14, %v2038_v10  ;;  %v2051_v20 = vsub.f32 1.0, %v2050_v8 }
 0x4a9   :  { %4156 = vrcp.f32 %v2072_v26  ;;  %v2126_v32 = vpop.f32.mrf.mxu1  ;;  %v2139_v47 = vpop.f32.mrf.mxu2  ;;  %v2047_v19 = vsel %vm2044_vm11, %v2046_v34, %v2042_v49  ;;  %vm2079_vm1 = vweird.f32 %v2072_v26 }
 0x4aa   :  { %v2127_v7 = vadd.f32 %v2126_v32, %v2114_v51  ;;  %v2052_v13 = vmul.f32 %v4151_v4, %v2051_v20  ;;  %v2140_v48 = vadd.f32 %v2139_v47, %v6260_v31  ;;  %v2085_v32 = vand.u32 2147483648, %v2072_v26 }
 0x4ab   :  { %v2115_v16 = vpop.f32.mrf.mxu0 }
 0x4ac   :  { %v4155_v53 = vpop.eup %4154  ;;  %v2156_v28 = vmul.f32 %v2127_v7, %v2047_v19  ;;  %v2053_v25 = vadd.f32 %v4151_v4, %v2052_v13  ;;  %v2061_v16 = vor.u32 1.1754944e-38, %v2060_v24  ;;  %v2086_v24 = vor.u32 1.1754944e-38, %v2085_v32 }
 0x4ad   :  { %v2073_v30 = vadd.f32 1.0, %v4155_v53  ;;  %v2083_v53 = vand.u32 2147483647, %v2072_v26 }
 0x4ae   :  { %v2158_v14 = vadd.f32 %v2156_v28, %v6452_v58  ;;  %v2057_v55 = vsel %vm2056_vm14, %v4151_v4, %v2053_v25  ;;  %v6453_v58 = vld [vmem:[#allocation67_spill] sm:$0xff] }
 0x4af   :  { %v4157_v10 = vpop.eup %4156  ;;  %4158 = vrcp.f32 %v2073_v30  ;;  %v2152_v8 = vpop.f32.mrf.mxu3  ;;  %v2062_v34 = vsel %vm2059_vm15, %v2061_v16, %v2057_v55  ;;  %vm2084_vm3 = vcmp.eq.f32.partialorder %v2083_v53, 8.507059e+37  ;;  %vm2094_vm5 = vweird.f32 %v2073_v30  ;;  %v6455_v53 = vld [vmem:[#allocation77_spill] sm:$0xff] }
 0x4b0   :  { %v2075_v51 = vmul.f32 %v4157_v10, %v2072_v26  ;;  %4160 = vtanh.f32 %v2158_v14  ;;  %v2153_v49 = vadd.f32 %v2152_v8, %v2140_v48  ;;  %vm2080_vm0 = vweird.f32 %v4157_v10 }
 0x4b1   :  { %v2128_v19 = vpop.f32.mrf.mxu1  ;;  %v2141_v13 = vpop.f32.mrf.mxu2  ;;  %vm2081_vm2 = vmor %vm2079_vm1, %vm2080_vm0  ;;  %v2100_v8 = vand.u32 2147483648, %v2073_v30 }
 0x4b2   :  { %v2076_v20 = vsub.f32 1.0, %v2075_v51  ;;  %v2157_v22 = vmul.f32 %v2153_v49, %v2062_v34  ;;  %v2098_v19 = vand.u32 2147483647, %v2073_v30 }
 0x4b3   :  { %v2101_v34 = vor.u32 1.1754944e-38, %v2100_v8  ;;  %v6466_v8 = vld [vmem:[#allocation123_spill] sm:$0xff] }
 0x4b4   :  { %v2077_v7 = vmul.f32 %v4157_v10, %v2076_v20  ;;  %v2159_v12 = vadd.f32 %v2157_v22, %v6453_v58  ;;  %vm2099_vm7 = vcmp.eq.f32.partialorder %v2098_v19, 8.507059e+37  ;;  %v6457_v58 = vld [vmem:[#allocation83_spill] sm:$0xff] }
 0x4b5   :  { %v4159_v28 = vpop.eup %4158  ;;  %v6470_v19 = vld [vmem:[#allocation127_spill] sm:$0xff] }
 0x4b6   :  { %v4161_v47 = vpop.eup %4160  ;;  %v2090_v4 = vmul.f32 %v4159_v28, %v2073_v30  ;;  %v2078_v25 = vadd.f32 %v4157_v10, %v2077_v7  ;;  %4162 = vtanh.f32 %v2159_v12  ;;  %vm2095_vm4 = vweird.f32 %v4159_v28 }
 0x4b7   :  { %v2162_v52 = vsub.f32 %v5389_v21, %v4161_v47  ;;  %v2154_v14 = vpop.f32.mrf.mxu3  ;;  %vm2096_vm6 = vmor %vm2094_vm5, %vm2095_vm4 }
 0x4b8   :  { %v2091_v48 = vsub.f32 1.0, %v2090_v4  ;;  %v2082_v55 = vsel %vm2081_vm2, %v4157_v10, %v2078_v25  ;;  %v6459_v4 = vld [vmem:[#allocation79_spill] sm:$0xff]  ;;  %v6460_v25 = vld [vmem:[#allocation112_spill] sm:$0xff]  ;;  %v6463_v14 = vld [vmem:[#allocation85_spill] sm:$0xff] }
 0x4b9   :  { %v2087_v51 = vsel %vm2084_vm3, %v2086_v24, %v2082_v55  ;;  %v6461_v24 = vld [vmem:[#allocation88_spill] sm:$0xff] }
 0x4ba   :  { %v2092_v16 = vmul.f32 %v4159_v28, %v2091_v48  ;;  %v2164_v49 = vmul.f32 %v2162_v52, %v2087_v51  ;;  %v6462_v52 = vld [vmem:[#allocation119_spill] sm:$0xff]  ;;  %v6464_v48 = vld [vmem:[#allocation116_spill] sm:$0xff]  ;;  %v6467_v51 = vld [vmem:[#allocation89_spill] sm:$0xff] }
 0x4bb   :  { %v6465_v55 = vld [vmem:[#allocation92_spill] sm:$0xff] }
 0x4bc   :  { %v5503_v13 = vadd.f32 %v4161_v47, %v2164_v49  ;;  %v2093_v26 = vadd.f32 %v4159_v28, %v2092_v16  ;;  %v4163_v20 = vpop.eup %4162  ;;  %v6458_v47 = vld [vmem:[#allocation115_spill] sm:$0xff]  ;;  %v6468_v16 = vld [vmem:[#allocation120_spill] sm:$0xff] }
 0x4bd   :  { %v2163_v10 = vsub.f32 %v5396_v40, %v4163_v20  ;;  %v6454_v40 = vld [vmem:[#allocation158_spill] sm:$0xff]  ;;  %v6469_v49 = vld [vmem:[#allocation96_spill] sm:$0xff] }
 0x4be   :  { %v2177_v21 = vpack.c.bf16 %v5503_v13, %v5503_v13  ;;  %v2097_v12 = vsel %vm2096_vm6, %v4159_v28, %v2093_v26  ;;  %v6456_v28 = vld [vmem:[#allocation107_spill] sm:$0xff]  ;;  %v6471_v26 = vld [vmem:[#allocation93_spill] sm:$0xff] }
 0x4bf   :  { %v2102_v32 = vsel %vm2099_vm7, %v2101_v34, %v2097_v12  ;;  %v6473_v34 = vld [vmem:[#allocation100_spill] sm:$0xff]  ;;  %v6475_v12 = vld [vmem:[#allocation97_spill] sm:$0xff] }
 0x4c0   :  { %v2165_v22 = vmul.f32 %v2163_v10, %v2102_v32  ;;  %2187 = vmatmul.bf16.vlgmr.msrb.gmra.mxu0 %v2177_v21  ;;  %2213 = vmatmul.bf16.vlgmr.msra.gmra.mxu2 %v2177_v21  ;;  %v6476_v10 = vld [vmem:[#allocation128_spill] sm:$0xff] }
 0x4c1   :  { %2363 = vmatpush.bf16.msrb.mxu0 %v6251_v44  ;;  %2389 = vmatpush.bf16.msra.mxu2 %v5044_v18  ;;  %v6477_v32 = vld [vmem:[#allocation104_spill] sm:$0xff] }
 0x4c2   :  { %v5510_v30 = vadd.f32 %v4163_v20, %v2165_v22  ;;  %v6472_v20 = vld [vmem:[#allocation124_spill] sm:$0xff]  ;;  %v6478_v22 = vld [vmem:[#allocation134_spill] sm:$0xff] }
 0x4c4   :  { %v2178_v7 = vpack.c.bf16 %v5510_v30, %v5510_v30 }
 0x4c5   :  { %2364 = vmatpush.bf16.msrb.mxu0 %v6252_v61  ;;  %2390 = vmatpush.bf16.msra.mxu2 %v5053_v38 }
 0x4c6   :  { %2200 = vmatmul.bf16.vlgmr.msrb.gmra.mxu1 %v2178_v7  ;;  %2226 = vmatmul.bf16.vlgmr.msra.gmra.mxu3 %v2178_v7 }
 0x4c7   :  { %2376 = vmatpush.bf16.msrb.mxu1 %v6265_v2  ;;  %2402 = vmatpush.bf16.msra.mxu3 %v5046_v37 }
 0x4c9   :  { %2365 = vmatpush.bf16.msrb.mxu0 %v6254_v6  ;;  %2391 = vmatpush.bf16.msra.mxu2 %v5064_v1 }
 0x4cb   :  { %2377 = vmatpush.bf16.msrb.mxu1 %v6266_v3  ;;  %2403 = vmatpush.bf16.msra.mxu3 %v5056_v29 }
 0x4cd   :  { %2366 = vmatpush.bf16.msrb.mxu0 %v6255_v15  ;;  %2392 = vmatpush.bf16.msra.mxu2 %v5073_v33 }
 0x4cf   :  { %2378 = vmatpush.bf16.msrb.mxu1 %v6267_v9  ;;  %2404 = vmatpush.bf16.msra.mxu3 %v5067_v56 }
 0x4d0   :  { %2239 = vmatmul.bf16.vlgmr.msra.gmra.mxu0 %v2177_v21  ;;  %2265 = vmatmul.bf16.vlgmr.msrb.gmra.mxu2 %v2177_v21 }
 0x4d1   :  { %2367 = vmatpush.bf16.msrb.mxu0 %v6256_v57  ;;  %2393 = vmatpush.bf16.msra.mxu2 %v5081_v54 }
 0x4d3   :  { %2379 = vmatpush.bf16.msrb.mxu1 %v6268_v63  ;;  %2405 = vmatpush.bf16.msra.mxu3 %v6269_v11 }
 0x4d5   :  { %2368 = vmatpush.bf16.msrb.mxu0 %v6257_v43  ;;  %2394 = vmatpush.bf16.msra.mxu2 %v5089_v0 }
 0x4d6   :  { %2252 = vmatmul.bf16.vlgmr.msra.gmra.mxu1 %v2178_v7  ;;  %2278 = vmatmul.bf16.vlgmr.msrb.gmra.mxu3 %v2178_v7 }
 0x4d7   :  { %2380 = vmatpush.bf16.msrb.mxu1 %v6270_v17  ;;  %2406 = vmatpush.bf16.msra.mxu3 %v6271_v5 }
 0x4d9   :  { %2369 = vmatpush.bf16.msrb.mxu0 %v4962_v46  ;;  %2395 = vmatpush.bf16.msra.mxu2 %v5097_v50 }
 0x4db   :  { %2381 = vmatpush.bf16.msrb.mxu1 %v6272_v35  ;;  %2407 = vmatpush.bf16.msra.mxu3 %v5092_v59 }
 0x4dd   :  { %2370 = vmatpush.bf16.msrb.mxu0 %v6318_v23  ;;  %2396 = vmatpush.bf16.msra.mxu2 %v6319_v36 }
 0x4df   :  { %2382 = vmatpush.bf16.msrb.mxu1 %v6273_v27  ;;  %2408 = vmatpush.bf16.msra.mxu3 %v5100_v42 }
 0x4e0   :  { %2371 = vmatmul.bf16.vlgmr.msrb.gmra.mxu0 %v2177_v21  ;;  %2397 = vmatmul.bf16.vlgmr.msra.gmra.mxu2 %v2177_v21  ;;  %v6474_v21 = vld [vmem:[#allocation131_spill] sm:$0xff] }
 0x4e1   :  { %2438 = vmatpush.bf16.msra.mxu0 %v6320_v60  ;;  %2464 = vmatpush.bf16.msrb.mxu2 %v6321_v62 }
 0x4e3   :  { %2383 = vmatpush.bf16.msrb.mxu1 %v6275_v41  ;;  %2409 = vmatpush.bf16.msra.mxu3 %v6454_v40 }
 0x4e5   :  { %2439 = vmatpush.bf16.msra.mxu0 %v6322_v39  ;;  %2465 = vmatpush.bf16.msrb.mxu2 %v6323_v45 }
 0x4e6   :  { %2384 = vmatmul.bf16.vlgmr.msrb.gmra.mxu1 %v2178_v7  ;;  %2410 = vmatmul.bf16.vlgmr.msra.gmra.mxu3 %v2178_v7  ;;  %v6479_v7 = vld [vmem:[#allocation80_spill] sm:$0xff] }
 0x4e7   :  { %2451 = vmatpush.bf16.msra.mxu1 %v6455_v53  ;;  %2477 = vmatpush.bf16.msrb.mxu3 %v6456_v28 }
 0x4e9   :  { %2440 = vmatpush.bf16.msra.mxu0 %v6457_v58  ;;  %2466 = vmatpush.bf16.msrb.mxu2 %v6458_v47 }
 0x4eb   :  { %2452 = vmatpush.bf16.msra.mxu1 %v6459_v4  ;;  %2478 = vmatpush.bf16.msrb.mxu3 %v6460_v25 }
 0x4ed   :  { %2441 = vmatpush.bf16.msra.mxu0 %v6461_v24  ;;  %2467 = vmatpush.bf16.msrb.mxu2 %v6462_v52 }
 0x4ef   :  { %2453 = vmatpush.bf16.msra.mxu1 %v6463_v14  ;;  %2479 = vmatpush.bf16.msrb.mxu3 %v6464_v48 }
 0x4f1   :  { %2442 = vmatpush.bf16.msra.mxu0 %v6465_v55  ;;  %2468 = vmatpush.bf16.msrb.mxu2 %v6466_v8 }
 0x4f3   :  { %2454 = vmatpush.bf16.msra.mxu1 %v6467_v51  ;;  %2480 = vmatpush.bf16.msrb.mxu3 %v6468_v16 }
 0x4f5   :  { %2443 = vmatpush.bf16.msra.mxu0 %v6469_v49  ;;  %2469 = vmatpush.bf16.msrb.mxu2 %v6470_v19  ;;  %v6480_v49 = vld [vmem:[#allocation136_spill] sm:$0xff]  ;;  %v6481_v19 = vld [vmem:[#allocation101_spill] sm:$0xff] }
 0x4f7   :  { %2455 = vmatpush.bf16.msra.mxu1 %v6471_v26  ;;  %2481 = vmatpush.bf16.msrb.mxu3 %v6472_v20  ;;  %v6482_v26 = vld [vmem:[#allocation132_spill] sm:$0xff]  ;;  %v6483_v20 = vld [vmem:[#allocation82_spill] sm:$0xff] }
 0x4f9   :  { %2444 = vmatpush.bf16.msra.mxu0 %v6473_v34  ;;  %2470 = vmatpush.bf16.msrb.mxu2 %v6474_v21  ;;  %v6484_v34 = vld [vmem:[#allocation140_spill] sm:$0xff]  ;;  %v6485_v21 = vld [vmem:[#allocation105_spill] sm:$0xff] }
 0x4fb   :  { %2456 = vmatpush.bf16.msra.mxu1 %v6475_v12  ;;  %2482 = vmatpush.bf16.msrb.mxu3 %v6476_v10  ;;  %v6486_v12 = vld [vmem:[#allocation135_spill] sm:$0xff]  ;;  %v6487_v10 = vld [vmem:[#allocation81_spill] sm:$0xff] }
 0x4fd   :  { %2445 = vmatpush.bf16.msra.mxu0 %v6477_v32  ;;  %2471 = vmatpush.bf16.msrb.mxu2 %v6478_v22  ;;  %v6488_v32 = vld [vmem:[#allocation137_spill] sm:$0xff]  ;;  %v6489_v22 = vld [vmem:[#allocation86_spill] sm:$0xff] }
 0x4ff   :  { %2457 = vmatpush.bf16.msra.mxu1 %v6481_v19  ;;  %2483 = vmatpush.bf16.msrb.mxu3 %v6482_v26  ;;  %v6492_v19 = vld [vmem:[#allocation141_spill] sm:$0xff]  ;;  %v6493_v26 = vld [vmem:[#allocation90_spill] sm:$0xff] }
 0x501   :  { %2490 = vmatpush.bf16.msrb.mxu0 %v6479_v7  ;;  %2516 = vmatpush.bf16.msra.mxu2 %v6480_v49  ;;  %v6490_v7 = vld [vmem:[#allocation143_spill] sm:$0xff]  ;;  %v6491_v49 = vld [vmem:[#allocation84_spill] sm:$0xff] }
 0x503   :  { %2458 = vmatpush.bf16.msra.mxu1 %v6485_v21  ;;  %2484 = vmatpush.bf16.msrb.mxu3 %v6486_v12  ;;  %v6496_v21 = vld [vmem:[#allocation144_spill] sm:$0xff]  ;;  %v6497_v12 = vld [vmem:[#allocation94_spill] sm:$0xff] }
 0x505   :  { %2491 = vmatpush.bf16.msrb.mxu0 %v6483_v20  ;;  %2517 = vmatpush.bf16.msra.mxu2 %v6484_v34  ;;  %v6494_v20 = vld [vmem:[#allocation145_spill] sm:$0xff]  ;;  %v6495_v34 = vld [vmem:[#allocation87_spill] sm:$0xff] }
 0x507   :  { %2503 = vmatpush.bf16.msrb.mxu1 %v6487_v10  ;;  %2529 = vmatpush.bf16.msra.mxu3 %v6488_v32  ;;  %v6498_v10 = vld [vmem:[#allocation147_spill] sm:$0xff] }
 0x508   :  { %v6499_v32 = vld [vmem:[#allocation91_spill] sm:$0xff] }
 0x509   :  { %2492 = vmatpush.bf16.msrb.mxu0 %v6489_v22  ;;  %2518 = vmatpush.bf16.msra.mxu2 %v6490_v7  ;;  %v6500_v22 = vld [vmem:[#allocation146_spill] sm:$0xff] }
 0x50a   :  { %v6501_v7 = vld [vmem:[#allocation98_spill] sm:$0xff] }
 0x50b   :  { %2504 = vmatpush.bf16.msrb.mxu1 %v6491_v49  ;;  %2530 = vmatpush.bf16.msra.mxu3 %v6492_v19  ;;  %v6502_v49 = vld [vmem:[#allocation149_spill] sm:$0xff]  ;;  %v6503_v19 = vld [vmem:[#allocation95_spill] sm:$0xff] }
 0x50d   :  { %2493 = vmatpush.bf16.msrb.mxu0 %v6493_v26  ;;  %2519 = vmatpush.bf16.msra.mxu2 %v6494_v20  ;;  %v6504_v26 = vld [vmem:[#allocation148_spill] sm:$0xff]  ;;  %v6505_v20 = vld [vmem:[#allocation102_spill] sm:$0xff] }
 0x50f   :  { %2505 = vmatpush.bf16.msrb.mxu1 %v6495_v34  ;;  %2531 = vmatpush.bf16.msra.mxu3 %v6496_v21  ;;  %v6506_v34 = vld [vmem:[#allocation151_spill] sm:$0xff] }
 0x510   :  { %v6507_v21 = vld [vmem:[#allocation99_spill] sm:$0xff] }
 0x511   :  { %2494 = vmatpush.bf16.msrb.mxu0 %v6497_v12  ;;  %2520 = vmatpush.bf16.msra.mxu2 %v6498_v10  ;;  %v6508_v12 = vld [vmem:[#allocation150_spill] sm:$0xff]  ;;  %v6509_v10 = vld [vmem:[#allocation108_spill] sm:$0xff] }
 0x513   :  { %2506 = vmatpush.bf16.msrb.mxu1 %v6499_v32  ;;  %2532 = vmatpush.bf16.msra.mxu3 %v6500_v22  ;;  %v6510_v32 = vld [vmem:[#allocation153_spill] sm:$0xff]  ;;  %v6511_v22 = vld [vmem:[#allocation103_spill] sm:$0xff] }
 0x515   :  { %2495 = vmatpush.bf16.msrb.mxu0 %v6501_v7  ;;  %2521 = vmatpush.bf16.msra.mxu2 %v6502_v49  ;;  %v6512_v7 = vld [vmem:[#allocation152_spill] sm:$0xff]  ;;  %v6513_v49 = vld [vmem:[#allocation111_spill] sm:$0xff] }
 0x517   :  { %2507 = vmatpush.bf16.msrb.mxu1 %v6503_v19  ;;  %2533 = vmatpush.bf16.msra.mxu3 %v6504_v26  ;;  %v6514_v19 = vld [vmem:[#allocation154_spill] sm:$0xff] }
 0x519   :  { %2496 = vmatpush.bf16.msrb.mxu0 %v6505_v20  ;;  %2522 = vmatpush.bf16.msra.mxu2 %v6506_v34 }
 0x51b   :  { %2508 = vmatpush.bf16.msrb.mxu1 %v6507_v21  ;;  %2534 = vmatpush.bf16.msra.mxu3 %v6508_v12  ;;  %v6515_v21 = vld [vmem:[#allocation44_spill] sm:$0xff] }
 0x51d   :  { %2497 = vmatpush.bf16.msrb.mxu0 %v6509_v10  ;;  %2523 = vmatpush.bf16.msra.mxu2 %v6510_v32 }
 0x51f   :  { %2509 = vmatpush.bf16.msrb.mxu1 %v6511_v22  ;;  %2535 = vmatpush.bf16.msra.mxu3 %v6512_v7  ;;  %v6516_v22 = vld [vmem:[#allocation45_spill] sm:$0xff] }
 0x523   :  { %2510 = vmatpush.bf16.msrb.mxu1 %v6513_v49  ;;  %2536 = vmatpush.bf16.msra.mxu3 %v6514_v19 }
 0x53d   :  { %v2188_v26 = vpop.f32.mrf.mxu0 }
 0x543   :  { %v2201_v20 = vpop.f32.mrf.mxu1  ;;  %v2214_v16 = vpop.f32.mrf.mxu2 }
 0x544   :  { %v2202_v34 = vadd.f32 %v2201_v20, %v2188_v26 }
 0x545   :  { %v2190_v51 = vpop.f32.mrf.mxu0 }
 0x546   :  { %v2283_v8 = vadd.f32 %v2202_v34, %v6515_v21 }
 0x548   :  { %v3875_v12 = vmul.f32 -1.442695, %v2283_v8  ;;  %v6517_v8 = vld [vmem:[#allocation46_spill] sm:$0xff] }
 0x549   :  { %v2227_v55 = vpop.f32.mrf.mxu3 }
 0x54a   :  { %4164 = vpow2.f32 %v3875_v12  ;;  %v2228_v10 = vadd.f32 %v2227_v55, %v2214_v16 }
 0x54b   :  { %v2203_v32 = vpop.f32.mrf.mxu1  ;;  %v2216_v48 = vpop.f32.mrf.mxu2 }
 0x54c   :  { %v2284_v14 = vadd.f32 %v2228_v10, %v6516_v22 }
 0x54d   :  { %v2240_v7 = vpop.f32.mrf.mxu0 }
 0x54e   :  { %v3876_v52 = vmul.f32 -1.442695, %v2284_v14 }
 0x550   :  { %v4165_v49 = vpop.eup %4164  ;;  %4166 = vpow2.f32 %v3876_v52 }
 0x551   :  { %v2291_v19 = vadd.f32 1.0, %v4165_v49  ;;  %v2229_v24 = vpop.f32.mrf.mxu3  ;;  %v6518_v49 = vld [vmem:[#allocation47_spill] sm:$0xff] }
 0x553   :  { %4168 = vrcp.f32 %v2291_v19  ;;  %v2253_v25 = vpop.f32.mrf.mxu1  ;;  %v2266_v26 = vpop.f32.mrf.mxu2  ;;  %vm2298_vm9 = vweird.f32 %v2291_v19 }
 0x554   :  { %v2254_v51 = vadd.f32 %v2253_v25, %v2240_v7 }
 0x555   :  { %v2242_v20 = vpop.f32.mrf.mxu0 }
 0x556   :  { %v4167_v34 = vpop.eup %4166  ;;  %v2323_v21 = vadd.f32 %v2254_v51, %v6517_v8  ;;  %v2304_v51 = vand.u32 2147483648, %v2291_v19  ;;  %v2302_v8 = vand.u32 2147483647, %v2291_v19 }
 0x557   :  { %v2292_v12 = vadd.f32 1.0, %v4167_v34 }
 0x558   :  { %v3877_v55 = vmul.f32 -1.442695, %v2323_v21  ;;  %vm2303_vm11 = vcmp.eq.f32.partialorder %v2302_v8, 8.507059e+37 }
 0x559   :  { %v4169_v16 = vpop.eup %4168  ;;  %4170 = vrcp.f32 %v2292_v12  ;;  %v2279_v48 = vpop.f32.mrf.mxu3  ;;  %vm2313_vm13 = vweird.f32 %v2292_v12  ;;  %v2317_v40 = vand.u32 2147483647, %v2292_v12 }
 0x55a   :  { %4172 = vpow2.f32 %v3877_v55  ;;  %v2280_v10 = vadd.f32 %v2279_v48, %v2266_v26  ;;  %v2294_v14 = vmul.f32 %v4169_v16, %v2291_v19  ;;  %vm2299_vm8 = vweird.f32 %v4169_v16  ;;  %v6519_v48 = vld [vmem:[#allocation26_spill] sm:$0xff] }
 0x55b   :  { %v2255_v32 = vpop.f32.mrf.mxu1  ;;  %v2268_v52 = vpop.f32.mrf.mxu2  ;;  %vm2300_vm10 = vmor %vm2298_vm9, %vm2299_vm8  ;;  %vm2318_vm15 = vcmp.eq.f32.partialorder %v2317_v40, 8.507059e+37 }
 0x55c   :  { %v2324_v24 = vadd.f32 %v2280_v10, %v6518_v49  ;;  %v2295_v22 = vsub.f32 1.0, %v2294_v14  ;;  %v2305_v14 = vor.u32 1.1754944e-38, %v2304_v51 }
 0x55d   :  { %v2372_v4 = vpop.f32.mrf.mxu0 }
 0x55e   :  { %v3878_v47 = vmul.f32 -1.442695, %v2324_v24  ;;  %v2296_v25 = vmul.f32 %v4169_v16, %v2295_v22  ;;  %v2373_v32 = vadd.f32 %v2372_v4, %v6519_v48  ;;  %v6520_v4 = vld [vmem:[#allocation68_spill] sm:$0xff] }
 0x55f   :  { %v4171_v7 = vpop.eup %4170 }
 0x560   :  { %v4173_v20 = vpop.eup %4172  ;;  %4174 = vpow2.f32 %v3878_v47  ;;  %v2297_v34 = vadd.f32 %v4169_v16, %v2296_v25  ;;  %v2309_v21 = vmul.f32 %v4171_v7, %v2292_v12  ;;  %vm2314_vm12 = vweird.f32 %v4171_v7 }
 0x561   :  { %v2331_v55 = vadd.f32 1.0, %v4173_v20  ;;  %v2281_v26 = vpop.f32.mrf.mxu3  ;;  %v2319_v20 = vand.u32 2147483648, %v2292_v12  ;;  %vm2315_vm14 = vmor %vm2313_vm13, %vm2314_vm12 }
 0x562   :  { %v2301_v52 = vsel %vm2300_vm10, %v4169_v16, %v2297_v34  ;;  %v2310_v10 = vsub.f32 1.0, %v2309_v21 }
 0x563   :  { %4176 = vrcp.f32 %v2331_v55  ;;  %v2385_v49 = vpop.f32.mrf.mxu1  ;;  %v2398_v24 = vpop.f32.mrf.mxu2  ;;  %v2306_v28 = vsel %vm2303_vm11, %v2305_v14, %v2301_v52  ;;  %vm2338_vm1 = vweird.f32 %v2331_v55 }
 0x564   :  { %v2386_v22 = vadd.f32 %v2385_v49, %v2373_v32  ;;  %v2311_v58 = vmul.f32 %v4171_v7, %v2310_v10  ;;  %v2399_v51 = vadd.f32 %v2398_v24, %v6260_v31  ;;  %v2344_v49 = vand.u32 2147483648, %v2331_v55 }
 0x565   :  { %v2374_v53 = vpop.f32.mrf.mxu0 }
 0x566   :  { %v4175_v47 = vpop.eup %4174  ;;  %v2415_v19 = vmul.f32 %v2386_v22, %v2306_v28  ;;  %v2312_v25 = vadd.f32 %v4171_v7, %v2311_v58  ;;  %v2320_v53 = vor.u32 1.1754944e-38, %v2319_v20  ;;  %v2345_v20 = vor.u32 1.1754944e-38, %v2344_v49 }
 0x567   :  { %v2332_v26 = vadd.f32 1.0, %v4175_v47  ;;  %v2342_v47 = vand.u32 2147483647, %v2331_v55 }
 0x568   :  { %v2417_v16 = vadd.f32 %v2415_v19, %v6520_v4  ;;  %v2316_v8 = vsel %vm2315_vm14, %v4171_v7, %v2312_v25  ;;  %v6521_v4 = vld [vmem:[#allocation69_spill] sm:$0xff] }
 0x569   :  { %v4177_v34 = vpop.eup %4176  ;;  %4178 = vrcp.f32 %v2332_v26  ;;  %v2411_v21 = vpop.f32.mrf.mxu3  ;;  %v2321_v14 = vsel %vm2318_vm15, %v2320_v53, %v2316_v8  ;;  %vm2343_vm3 = vcmp.eq.f32.partialorder %v2342_v47, 8.507059e+37  ;;  %vm2353_vm5 = vweird.f32 %v2332_v26  ;;  %v6523_v47 = vld [vmem:[#allocation77_spill] sm:$0xff] }
 0x56a   :  { %v2334_v32 = vmul.f32 %v4177_v34, %v2331_v55  ;;  %4180 = vtanh.f32 %v2417_v16  ;;  %v2412_v52 = vadd.f32 %v2411_v21, %v2399_v51  ;;  %vm2339_vm0 = vweird.f32 %v4177_v34 }
 0x56b   :  { %v2387_v28 = vpop.f32.mrf.mxu1  ;;  %v2400_v58 = vpop.f32.mrf.mxu2  ;;  %vm2340_vm2 = vmor %vm2338_vm1, %vm2339_vm0  ;;  %v2359_v21 = vand.u32 2147483648, %v2332_v26 }
 0x56c   :  { %v2335_v10 = vsub.f32 1.0, %v2334_v32  ;;  %v2416_v12 = vmul.f32 %v2412_v52, %v2321_v14  ;;  %v2357_v28 = vand.u32 2147483647, %v2332_v26 }
 0x56d   :  { %v2360_v14 = vor.u32 1.1754944e-38, %v2359_v21  ;;  %v6534_v21 = vld [vmem:[#allocation123_spill] sm:$0xff] }
 0x56e   :  { %v2336_v22 = vmul.f32 %v4177_v34, %v2335_v10  ;;  %v2418_v48 = vadd.f32 %v2416_v12, %v6521_v4  ;;  %vm2358_vm7 = vcmp.eq.f32.partialorder %v2357_v28, 8.507059e+37  ;;  %v6525_v4 = vld [vmem:[#allocation83_spill] sm:$0xff] }
 0x56f   :  { %v4179_v19 = vpop.eup %4178  ;;  %v6538_v28 = vld [vmem:[#allocation127_spill] sm:$0xff] }
 0x570   :  { %v4181_v24 = vpop.eup %4180  ;;  %v2349_v7 = vmul.f32 %v4179_v19, %v2332_v26  ;;  %v2337_v25 = vadd.f32 %v4177_v34, %v2336_v22  ;;  %4182 = vtanh.f32 %v2418_v48  ;;  %vm2354_vm4 = vweird.f32 %v4179_v19 }
 0x571   :  { %v2421_v40 = vsub.f32 %v5503_v13, %v4181_v24  ;;  %v2413_v16 = vpop.f32.mrf.mxu3  ;;  %vm2355_vm6 = vmor %vm2353_vm5, %vm2354_vm4 }
 0x572   :  { %v2350_v51 = vsub.f32 1.0, %v2349_v7  ;;  %v2341_v8 = vsel %vm2340_vm2, %v4177_v34, %v2337_v25  ;;  %v6527_v7 = vld [vmem:[#allocation79_spill] sm:$0xff]  ;;  %v6528_v25 = vld [vmem:[#allocation112_spill] sm:$0xff]  ;;  %v6531_v16 = vld [vmem:[#allocation85_spill] sm:$0xff] }
 0x573   :  { %v2346_v32 = vsel %vm2343_vm3, %v2345_v20, %v2341_v8  ;;  %v6529_v20 = vld [vmem:[#allocation88_spill] sm:$0xff] }
 0x574   :  { %v2351_v53 = vmul.f32 %v4179_v19, %v2350_v51  ;;  %v2423_v52 = vmul.f32 %v2421_v40, %v2346_v32  ;;  %v6530_v40 = vld [vmem:[#allocation119_spill] sm:$0xff]  ;;  %v6532_v51 = vld [vmem:[#allocation116_spill] sm:$0xff]  ;;  %v6535_v32 = vld [vmem:[#allocation89_spill] sm:$0xff] }
 0x575   :  { %v6533_v8 = vld [vmem:[#allocation92_spill] sm:$0xff] }
 0x576   :  { %v5617_v58 = vadd.f32 %v4181_v24, %v2423_v52  ;;  %v2352_v55 = vadd.f32 %v4179_v19, %v2351_v53  ;;  %v4183_v10 = vpop.eup %4182  ;;  %v6526_v24 = vld [vmem:[#allocation115_spill] sm:$0xff]  ;;  %v6536_v53 = vld [vmem:[#allocation120_spill] sm:$0xff] }
 0x577   :  { %v2422_v34 = vsub.f32 %v5510_v30, %v4183_v10  ;;  %v6522_v30 = vld [vmem:[#allocation158_spill] sm:$0xff]  ;;  %v6537_v52 = vld [vmem:[#allocation96_spill] sm:$0xff] }
 0x578   :  { %v2436_v13 = vpack.c.bf16 %v5617_v58, %v5617_v58  ;;  %v2356_v48 = vsel %vm2355_vm6, %v4179_v19, %v2352_v55  ;;  %v6524_v19 = vld [vmem:[#allocation107_spill] sm:$0xff]  ;;  %v6539_v55 = vld [vmem:[#allocation93_spill] sm:$0xff] }
 0x579   :  { %v2361_v49 = vsel %vm2358_vm7, %v2360_v14, %v2356_v48  ;;  %v6541_v14 = vld [vmem:[#allocation100_spill] sm:$0xff]  ;;  %v6543_v48 = vld [vmem:[#allocation97_spill] sm:$0xff] }
 0x57a   :  { %v2424_v12 = vmul.f32 %v2422_v34, %v2361_v49  ;;  %2446 = vmatmul.bf16.vlgmr.msra.gmra.mxu0 %v2436_v13  ;;  %2472 = vmatmul.bf16.vlgmr.msrb.gmra.mxu2 %v2436_v13  ;;  %v6544_v34 = vld [vmem:[#allocation128_spill] sm:$0xff] }
 0x57b   :  { %2622 = vmatpush.bf16.msra.mxu0 %v6251_v44  ;;  %2648 = vmatpush.bf16.msrb.mxu2 %v5044_v18  ;;  %v6545_v49 = vld [vmem:[#allocation104_spill] sm:$0xff] }
 0x57c   :  { %v5624_v26 = vadd.f32 %v4183_v10, %v2424_v12  ;;  %v6540_v10 = vld [vmem:[#allocation124_spill] sm:$0xff]  ;;  %v6546_v12 = vld [vmem:[#allocation134_spill] sm:$0xff] }
 0x57e   :  { %v2437_v22 = vpack.c.bf16 %v5624_v26, %v5624_v26 }
 0x57f   :  { %2623 = vmatpush.bf16.msra.mxu0 %v6252_v61  ;;  %2649 = vmatpush.bf16.msrb.mxu2 %v5053_v38 }
 0x580   :  { %2459 = vmatmul.bf16.vlgmr.msra.gmra.mxu1 %v2437_v22  ;;  %2485 = vmatmul.bf16.vlgmr.msrb.gmra.mxu3 %v2437_v22 }
 0x581   :  { %2635 = vmatpush.bf16.msra.mxu1 %v6265_v2  ;;  %2661 = vmatpush.bf16.msrb.mxu3 %v5046_v37 }
 0x583   :  { %2624 = vmatpush.bf16.msra.mxu0 %v6254_v6  ;;  %2650 = vmatpush.bf16.msrb.mxu2 %v5064_v1 }
 0x585   :  { %2636 = vmatpush.bf16.msra.mxu1 %v6266_v3  ;;  %2662 = vmatpush.bf16.msrb.mxu3 %v5056_v29 }
 0x587   :  { %2625 = vmatpush.bf16.msra.mxu0 %v6255_v15  ;;  %2651 = vmatpush.bf16.msrb.mxu2 %v5073_v33 }
 0x589   :  { %2637 = vmatpush.bf16.msra.mxu1 %v6267_v9  ;;  %2663 = vmatpush.bf16.msrb.mxu3 %v5067_v56 }
 0x58a   :  { %2498 = vmatmul.bf16.vlgmr.msrb.gmra.mxu0 %v2436_v13  ;;  %2524 = vmatmul.bf16.vlgmr.msra.gmra.mxu2 %v2436_v13 }
 0x58b   :  { %2626 = vmatpush.bf16.msra.mxu0 %v6256_v57  ;;  %2652 = vmatpush.bf16.msrb.mxu2 %v5081_v54 }
 0x58d   :  { %2638 = vmatpush.bf16.msra.mxu1 %v6268_v63  ;;  %2664 = vmatpush.bf16.msrb.mxu3 %v6269_v11 }
 0x58f   :  { %2627 = vmatpush.bf16.msra.mxu0 %v6257_v43  ;;  %2653 = vmatpush.bf16.msrb.mxu2 %v5089_v0 }
 0x590   :  { %2511 = vmatmul.bf16.vlgmr.msrb.gmra.mxu1 %v2437_v22  ;;  %2537 = vmatmul.bf16.vlgmr.msra.gmra.mxu3 %v2437_v22 }
 0x591   :  { %2639 = vmatpush.bf16.msra.mxu1 %v6270_v17  ;;  %2665 = vmatpush.bf16.msrb.mxu3 %v6271_v5 }
 0x593   :  { %2628 = vmatpush.bf16.msra.mxu0 %v4962_v46  ;;  %2654 = vmatpush.bf16.msrb.mxu2 %v5097_v50 }
 0x595   :  { %2640 = vmatpush.bf16.msra.mxu1 %v6272_v35  ;;  %2666 = vmatpush.bf16.msrb.mxu3 %v5092_v59 }
 0x597   :  { %2629 = vmatpush.bf16.msra.mxu0 %v6318_v23  ;;  %2655 = vmatpush.bf16.msrb.mxu2 %v6319_v36 }
 0x599   :  { %2641 = vmatpush.bf16.msra.mxu1 %v6273_v27  ;;  %2667 = vmatpush.bf16.msrb.mxu3 %v5100_v42 }
 0x59a   :  { %2630 = vmatmul.bf16.vlgmr.msra.gmra.mxu0 %v2436_v13  ;;  %2656 = vmatmul.bf16.vlgmr.msrb.gmra.mxu2 %v2436_v13  ;;  %v6542_v13 = vld [vmem:[#allocation131_spill] sm:$0xff] }
 0x59b   :  { %2697 = vmatpush.bf16.msrb.mxu0 %v6320_v60  ;;  %2723 = vmatpush.bf16.msra.mxu2 %v6321_v62 }
 0x59d   :  { %2642 = vmatpush.bf16.msra.mxu1 %v6275_v41  ;;  %2668 = vmatpush.bf16.msrb.mxu3 %v6522_v30 }
 0x59f   :  { %2698 = vmatpush.bf16.msrb.mxu0 %v6322_v39  ;;  %2724 = vmatpush.bf16.msra.mxu2 %v6323_v45 }
 0x5a0   :  { %2643 = vmatmul.bf16.vlgmr.msra.gmra.mxu1 %v2437_v22  ;;  %2669 = vmatmul.bf16.vlgmr.msrb.gmra.mxu3 %v2437_v22  ;;  %v6547_v22 = vld [vmem:[#allocation80_spill] sm:$0xff] }
 0x5a1   :  { %2710 = vmatpush.bf16.msrb.mxu1 %v6523_v47  ;;  %2736 = vmatpush.bf16.msra.mxu3 %v6524_v19 }
 0x5a3   :  { %2699 = vmatpush.bf16.msrb.mxu0 %v6525_v4  ;;  %2725 = vmatpush.bf16.msra.mxu2 %v6526_v24 }
 0x5a5   :  { %2711 = vmatpush.bf16.msrb.mxu1 %v6527_v7  ;;  %2737 = vmatpush.bf16.msra.mxu3 %v6528_v25 }
 0x5a7   :  { %2700 = vmatpush.bf16.msrb.mxu0 %v6529_v20  ;;  %2726 = vmatpush.bf16.msra.mxu2 %v6530_v40 }
 0x5a9   :  { %2712 = vmatpush.bf16.msrb.mxu1 %v6531_v16  ;;  %2738 = vmatpush.bf16.msra.mxu3 %v6532_v51 }
 0x5ab   :  { %2701 = vmatpush.bf16.msrb.mxu0 %v6533_v8  ;;  %2727 = vmatpush.bf16.msra.mxu2 %v6534_v21 }
 0x5ad   :  { %2713 = vmatpush.bf16.msrb.mxu1 %v6535_v32  ;;  %2739 = vmatpush.bf16.msra.mxu3 %v6536_v53 }
 0x5af   :  { %2702 = vmatpush.bf16.msrb.mxu0 %v6537_v52  ;;  %2728 = vmatpush.bf16.msra.mxu2 %v6538_v28  ;;  %v6548_v52 = vld [vmem:[#allocation136_spill] sm:$0xff]  ;;  %v6549_v28 = vld [vmem:[#allocation101_spill] sm:$0xff] }
 0x5b1   :  { %2714 = vmatpush.bf16.msrb.mxu1 %v6539_v55  ;;  %2740 = vmatpush.bf16.msra.mxu3 %v6540_v10  ;;  %v6550_v55 = vld [vmem:[#allocation132_spill] sm:$0xff]  ;;  %v6551_v10 = vld [vmem:[#allocation82_spill] sm:$0xff] }
 0x5b3   :  { %2703 = vmatpush.bf16.msrb.mxu0 %v6541_v14  ;;  %2729 = vmatpush.bf16.msra.mxu2 %v6542_v13  ;;  %v6552_v14 = vld [vmem:[#allocation140_spill] sm:$0xff]  ;;  %v6553_v13 = vld [vmem:[#allocation105_spill] sm:$0xff] }
 0x5b5   :  { %2715 = vmatpush.bf16.msrb.mxu1 %v6543_v48  ;;  %2741 = vmatpush.bf16.msra.mxu3 %v6544_v34  ;;  %v6554_v48 = vld [vmem:[#allocation135_spill] sm:$0xff]  ;;  %v6555_v34 = vld [vmem:[#allocation81_spill] sm:$0xff] }
 0x5b7   :  { %2704 = vmatpush.bf16.msrb.mxu0 %v6545_v49  ;;  %2730 = vmatpush.bf16.msra.mxu2 %v6546_v12  ;;  %v6556_v49 = vld [vmem:[#allocation137_spill] sm:$0xff]  ;;  %v6557_v12 = vld [vmem:[#allocation86_spill] sm:$0xff] }
 0x5b9   :  { %2716 = vmatpush.bf16.msrb.mxu1 %v6549_v28  ;;  %2742 = vmatpush.bf16.msra.mxu3 %v6550_v55  ;;  %v6560_v28 = vld [vmem:[#allocation141_spill] sm:$0xff]  ;;  %v6561_v55 = vld [vmem:[#allocation90_spill] sm:$0xff] }
 0x5bb   :  { %2749 = vmatpush.bf16.msra.mxu0 %v6547_v22  ;;  %2775 = vmatpush.bf16.msrb.mxu2 %v6548_v52  ;;  %v6558_v22 = vld [vmem:[#allocation143_spill] sm:$0xff]  ;;  %v6559_v52 = vld [vmem:[#allocation84_spill] sm:$0xff] }
 0x5bd   :  { %2717 = vmatpush.bf16.msrb.mxu1 %v6553_v13  ;;  %2743 = vmatpush.bf16.msra.mxu3 %v6554_v48  ;;  %v6564_v13 = vld [vmem:[#allocation144_spill] sm:$0xff]  ;;  %v6565_v48 = vld [vmem:[#allocation94_spill] sm:$0xff] }
 0x5bf   :  { %2750 = vmatpush.bf16.msra.mxu0 %v6551_v10  ;;  %2776 = vmatpush.bf16.msrb.mxu2 %v6552_v14  ;;  %v6562_v10 = vld [vmem:[#allocation145_spill] sm:$0xff]  ;;  %v6563_v14 = vld [vmem:[#allocation87_spill] sm:$0xff] }
 0x5c1   :  { %2762 = vmatpush.bf16.msra.mxu1 %v6555_v34  ;;  %2788 = vmatpush.bf16.msrb.mxu3 %v6556_v49  ;;  %v6566_v34 = vld [vmem:[#allocation147_spill] sm:$0xff] }
 0x5c2   :  { %v6567_v49 = vld [vmem:[#allocation91_spill] sm:$0xff] }
 0x5c3   :  { %2751 = vmatpush.bf16.msra.mxu0 %v6557_v12  ;;  %2777 = vmatpush.bf16.msrb.mxu2 %v6558_v22  ;;  %v6568_v12 = vld [vmem:[#allocation146_spill] sm:$0xff] }
 0x5c4   :  { %v6569_v22 = vld [vmem:[#allocation98_spill] sm:$0xff] }
 0x5c5   :  { %2763 = vmatpush.bf16.msra.mxu1 %v6559_v52  ;;  %2789 = vmatpush.bf16.msrb.mxu3 %v6560_v28  ;;  %v6570_v52 = vld [vmem:[#allocation149_spill] sm:$0xff]  ;;  %v6571_v28 = vld [vmem:[#allocation95_spill] sm:$0xff] }
 0x5c7   :  { %2752 = vmatpush.bf16.msra.mxu0 %v6561_v55  ;;  %2778 = vmatpush.bf16.msrb.mxu2 %v6562_v10  ;;  %v6572_v55 = vld [vmem:[#allocation148_spill] sm:$0xff]  ;;  %v6573_v10 = vld [vmem:[#allocation102_spill] sm:$0xff] }
 0x5c9   :  { %2764 = vmatpush.bf16.msra.mxu1 %v6563_v14  ;;  %2790 = vmatpush.bf16.msrb.mxu3 %v6564_v13  ;;  %v6574_v14 = vld [vmem:[#allocation151_spill] sm:$0xff] }
 0x5ca   :  { %v6575_v13 = vld [vmem:[#allocation99_spill] sm:$0xff] }
 0x5cb   :  { %2753 = vmatpush.bf16.msra.mxu0 %v6565_v48  ;;  %2779 = vmatpush.bf16.msrb.mxu2 %v6566_v34  ;;  %v6576_v48 = vld [vmem:[#allocation150_spill] sm:$0xff]  ;;  %v6577_v34 = vld [vmem:[#allocation108_spill] sm:$0xff] }
 0x5cd   :  { %2765 = vmatpush.bf16.msra.mxu1 %v6567_v49  ;;  %2791 = vmatpush.bf16.msrb.mxu3 %v6568_v12  ;;  %v6578_v49 = vld [vmem:[#allocation153_spill] sm:$0xff]  ;;  %v6579_v12 = vld [vmem:[#allocation103_spill] sm:$0xff] }
 0x5cf   :  { %2754 = vmatpush.bf16.msra.mxu0 %v6569_v22  ;;  %2780 = vmatpush.bf16.msrb.mxu2 %v6570_v52  ;;  %v6580_v22 = vld [vmem:[#allocation152_spill] sm:$0xff]  ;;  %v6581_v52 = vld [vmem:[#allocation111_spill] sm:$0xff] }
 0x5d1   :  { %2766 = vmatpush.bf16.msra.mxu1 %v6571_v28  ;;  %2792 = vmatpush.bf16.msrb.mxu3 %v6572_v55  ;;  %v6582_v28 = vld [vmem:[#allocation154_spill] sm:$0xff] }
 0x5d3   :  { %2755 = vmatpush.bf16.msra.mxu0 %v6573_v10  ;;  %2781 = vmatpush.bf16.msrb.mxu2 %v6574_v14 }
 0x5d5   :  { %2767 = vmatpush.bf16.msra.mxu1 %v6575_v13  ;;  %2793 = vmatpush.bf16.msrb.mxu3 %v6576_v48  ;;  %v6583_v13 = vld [vmem:[#allocation48_spill] sm:$0xff] }
 0x5d7   :  { %2756 = vmatpush.bf16.msra.mxu0 %v6577_v34  ;;  %2782 = vmatpush.bf16.msrb.mxu2 %v6578_v49 }
 0x5d9   :  { %2768 = vmatpush.bf16.msra.mxu1 %v6579_v12  ;;  %2794 = vmatpush.bf16.msrb.mxu3 %v6580_v22  ;;  %v6584_v12 = vld [vmem:[#allocation49_spill] sm:$0xff] }
 0x5dd   :  { %2769 = vmatpush.bf16.msra.mxu1 %v6581_v52  ;;  %2795 = vmatpush.bf16.msrb.mxu3 %v6582_v28 }
 0x5f7   :  { %v2447_v55 = vpop.f32.mrf.mxu0 }
 0x5fd   :  { %v2460_v10 = vpop.f32.mrf.mxu1  ;;  %v2473_v53 = vpop.f32.mrf.mxu2 }
 0x5fe   :  { %v2461_v14 = vadd.f32 %v2460_v10, %v2447_v55 }
 0x5ff   :  { %v2449_v32 = vpop.f32.mrf.mxu0 }
 0x600   :  { %v2542_v21 = vadd.f32 %v2461_v14, %v6583_v13 }
 0x602   :  { %v3879_v48 = vmul.f32 -1.442695, %v2542_v21  ;;  %v6585_v21 = vld [vmem:[#allocation50_spill] sm:$0xff] }
 0x603   :  { %v2486_v8 = vpop.f32.mrf.mxu3 }
 0x604   :  { %4184 = vpow2.f32 %v3879_v48  ;;  %v2487_v34 = vadd.f32 %v2486_v8, %v2473_v53 }
 0x605   :  { %v2462_v49 = vpop.f32.mrf.mxu1  ;;  %v2475_v51 = vpop.f32.mrf.mxu2 }
 0x606   :  { %v2543_v16 = vadd.f32 %v2487_v34, %v6584_v12 }
 0x607   :  { %v2499_v22 = vpop.f32.mrf.mxu0 }
 0x608   :  { %v3880_v40 = vmul.f32 -1.442695, %v2543_v16 }
 0x60a   :  { %v4185_v52 = vpop.eup %4184  ;;  %4186 = vpow2.f32 %v3880_v40 }
 0x60b   :  { %v2550_v28 = vadd.f32 1.0, %v4185_v52  ;;  %v2488_v20 = vpop.f32.mrf.mxu3  ;;  %v6586_v52 = vld [vmem:[#allocation51_spill] sm:$0xff] }
 0x60d   :  { %4188 = vrcp.f32 %v2550_v28  ;;  %v2512_v25 = vpop.f32.mrf.mxu1  ;;  %v2525_v55 = vpop.f32.mrf.mxu2  ;;  %vm2557_vm9 = vweird.f32 %v2550_v28 }
 0x60e   :  { %v2513_v32 = vadd.f32 %v2512_v25, %v2499_v22 }
 0x60f   :  { %v2501_v10 = vpop.f32.mrf.mxu0 }
 0x610   :  { %v4187_v14 = vpop.eup %4186  ;;  %v2582_v13 = vadd.f32 %v2513_v32, %v6585_v21  ;;  %v2563_v32 = vand.u32 2147483648, %v2550_v28  ;;  %v2561_v21 = vand.u32 2147483647, %v2550_v28 }
 0x611   :  { %v2551_v48 = vadd.f32 1.0, %v4187_v14 }
 0x612   :  { %v3881_v8 = vmul.f32 -1.442695, %v2582_v13  ;;  %vm2562_vm11 = vcmp.eq.f32.partialorder %v2561_v21, 8.507059e+37 }
 0x613   :  { %v4189_v53 = vpop.eup %4188  ;;  %4190 = vrcp.f32 %v2551_v48  ;;  %v2538_v51 = vpop.f32.mrf.mxu3  ;;  %vm2572_vm13 = vweird.f32 %v2551_v48  ;;  %v2576_v30 = vand.u32 2147483647, %v2551_v48 }
 0x614   :  { %4192 = vpow2.f32 %v3881_v8  ;;  %v2539_v34 = vadd.f32 %v2538_v51, %v2525_v55  ;;  %v2553_v16 = vmul.f32 %v4189_v53, %v2550_v28  ;;  %vm2558_vm8 = vweird.f32 %v4189_v53  ;;  %v6587_v51 = vld [vmem:[#allocation26_spill] sm:$0xff] }
 0x615   :  { %v2514_v49 = vpop.f32.mrf.mxu1  ;;  %v2527_v40 = vpop.f32.mrf.mxu2  ;;  %vm2559_vm10 = vmor %vm2557_vm9, %vm2558_vm8  ;;  %vm2577_vm15 = vcmp.eq.f32.partialorder %v2576_v30, 8.507059e+37 }
 0x616   :  { %v2583_v20 = vadd.f32 %v2539_v34, %v6586_v52  ;;  %v2554_v12 = vsub.f32 1.0, %v2553_v16  ;;  %v2564_v16 = vor.u32 1.1754944e-38, %v2563_v32 }
 0x617   :  { %v2631_v7 = vpop.f32.mrf.mxu0 }
 0x618   :  { %v3882_v24 = vmul.f32 -1.442695, %v2583_v20  ;;  %v2555_v25 = vmul.f32 %v4189_v53, %v2554_v12  ;;  %v2632_v49 = vadd.f32 %v2631_v7, %v6587_v51  ;;  %v6588_v7 = vld [vmem:[#allocation70_spill] sm:$0xff] }
 0x619   :  { %v4191_v22 = vpop.eup %4190 }
 0x61a   :  { %v4193_v10 = vpop.eup %4192  ;;  %4194 = vpow2.f32 %v3882_v24  ;;  %v2556_v14 = vadd.f32 %v4189_v53, %v2555_v25  ;;  %v2568_v13 = vmul.f32 %v4191_v22, %v2551_v48  ;;  %vm2573_vm12 = vweird.f32 %v4191_v22 }
 0x61b   :  { %v2590_v8 = vadd.f32 1.0, %v4193_v10  ;;  %v2540_v55 = vpop.f32.mrf.mxu3  ;;  %v2578_v10 = vand.u32 2147483648, %v2551_v48  ;;  %vm2574_vm14 = vmor %vm2572_vm13, %vm2573_vm12 }
 0x61c   :  { %v2560_v40 = vsel %vm2559_vm10, %v4189_v53, %v2556_v14  ;;  %v2569_v34 = vsub.f32 1.0, %v2568_v13 }
 0x61d   :  { %4196 = vrcp.f32 %v2590_v8  ;;  %v2644_v52 = vpop.f32.mrf.mxu1  ;;  %v2657_v20 = vpop.f32.mrf.mxu2  ;;  %v2565_v19 = vsel %vm2562_vm11, %v2564_v16, %v2560_v40  ;;  %vm2597_vm1 = vweird.f32 %v2590_v8 }
 0x61e   :  { %v2645_v12 = vadd.f32 %v2644_v52, %v2632_v49  ;;  %v2570_v4 = vmul.f32 %v4191_v22, %v2569_v34  ;;  %v2658_v32 = vadd.f32 %v2657_v20, %v6260_v31  ;;  %v2603_v52 = vand.u32 2147483648, %v2590_v8 }
 0x61f   :  { %v2633_v47 = vpop.f32.mrf.mxu0 }
 0x620   :  { %v4195_v24 = vpop.eup %4194  ;;  %v2674_v28 = vmul.f32 %v2645_v12, %v2565_v19  ;;  %v2571_v25 = vadd.f32 %v4191_v22, %v2570_v4  ;;  %v2579_v47 = vor.u32 1.1754944e-38, %v2578_v10  ;;  %v2604_v10 = vor.u32 1.1754944e-38, %v2603_v52 }
 0x621   :  { %v2591_v55 = vadd.f32 1.0, %v4195_v24  ;;  %v2601_v24 = vand.u32 2147483647, %v2590_v8 }
 0x622   :  { %v2676_v53 = vadd.f32 %v2674_v28, %v6588_v7  ;;  %v2575_v21 = vsel %vm2574_vm14, %v4191_v22, %v2571_v25  ;;  %v6589_v7 = vld [vmem:[#allocation71_spill] sm:$0xff] }
 0x623   :  { %v4197_v14 = vpop.eup %4196  ;;  %4198 = vrcp.f32 %v2591_v55  ;;  %v2670_v13 = vpop.f32.mrf.mxu3  ;;  %v2580_v16 = vsel %vm2577_vm15, %v2579_v47, %v2575_v21  ;;  %vm2602_vm3 = vcmp.eq.f32.partialorder %v2601_v24, 8.507059e+37  ;;  %vm2612_vm5 = vweird.f32 %v2591_v55  ;;  %v6591_v24 = vld [vmem:[#allocation77_spill] sm:$0xff] }
 0x624   :  { %v2593_v49 = vmul.f32 %v4197_v14, %v2590_v8  ;;  %4200 = vtanh.f32 %v2676_v53  ;;  %v2671_v40 = vadd.f32 %v2670_v13, %v2658_v32  ;;  %vm2598_vm0 = vweird.f32 %v4197_v14 }
 0x625   :  { %v2646_v19 = vpop.f32.mrf.mxu1  ;;  %v2659_v4 = vpop.f32.mrf.mxu2  ;;  %vm2599_vm2 = vmor %vm2597_vm1, %vm2598_vm0  ;;  %v2618_v13 = vand.u32 2147483648, %v2591_v55 }
 0x626   :  { %v2594_v34 = vsub.f32 1.0, %v2593_v49  ;;  %v2675_v48 = vmul.f32 %v2671_v40, %v2580_v16  ;;  %v2616_v19 = vand.u32 2147483647, %v2591_v55 }
 0x627   :  { %v2619_v16 = vor.u32 1.1754944e-38, %v2618_v13  ;;  %v6606_v13 = vld [vmem:[#allocation127_spill] sm:$0xff] }
 0x628   :  { %v2595_v12 = vmul.f32 %v4197_v14, %v2594_v34  ;;  %v2677_v51 = vadd.f32 %v2675_v48, %v6589_v7  ;;  %vm2617_vm7 = vcmp.eq.f32.partialorder %v2616_v19, 8.507059e+37  ;;  %v6595_v7 = vld [vmem:[#allocation79_spill] sm:$0xff] }
 0x629   :  { %v4199_v28 = vpop.eup %4198  ;;  %v6610_v19 = vld [vmem:[#allocation131_spill] sm:$0xff] }
 0x62a   :  { %v4201_v20 = vpop.eup %4200  ;;  %v2608_v22 = vmul.f32 %v4199_v28, %v2591_v55  ;;  %v2596_v25 = vadd.f32 %v4197_v14, %v2595_v12  ;;  %4202 = vtanh.f32 %v2677_v51  ;;  %vm2613_vm4 = vweird.f32 %v4199_v28 }
 0x62b   :  { %v2680_v30 = vsub.f32 %v5617_v58, %v4201_v20  ;;  %v2672_v53 = vpop.f32.mrf.mxu3  ;;  %vm2614_vm6 = vmor %vm2612_vm5, %vm2613_vm4 }
 0x62c   :  { %v2609_v32 = vsub.f32 1.0, %v2608_v22  ;;  %v2600_v21 = vsel %vm2599_vm2, %v4197_v14, %v2596_v25  ;;  %v6599_v22 = vld [vmem:[#allocation85_spill] sm:$0xff]  ;;  %v6600_v25 = vld [vmem:[#allocation116_spill] sm:$0xff] }
 0x62d   :  { %v2605_v49 = vsel %vm2602_vm3, %v2604_v10, %v2600_v21  ;;  %v6601_v10 = vld [vmem:[#allocation92_spill] sm:$0xff]  ;;  %v6603_v53 = vld [vmem:[#allocation89_spill] sm:$0xff] }
 0x62e   :  { %v2610_v47 = vmul.f32 %v4199_v28, %v2609_v32  ;;  %v2682_v40 = vmul.f32 %v2680_v30, %v2605_v49  ;;  %v6602_v30 = vld [vmem:[#allocation123_spill] sm:$0xff]  ;;  %v6604_v32 = vld [vmem:[#allocation120_spill] sm:$0xff]  ;;  %v6607_v49 = vld [vmem:[#allocation93_spill] sm:$0xff] }
 0x62f   :  { %v6605_v21 = vld [vmem:[#allocation96_spill] sm:$0xff] }
 0x630   :  { %v5731_v4 = vadd.f32 %v4201_v20, %v2682_v40  ;;  %v2611_v8 = vadd.f32 %v4199_v28, %v2610_v47  ;;  %v4203_v34 = vpop.eup %4202  ;;  %v6596_v20 = vld [vmem:[#allocation112_spill] sm:$0xff] }
 0x631   :  { %v2681_v14 = vsub.f32 %v5624_v26, %v4203_v34  ;;  %v6590_v26 = vld [vmem:[#allocation158_spill] sm:$0xff]  ;;  %v6608_v47 = vld [vmem:[#allocation124_spill] sm:$0xff] }
 0x632   :  { %v2695_v58 = vpack.c.bf16 %v5731_v4, %v5731_v4  ;;  %v2615_v51 = vsel %vm2614_vm6, %v4199_v28, %v2611_v8  ;;  %v6592_v28 = vld [vmem:[#allocation107_spill] sm:$0xff]  ;;  %v6609_v40 = vld [vmem:[#allocation100_spill] sm:$0xff]  ;;  %v6611_v8 = vld [vmem:[#allocation97_spill] sm:$0xff] }
 0x633   :  { %v2620_v52 = vsel %vm2617_vm7, %v2619_v16, %v2615_v51  ;;  %v6613_v16 = vld [vmem:[#allocation104_spill] sm:$0xff] }
 0x634   :  { %v2683_v48 = vmul.f32 %v2681_v14, %v2620_v52  ;;  %2705 = vmatmul.bf16.vlgmr.msrb.gmra.mxu0 %v2695_v58  ;;  %2731 = vmatmul.bf16.vlgmr.msra.gmra.mxu2 %v2695_v58  ;;  %v6615_v51 = vld [vmem:[#allocation80_spill] sm:$0xff]  ;;  %v6617_v52 = vld [vmem:[#allocation101_spill] sm:$0xff] }
 0x635   :  { %2881 = vmatpush.bf16.msrb.mxu0 %v6251_v44  ;;  %2907 = vmatpush.bf16.msra.mxu2 %v5044_v18  ;;  %v6616_v14 = vld [vmem:[#allocation136_spill] sm:$0xff] }
 0x636   :  { %v5738_v55 = vadd.f32 %v4203_v34, %v2683_v48  ;;  %v6612_v34 = vld [vmem:[#allocation128_spill] sm:$0xff] }
 0x637   :  { %v6618_v48 = vld [vmem:[#allocation132_spill] sm:$0xff] }
 0x638   :  { %v2696_v12 = vpack.c.bf16 %v5738_v55, %v5738_v55 }
 0x639   :  { %2882 = vmatpush.bf16.msrb.mxu0 %v6252_v61  ;;  %2908 = vmatpush.bf16.msra.mxu2 %v5053_v38 }
 0x63a   :  { %2718 = vmatmul.bf16.vlgmr.msrb.gmra.mxu1 %v2696_v12  ;;  %2744 = vmatmul.bf16.vlgmr.msra.gmra.mxu3 %v2696_v12 }
 0x63b   :  { %2894 = vmatpush.bf16.msrb.mxu1 %v6265_v2  ;;  %2920 = vmatpush.bf16.msra.mxu3 %v5046_v37 }
 0x63d   :  { %2883 = vmatpush.bf16.msrb.mxu0 %v6254_v6  ;;  %2909 = vmatpush.bf16.msra.mxu2 %v5064_v1 }
 0x63f   :  { %2895 = vmatpush.bf16.msrb.mxu1 %v6266_v3  ;;  %2921 = vmatpush.bf16.msra.mxu3 %v5056_v29 }
 0x641   :  { %2884 = vmatpush.bf16.msrb.mxu0 %v6255_v15  ;;  %2910 = vmatpush.bf16.msra.mxu2 %v5073_v33 }
 0x643   :  { %2896 = vmatpush.bf16.msrb.mxu1 %v6267_v9  ;;  %2922 = vmatpush.bf16.msra.mxu3 %v5067_v56 }
 0x644   :  { %2757 = vmatmul.bf16.vlgmr.msra.gmra.mxu0 %v2695_v58  ;;  %2783 = vmatmul.bf16.vlgmr.msrb.gmra.mxu2 %v2695_v58 }
 0x645   :  { %2885 = vmatpush.bf16.msrb.mxu0 %v6256_v57  ;;  %2911 = vmatpush.bf16.msra.mxu2 %v5081_v54 }
 0x647   :  { %2897 = vmatpush.bf16.msrb.mxu1 %v6268_v63  ;;  %2923 = vmatpush.bf16.msra.mxu3 %v6269_v11 }
 0x649   :  { %2886 = vmatpush.bf16.msrb.mxu0 %v6257_v43  ;;  %2912 = vmatpush.bf16.msra.mxu2 %v5089_v0 }
 0x64a   :  { %2770 = vmatmul.bf16.vlgmr.msra.gmra.mxu1 %v2696_v12  ;;  %2796 = vmatmul.bf16.vlgmr.msrb.gmra.mxu3 %v2696_v12 }
 0x64b   :  { %2898 = vmatpush.bf16.msrb.mxu1 %v6270_v17  ;;  %2924 = vmatpush.bf16.msra.mxu3 %v6271_v5 }
 0x64d   :  { %2887 = vmatpush.bf16.msrb.mxu0 %v4962_v46  ;;  %2913 = vmatpush.bf16.msra.mxu2 %v5097_v50 }
 0x64f   :  { %2899 = vmatpush.bf16.msrb.mxu1 %v6272_v35  ;;  %2925 = vmatpush.bf16.msra.mxu3 %v5092_v59 }
 0x651   :  { %2888 = vmatpush.bf16.msrb.mxu0 %v6318_v23  ;;  %2914 = vmatpush.bf16.msra.mxu2 %v6319_v36 }
 0x653   :  { %2900 = vmatpush.bf16.msrb.mxu1 %v6273_v27  ;;  %2926 = vmatpush.bf16.msra.mxu3 %v5100_v42 }
 0x654   :  { %2889 = vmatmul.bf16.vlgmr.msrb.gmra.mxu0 %v2695_v58  ;;  %2915 = vmatmul.bf16.vlgmr.msra.gmra.mxu2 %v2695_v58  ;;  %v6614_v58 = vld [vmem:[#allocation134_spill] sm:$0xff] }
 0x655   :  { %2956 = vmatpush.bf16.msra.mxu0 %v6320_v60  ;;  %2982 = vmatpush.bf16.msrb.mxu2 %v6321_v62  ;;  %v6593_v60 = vld [vmem:[#allocation83_spill] sm:$0xff] }
 0x656   :  { %v6594_v62 = vld [vmem:[#allocation115_spill] sm:$0xff] }
 0x657   :  { %2901 = vmatpush.bf16.msrb.mxu1 %v6275_v41  ;;  %2927 = vmatpush.bf16.msra.mxu3 %v6590_v26 }
 0x659   :  { %2957 = vmatpush.bf16.msra.mxu0 %v6322_v39  ;;  %2983 = vmatpush.bf16.msrb.mxu2 %v6323_v45  ;;  %v6597_v39 = vld [vmem:[#allocation88_spill] sm:$0xff]  ;;  %v6598_v45 = vld [vmem:[#allocation119_spill] sm:$0xff] }
 0x65a   :  { %2902 = vmatmul.bf16.vlgmr.msrb.gmra.mxu1 %v2696_v12  ;;  %2928 = vmatmul.bf16.vlgmr.msra.gmra.mxu3 %v2696_v12  ;;  %v6619_v12 = vld [vmem:[#allocation82_spill] sm:$0xff] }
 0x65b   :  { %2969 = vmatpush.bf16.msra.mxu1 %v6591_v24  ;;  %2995 = vmatpush.bf16.msrb.mxu3 %v6592_v28  ;;  %v6620_v24 = vld [vmem:[#allocation140_spill] sm:$0xff]  ;;  %v6621_v28 = vld [vmem:[#allocation105_spill] sm:$0xff] }
 0x65d   :  { %2958 = vmatpush.bf16.msra.mxu0 %v6593_v60  ;;  %2984 = vmatpush.bf16.msrb.mxu2 %v6594_v62  ;;  %v6622_v60 = vld [vmem:[#allocation135_spill] sm:$0xff]  ;;  %v6623_v62 = vld [vmem:[#allocation81_spill] sm:$0xff] }
 0x65f   :  { %2970 = vmatpush.bf16.msra.mxu1 %v6595_v7  ;;  %2996 = vmatpush.bf16.msrb.mxu3 %v6596_v20  ;;  %v6624_v7 = vld [vmem:[#allocation137_spill] sm:$0xff]  ;;  %v6625_v20 = vld [vmem:[#allocation86_spill] sm:$0xff] }
 0x661   :  { %2959 = vmatpush.bf16.msra.mxu0 %v6597_v39  ;;  %2985 = vmatpush.bf16.msrb.mxu2 %v6598_v45  ;;  %v6626_v39 = vld [vmem:[#allocation143_spill] sm:$0xff]  ;;  %v6627_v45 = vld [vmem:[#allocation84_spill] sm:$0xff] }
 0x663   :  { %2971 = vmatpush.bf16.msra.mxu1 %v6599_v22  ;;  %2997 = vmatpush.bf16.msrb.mxu3 %v6600_v25  ;;  %v6628_v22 = vld [vmem:[#allocation141_spill] sm:$0xff]  ;;  %v6629_v25 = vld [vmem:[#allocation90_spill] sm:$0xff] }
 0x665   :  { %2960 = vmatpush.bf16.msra.mxu0 %v6601_v10  ;;  %2986 = vmatpush.bf16.msrb.mxu2 %v6602_v30  ;;  %v6630_v10 = vld [vmem:[#allocation145_spill] sm:$0xff]  ;;  %v6631_v30 = vld [vmem:[#allocation87_spill] sm:$0xff] }
 0x667   :  { %2972 = vmatpush.bf16.msra.mxu1 %v6603_v53  ;;  %2998 = vmatpush.bf16.msrb.mxu3 %v6604_v32  ;;  %v6632_v53 = vld [vmem:[#allocation144_spill] sm:$0xff]  ;;  %v6633_v32 = vld [vmem:[#allocation94_spill] sm:$0xff] }
 0x669   :  { %2961 = vmatpush.bf16.msra.mxu0 %v6605_v21  ;;  %2987 = vmatpush.bf16.msrb.mxu2 %v6606_v13  ;;  %v6634_v21 = vld [vmem:[#allocation147_spill] sm:$0xff] }
 0x66a   :  { %v6635_v13 = vld [vmem:[#allocation91_spill] sm:$0xff] }
 0x66b   :  { %2973 = vmatpush.bf16.msra.mxu1 %v6607_v49  ;;  %2999 = vmatpush.bf16.msrb.mxu3 %v6608_v47  ;;  %v6636_v49 = vld [vmem:[#allocation146_spill] sm:$0xff] }
 0x66c   :  { %v6637_v47 = vld [vmem:[#allocation98_spill] sm:$0xff] }
 0x66d   :  { %2962 = vmatpush.bf16.msra.mxu0 %v6609_v40  ;;  %2988 = vmatpush.bf16.msrb.mxu2 %v6610_v19  ;;  %v6638_v40 = vld [vmem:[#allocation149_spill] sm:$0xff]  ;;  %v6639_v19 = vld [vmem:[#allocation95_spill] sm:$0xff] }
 0x66f   :  { %2974 = vmatpush.bf16.msra.mxu1 %v6611_v8  ;;  %3000 = vmatpush.bf16.msrb.mxu3 %v6612_v34  ;;  %v6640_v8 = vld [vmem:[#allocation148_spill] sm:$0xff]  ;;  %v6641_v34 = vld [vmem:[#allocation102_spill] sm:$0xff] }
 0x671   :  { %2963 = vmatpush.bf16.msra.mxu0 %v6613_v16  ;;  %2989 = vmatpush.bf16.msrb.mxu2 %v6614_v58  ;;  %v6642_v16 = vld [vmem:[#allocation151_spill] sm:$0xff] }
 0x672   :  { %v6643_v58 = vld [vmem:[#allocation99_spill] sm:$0xff] }
 0x673   :  { %2975 = vmatpush.bf16.msra.mxu1 %v6617_v52  ;;  %3001 = vmatpush.bf16.msrb.mxu3 %v6618_v48  ;;  %v6646_v52 = vld [vmem:[#allocation153_spill] sm:$0xff]  ;;  %v6647_v48 = vld [vmem:[#allocation103_spill] sm:$0xff] }
 0x675   :  { %3008 = vmatpush.bf16.msrb.mxu0 %v6615_v51  ;;  %3034 = vmatpush.bf16.msra.mxu2 %v6616_v14  ;;  %v6644_v51 = vld [vmem:[#allocation150_spill] sm:$0xff]  ;;  %v6645_v14 = vld [vmem:[#allocation108_spill] sm:$0xff] }
 0x677   :  { %2976 = vmatpush.bf16.msra.mxu1 %v6621_v28  ;;  %3002 = vmatpush.bf16.msrb.mxu3 %v6622_v60  ;;  %v6650_v28 = vld [vmem:[#allocation154_spill] sm:$0xff] }
 0x679   :  { %3009 = vmatpush.bf16.msrb.mxu0 %v6619_v12  ;;  %3035 = vmatpush.bf16.msra.mxu2 %v6620_v24  ;;  %v6648_v12 = vld [vmem:[#allocation152_spill] sm:$0xff]  ;;  %v6649_v24 = vld [vmem:[#allocation111_spill] sm:$0xff] }
 0x67b   :  { %3021 = vmatpush.bf16.msrb.mxu1 %v6623_v62  ;;  %3047 = vmatpush.bf16.msra.mxu3 %v6624_v7 }
 0x67d   :  { %3010 = vmatpush.bf16.msrb.mxu0 %v6625_v20  ;;  %3036 = vmatpush.bf16.msra.mxu2 %v6626_v39 }
 0x67f   :  { %3022 = vmatpush.bf16.msrb.mxu1 %v6627_v45  ;;  %3048 = vmatpush.bf16.msra.mxu3 %v6628_v22  ;;  %v6651_v45 = vld [vmem:[#allocation52_spill] sm:$0xff] }
 0x681   :  { %3011 = vmatpush.bf16.msrb.mxu0 %v6629_v25  ;;  %3037 = vmatpush.bf16.msra.mxu2 %v6630_v10 }
 0x683   :  { %3023 = vmatpush.bf16.msrb.mxu1 %v6631_v30  ;;  %3049 = vmatpush.bf16.msra.mxu3 %v6632_v53 }
 0x685   :  { %3012 = vmatpush.bf16.msrb.mxu0 %v6633_v32  ;;  %3038 = vmatpush.bf16.msra.mxu2 %v6634_v21  ;;  %v6652_v21 = vld [vmem:[#allocation53_spill] sm:$0xff] }
 0x687   :  { %3024 = vmatpush.bf16.msrb.mxu1 %v6635_v13  ;;  %3050 = vmatpush.bf16.msra.mxu3 %v6636_v49 }
 0x689   :  { %3013 = vmatpush.bf16.msrb.mxu0 %v6637_v47  ;;  %3039 = vmatpush.bf16.msra.mxu2 %v6638_v40 }
 0x68b   :  { %3025 = vmatpush.bf16.msrb.mxu1 %v6639_v19  ;;  %3051 = vmatpush.bf16.msra.mxu3 %v6640_v8 }
 0x68d   :  { %3014 = vmatpush.bf16.msrb.mxu0 %v6641_v34  ;;  %3040 = vmatpush.bf16.msra.mxu2 %v6642_v16 }
 0x68f   :  { %3026 = vmatpush.bf16.msrb.mxu1 %v6643_v58  ;;  %3052 = vmatpush.bf16.msra.mxu3 %v6644_v51 }
 0x691   :  { %3015 = vmatpush.bf16.msrb.mxu0 %v6645_v14  ;;  %3041 = vmatpush.bf16.msra.mxu2 %v6646_v52  ;;  %v6653_v52 = vld [vmem:[#allocation54_spill] sm:$0xff] }
 0x693   :  { %3027 = vmatpush.bf16.msrb.mxu1 %v6647_v48  ;;  %3053 = vmatpush.bf16.msra.mxu3 %v6648_v12 }
 0x697   :  { %3028 = vmatpush.bf16.msrb.mxu1 %v6649_v24  ;;  %3054 = vmatpush.bf16.msra.mxu3 %v6650_v28 }
 0x6b1   :  { %v2706_v60 = vpop.f32.mrf.mxu0 }
 0x6b7   :  { %v2719_v62 = vpop.f32.mrf.mxu1  ;;  %v2732_v7 = vpop.f32.mrf.mxu2 }
 0x6b8   :  { %v2720_v20 = vadd.f32 %v2719_v62, %v2706_v60 }
 0x6b9   :  { %v2708_v39 = vpop.f32.mrf.mxu0 }
 0x6ba   :  { %v2801_v22 = vadd.f32 %v2720_v20, %v6651_v45  ;;  %v6654_v45 = vld [vmem:[#allocation55_spill] sm:$0xff] }
 0x6bc   :  { %v3883_v25 = vmul.f32 -1.442695, %v2801_v22 }
 0x6bd   :  { %v2745_v10 = vpop.f32.mrf.mxu3 }
 0x6be   :  { %4204 = vpow2.f32 %v3883_v25  ;;  %v2746_v30 = vadd.f32 %v2745_v10, %v2732_v7 }
 0x6bf   :  { %v2721_v53 = vpop.f32.mrf.mxu1  ;;  %v2734_v32 = vpop.f32.mrf.mxu2 }
 0x6c0   :  { %v2802_v13 = vadd.f32 %v2746_v30, %v6652_v21 }
 0x6c1   :  { %v2758_v49 = vpop.f32.mrf.mxu0 }
 0x6c2   :  { %v3884_v47 = vmul.f32 -1.442695, %v2802_v13 }
 0x6c4   :  { %v4205_v40 = vpop.eup %4204  ;;  %4206 = vpow2.f32 %v3884_v47 }
 0x6c5   :  { %v2809_v19 = vadd.f32 1.0, %v4205_v40  ;;  %v2747_v8 = vpop.f32.mrf.mxu3 }
 0x6c7   :  { %4208 = vrcp.f32 %v2809_v19  ;;  %v2771_v34 = vpop.f32.mrf.mxu1  ;;  %v2784_v16 = vpop.f32.mrf.mxu2  ;;  %vm2816_vm9 = vweird.f32 %v2809_v19  ;;  %v2822_v21 = vand.u32 2147483648, %v2809_v19  ;;  %v2820_v47 = vand.u32 2147483647, %v2809_v19 }
 0x6c8   :  { %v2772_v58 = vadd.f32 %v2771_v34, %v2758_v49 }
 0x6c9   :  { %v2760_v51 = vpop.f32.mrf.mxu0  ;;  %vm2821_vm11 = vcmp.eq.f32.partialorder %v2820_v47, 8.507059e+37 }
 0x6ca   :  { %v4207_v14 = vpop.eup %4206  ;;  %v2841_v48 = vadd.f32 %v2772_v58, %v6653_v52  ;;  %v2823_v52 = vor.u32 1.1754944e-38, %v2822_v21 }
 0x6cb   :  { %v2810_v12 = vadd.f32 1.0, %v4207_v14 }
 0x6cc   :  { %v3885_v24 = vmul.f32 -1.442695, %v2841_v48 }
 0x6cd   :  { %v4209_v28 = vpop.eup %4208  ;;  %4210 = vrcp.f32 %v2810_v12  ;;  %v2797_v60 = vpop.f32.mrf.mxu3  ;;  %vm2831_vm13 = vweird.f32 %v2810_v12 }
 0x6ce   :  { %4212 = vpow2.f32 %v3885_v24  ;;  %v2798_v62 = vadd.f32 %v2797_v60, %v2784_v16  ;;  %v2812_v7 = vmul.f32 %v4209_v28, %v2809_v19  ;;  %vm2817_vm8 = vweird.f32 %v4209_v28  ;;  %v6655_v16 = vld [vmem:[#allocation26_spill] sm:$0xff] }
 0x6cf   :  { %v2773_v20 = vpop.f32.mrf.mxu1  ;;  %v2786_v39 = vpop.f32.mrf.mxu2  ;;  %vm2818_vm10 = vmor %vm2816_vm9, %vm2817_vm8 }
 0x6d0   :  { %v2842_v22 = vadd.f32 %v2798_v62, %v6654_v45  ;;  %v2813_v25 = vsub.f32 1.0, %v2812_v7 }
 0x6d1   :  { %v2890_v10 = vpop.f32.mrf.mxu0 }
 0x6d2   :  { %v3886_v30 = vmul.f32 -1.442695, %v2842_v22  ;;  %v2814_v53 = vmul.f32 %v4209_v28, %v2813_v25  ;;  %v2891_v58 = vadd.f32 %v2890_v10, %v6655_v16  ;;  %v2837_v22 = vand.u32 2147483648, %v2810_v12  ;;  %v6656_v10 = vld [vmem:[#allocation72_spill] sm:$0xff] }
 0x6d3   :  { %v4211_v32 = vpop.eup %4210 }
 0x6d4   :  { %v4213_v13 = vpop.eup %4212  ;;  %4214 = vpow2.f32 %v3886_v30  ;;  %v2815_v49 = vadd.f32 %v4209_v28, %v2814_v53  ;;  %v2827_v40 = vmul.f32 %v4211_v32, %v2810_v12  ;;  %vm2832_vm12 = vweird.f32 %v4211_v32 }
 0x6d5   :  { %v2849_v8 = vadd.f32 1.0, %v4213_v13  ;;  %v2799_v34 = vpop.f32.mrf.mxu3  ;;  %v2835_v30 = vand.u32 2147483647, %v2810_v12  ;;  %vm2833_vm14 = vmor %vm2831_vm13, %vm2832_vm12 }
 0x6d6   :  { %v2819_v51 = vsel %vm2818_vm10, %v4209_v28, %v2815_v49  ;;  %v2828_v14 = vsub.f32 1.0, %v2827_v40  ;;  %v2838_v40 = vor.u32 1.1754944e-38, %v2837_v22 }
 0x6d7   :  { %4216 = vrcp.f32 %v2849_v8  ;;  %v2903_v48 = vpop.f32.mrf.mxu1  ;;  %v2916_v24 = vpop.f32.mrf.mxu2  ;;  %v2824_v7 = vsel %vm2821_vm11, %v2823_v52, %v2819_v51  ;;  %vm2836_vm15 = vcmp.eq.f32.partialorder %v2835_v30, 8.507059e+37  ;;  %vm2856_vm1 = vweird.f32 %v2849_v8 }
 0x6d8   :  { %v2904_v60 = vadd.f32 %v2903_v48, %v2891_v58  ;;  %v2829_v62 = vmul.f32 %v4211_v32, %v2828_v14  ;;  %v2917_v21 = vadd.f32 %v2916_v24, %v6260_v31  ;;  %v2862_v48 = vand.u32 2147483648, %v2849_v8 }
 0x6d9   :  { %v2892_v20 = vpop.f32.mrf.mxu0 }
 0x6da   :  { %v4215_v39 = vpop.eup %4214  ;;  %v2933_v19 = vmul.f32 %v2904_v60, %v2824_v7  ;;  %v2830_v45 = vadd.f32 %v4211_v32, %v2829_v62  ;;  %v2860_v62 = vand.u32 2147483647, %v2849_v8  ;;  %v6657_v20 = vld [vmem:[#allocation73_spill] sm:$0xff] }
 0x6db   :  { %v2850_v25 = vadd.f32 1.0, %v4215_v39 }
 0x6dc   :  { %v2935_v28 = vadd.f32 %v2933_v19, %v6656_v10  ;;  %v2834_v13 = vsel %vm2833_vm14, %v4211_v32, %v2830_v45  ;;  %v2863_v45 = vor.u32 1.1754944e-38, %v2862_v48  ;;  %vm2861_vm3 = vcmp.eq.f32.partialorder %v2860_v62, 8.507059e+37  ;;  %v6661_v62 = vld [vmem:[#allocation59_spill] sm:$0xff] }
 0x6dd   :  { %v4217_v53 = vpop.eup %4216  ;;  %4218 = vrcp.f32 %v2850_v25  ;;  %v2929_v49 = vpop.f32.mrf.mxu3  ;;  %v2839_v52 = vsel %vm2836_vm15, %v2838_v40, %v2834_v13  ;;  %v2875_v40 = vand.u32 2147483647, %v2850_v25  ;;  %vm2871_vm5 = vweird.f32 %v2850_v25 }
 0x6de   :  { %v2852_v47 = vmul.f32 %v4217_v53, %v2849_v8  ;;  %4220 = vtanh.f32 %v2935_v28  ;;  %v2930_v34 = vadd.f32 %v2929_v49, %v2917_v21  ;;  %vm2857_vm0 = vweird.f32 %v4217_v53 }
 0x6df   :  { %v2905_v58 = vpop.f32.mrf.mxu1  ;;  %v2918_v51 = vpop.f32.mrf.mxu2  ;;  %vm2858_vm2 = vmor %vm2856_vm1, %vm2857_vm0  ;;  %v2877_v21 = vand.u32 2147483648, %v2850_v25  ;;  %vm2876_vm7 = vcmp.eq.f32.partialorder %v2875_v40, 8.507059e+37 }
 0x6e0   :  { %v2853_v14 = vsub.f32 1.0, %v2852_v47  ;;  %v2934_v12 = vmul.f32 %v2930_v34, %v2839_v52 }
 0x6e1   :  { %v2878_v51 = vor.u32 1.1754944e-38, %v2877_v21 }
 0x6e2   :  { %v2854_v60 = vmul.f32 %v4217_v53, %v2853_v14  ;;  %v2936_v39 = vadd.f32 %v2934_v12, %v6657_v20 }
 0x6e3   :  { %v4219_v7 = vpop.eup %4218 }
 0x6e4   :  { %v4221_v24 = vpop.eup %4220  ;;  %v2867_v32 = vmul.f32 %v4219_v7, %v2850_v25  ;;  %v2855_v19 = vadd.f32 %v4217_v53, %v2854_v60  ;;  %4222 = vtanh.f32 %v2936_v39  ;;  %vm2872_vm4 = vweird.f32 %v4219_v7 }
 0x6e5   :  { %v2939_v22 = vsub.f32 %v5731_v4, %v4221_v24  ;;  %v2931_v30 = vpop.f32.mrf.mxu3  ;;  %vm2873_vm6 = vmor %vm2871_vm5, %vm2872_vm4 }
 0x6e6   :  { %v2868_v10 = vsub.f32 1.0, %v2867_v32  ;;  %v2859_v28 = vsel %vm2858_vm2, %v4217_v53, %v2855_v19 }
 0x6e7   :  { %v2864_v13 = vsel %vm2861_vm3, %v2863_v45, %v2859_v28 }
 0x6e8   :  { %v2869_v49 = vmul.f32 %v4219_v7, %v2868_v10  ;;  %v2941_v47 = vmul.f32 %v2939_v22, %v2864_v13 }
 0x6ea   :  { %v5845_v34 = vadd.f32 %v4221_v24, %v2941_v47  ;;  %v2870_v8 = vadd.f32 %v4219_v7, %v2869_v49  ;;  %v4223_v58 = vpop.eup %4222 }
 0x6eb   :  { %v2940_v53 = vsub.f32 %v5738_v55, %v4223_v58 }
 0x6ec   :  { %v2954_v4 = vpack.c.bf16 %v5845_v34, %v5845_v34  ;;  %v2874_v14 = vsel %vm2873_vm6, %v4219_v7, %v2870_v8 }
 0x6ed   :  { %v2879_v52 = vsel %vm2876_vm7, %v2878_v51, %v2874_v14 }
 0x6ee   :  { %v2942_v48 = vmul.f32 %v2940_v53, %v2879_v52  ;;  %2964 = vmatmul.bf16.vlgmr.msra.gmra.mxu0 %v2954_v4  ;;  %2990 = vmatmul.bf16.vlgmr.msrb.gmra.mxu2 %v2954_v4 }
 0x6ef   :  { %3140 = vmatpush.bf16.msra.mxu0 %v6251_v44  ;;  %3166 = vmatpush.bf16.msrb.mxu2 %v5044_v18  ;;  %v6658_v18 = vld [vmem:[#allocation56_spill] sm:$0xff] }
 0x6f0   :  { %v5852_v25 = vadd.f32 %v4223_v58, %v2942_v48 }
 0x6f2   :  { %v2955_v12 = vpack.c.bf16 %v5852_v25, %v5852_v25 }
 0x6f3   :  { %3141 = vmatpush.bf16.msra.mxu0 %v6252_v61  ;;  %3167 = vmatpush.bf16.msrb.mxu2 %v5053_v38 }
 0x6f4   :  { %2977 = vmatmul.bf16.vlgmr.msra.gmra.mxu1 %v2955_v12  ;;  %3003 = vmatmul.bf16.vlgmr.msrb.gmra.mxu3 %v2955_v12 }
 0x6f5   :  { %3153 = vmatpush.bf16.msra.mxu1 %v6265_v2  ;;  %3179 = vmatpush.bf16.msrb.mxu3 %v5046_v37 }
 0x6f7   :  { %3142 = vmatpush.bf16.msra.mxu0 %v6254_v6  ;;  %3168 = vmatpush.bf16.msrb.mxu2 %v5064_v1 }
 0x6f9   :  { %3154 = vmatpush.bf16.msra.mxu1 %v6266_v3  ;;  %3180 = vmatpush.bf16.msrb.mxu3 %v5056_v29 }
 0x6fb   :  { %3143 = vmatpush.bf16.msra.mxu0 %v6255_v15  ;;  %3169 = vmatpush.bf16.msrb.mxu2 %v5073_v33 }
 0x6fd   :  { %3155 = vmatpush.bf16.msra.mxu1 %v6267_v9  ;;  %3181 = vmatpush.bf16.msrb.mxu3 %v5067_v56 }
 0x6fe   :  { %3016 = vmatmul.bf16.vlgmr.msrb.gmra.mxu0 %v2954_v4  ;;  %3042 = vmatmul.bf16.vlgmr.msra.gmra.mxu2 %v2954_v4 }
 0x6ff   :  { %3144 = vmatpush.bf16.msra.mxu0 %v6256_v57  ;;  %3170 = vmatpush.bf16.msrb.mxu2 %v5081_v54 }
 0x701   :  { %3156 = vmatpush.bf16.msra.mxu1 %v6268_v63  ;;  %3182 = vmatpush.bf16.msrb.mxu3 %v6269_v11 }
 0x703   :  { %3145 = vmatpush.bf16.msra.mxu0 %v6257_v43  ;;  %3171 = vmatpush.bf16.msrb.mxu2 %v5089_v0 }
 0x704   :  { %3029 = vmatmul.bf16.vlgmr.msrb.gmra.mxu1 %v2955_v12  ;;  %3055 = vmatmul.bf16.vlgmr.msra.gmra.mxu3 %v2955_v12 }
 0x705   :  { %3157 = vmatpush.bf16.msra.mxu1 %v6270_v17  ;;  %3183 = vmatpush.bf16.msrb.mxu3 %v6271_v5  ;;  %v6660_v17 = vld [vmem:[#allocation58_spill] sm:$0xff] }
 0x707   :  { %3146 = vmatpush.bf16.msra.mxu0 %v4962_v46  ;;  %3172 = vmatpush.bf16.msrb.mxu2 %v5097_v50 }
 0x709   :  { %3158 = vmatpush.bf16.msra.mxu1 %v6272_v35  ;;  %3184 = vmatpush.bf16.msrb.mxu3 %v5092_v59 }
 0x70b   :  { %3147 = vmatpush.bf16.msra.mxu0 %v6318_v23  ;;  %3173 = vmatpush.bf16.msrb.mxu2 %v6319_v36 }
 0x70d   :  { %3159 = vmatpush.bf16.msra.mxu1 %v6273_v27  ;;  %3185 = vmatpush.bf16.msrb.mxu3 %v5100_v42  ;;  %v6659_v42 = vld [vmem:[#allocation57_spill] sm:$0xff] }
 0x70e   :  { %3148 = vmatmul.bf16.vlgmr.msra.gmra.mxu0 %v2954_v4  ;;  %3174 = vmatmul.bf16.vlgmr.msrb.gmra.mxu2 %v2954_v4 }
 0x711   :  { %3160 = vmatpush.bf16.msra.mxu1 %v6275_v41  ;;  %3186 = vmatpush.bf16.msrb.mxu3 %v6590_v26 }
 0x714   :  { %3161 = vmatmul.bf16.vlgmr.msra.gmra.mxu1 %v2955_v12  ;;  %3187 = vmatmul.bf16.vlgmr.msrb.gmra.mxu3 %v2955_v12 }
 0x76b   :  { %v2965_v54 = vpop.f32.mrf.mxu0 }
 0x771   :  { %v2978_v0 = vpop.f32.mrf.mxu1  ;;  %v2991_v50 = vpop.f32.mrf.mxu2 }
 0x772   :  { %v2979_v33 = vadd.f32 %v2978_v0, %v2965_v54 }
 0x773   :  { %v2967_v46 = vpop.f32.mrf.mxu0 }
 0x774   :  { %v3060_v37 = vadd.f32 %v2979_v33, %v6658_v18 }
 0x776   :  { %v3887_v38 = vmul.f32 -1.442695, %v3060_v37 }
 0x777   :  { %v3004_v29 = vpop.f32.mrf.mxu3 }
 0x778   :  { %4224 = vpow2.f32 %v3887_v38  ;;  %v3005_v1 = vadd.f32 %v3004_v29, %v2991_v50 }
 0x779   :  { %v2980_v56 = vpop.f32.mrf.mxu1  ;;  %v2993_v59 = vpop.f32.mrf.mxu2 }
 0x77a   :  { %v3061_v44 = vadd.f32 %v3005_v1, %v6659_v42 }
 0x77b   :  { %v3017_v61 = vpop.f32.mrf.mxu0 }
 0x77c   :  { %v3888_v6 = vmul.f32 -1.442695, %v3061_v44 }
 0x77e   :  { %v4225_v15 = vpop.eup %4224  ;;  %4226 = vpow2.f32 %v3888_v6 }
 0x77f   :  { %v3068_v57 = vadd.f32 1.0, %v4225_v15  ;;  %v3006_v43 = vpop.f32.mrf.mxu3 }
 0x781   :  { %4228 = vrcp.f32 %v3068_v57  ;;  %v3030_v2 = vpop.f32.mrf.mxu1  ;;  %v3043_v3 = vpop.f32.mrf.mxu2  ;;  %vm3075_vm9 = vweird.f32 %v3068_v57  ;;  %v3081_v45 = vand.u32 2147483648, %v3068_v57  ;;  %v3079_v10 = vand.u32 2147483647, %v3068_v57 }
 0x782   :  { %v3031_v9 = vadd.f32 %v3030_v2, %v3017_v61 }
 0x783   :  { %v3019_v63 = vpop.f32.mrf.mxu0  ;;  %v3082_v8 = vor.u32 1.1754944e-38, %v3081_v45  ;;  %vm3080_vm11 = vcmp.eq.f32.partialorder %v3079_v10, 8.507059e+37 }
 0x784   :  { %v4227_v11 = vpop.eup %4226  ;;  %v3100_v5 = vadd.f32 %v3031_v9, %v6660_v17  ;;  %v6663_v9 = vld [vmem:[#allocation75_spill] sm:$0xff] }
 0x785   :  { %v3069_v35 = vadd.f32 1.0, %v4227_v11 }
 0x786   :  { %v3889_v27 = vmul.f32 -1.442695, %v3100_v5 }
 0x787   :  { %v4229_v41 = vpop.eup %4228  ;;  %4230 = vrcp.f32 %v3069_v35  ;;  %v3056_v23 = vpop.f32.mrf.mxu3  ;;  %v3096_v0 = vand.u32 2147483648, %v3069_v35  ;;  %vm3090_vm13 = vweird.f32 %v3069_v35  ;;  %v3094_v33 = vand.u32 2147483647, %v3069_v35 }
 0x788   :  { %4232 = vpow2.f32 %v3889_v27  ;;  %v3057_v36 = vadd.f32 %v3056_v23, %v3043_v3  ;;  %v3071_v55 = vmul.f32 %v4229_v41, %v3068_v57  ;;  %vm3076_vm8 = vweird.f32 %v4229_v41 }
 0x789   :  { %v3032_v26 = vpop.f32.mrf.mxu1  ;;  %v3045_v60 = vpop.f32.mrf.mxu2  ;;  %vm3077_vm10 = vmor %vm3075_vm9, %vm3076_vm8  ;;  %v3097_v56 = vor.u32 1.1754944e-38, %v3096_v0  ;;  %vm3095_vm15 = vcmp.eq.f32.partialorder %v3094_v33, 8.507059e+37 }
 0x78a   :  { %v3101_v7 = vadd.f32 %v3057_v36, %v6661_v62  ;;  %v3072_v20 = vsub.f32 1.0, %v3071_v55 }
 0x78b   :  { %v3149_v39 = vpop.f32.mrf.mxu0 }
 0x78c   :  { %v3890_v24 = vmul.f32 -1.442695, %v3101_v7  ;;  %v3073_v32 = vmul.f32 %v4229_v41, %v3072_v20  ;;  %v3150_v49 = vadd.f32 %v3149_v39, %v6655_v16  ;;  %v6662_v16 = vld [vmem:[#allocation74_spill] sm:$0xff] }
 0x78d   :  { %v4231_v19 = vpop.eup %4230 }
 0x78e   :  { %v4233_v22 = vpop.eup %4232  ;;  %4234 = vpow2.f32 %v3890_v24  ;;  %v3074_v30 = vadd.f32 %v4229_v41, %v3073_v32  ;;  %v3086_v28 = vmul.f32 %v4231_v19, %v3069_v35  ;;  %vm3091_vm12 = vweird.f32 %v4231_v19 }
 0x78f   :  { %v3108_v21 = vadd.f32 1.0, %v4233_v22  ;;  %v3058_v13 = vpop.f32.mrf.mxu3  ;;  %vm3092_vm14 = vmor %vm3090_vm13, %vm3091_vm12 }
 0x790   :  { %v3078_v47 = vsel %vm3077_vm10, %v4229_v41, %v3074_v30  ;;  %v3087_v40 = vsub.f32 1.0, %v3086_v28 }
 0x791   :  { %4236 = vrcp.f32 %v3108_v21  ;;  %v3162_v58 = vpop.f32.mrf.mxu1  ;;  %v3175_v51 = vpop.f32.mrf.mxu2  ;;  %v3083_v53 = vsel %vm3080_vm11, %v3082_v8, %v3078_v47  ;;  %v3121_v15 = vand.u32 2147483648, %v3108_v21  ;;  %v3119_v2 = vand.u32 2147483647, %v3108_v21 }
 0x792   :  { %v3163_v4 = vadd.f32 %v3162_v58, %v3150_v49  ;;  %v3088_v14 = vmul.f32 %v4231_v19, %v3087_v40  ;;  %v3176_v37 = vadd.f32 %v3175_v51, %v6260_v31  ;;  %vm3115_vm1 = vweird.f32 %v3108_v21 }
 0x793   :  { %v3151_v52 = vpop.f32.mrf.mxu0  ;;  %v3122_v5 = vor.u32 1.1754944e-38, %v3121_v15  ;;  %vm3120_vm3 = vcmp.eq.f32.partialorder %v3119_v2, 8.507059e+37 }
 0x794   :  { %v4235_v48 = vpop.eup %4234  ;;  %v3192_v12 = vmul.f32 %v3163_v4, %v3083_v53  ;;  %v3089_v54 = vadd.f32 %v4231_v19, %v3088_v14 }
 0x795   :  { %v3109_v50 = vadd.f32 1.0, %v4235_v48 }
 0x796   :  { %v3194_v46 = vadd.f32 %v3192_v12, %v6662_v16  ;;  %v3093_v38 = vsel %vm3092_vm14, %v4231_v19, %v3089_v54 }
 0x797   :  { %v4237_v18 = vpop.eup %4236  ;;  %4238 = vrcp.f32 %v3109_v50  ;;  %v3188_v29 = vpop.f32.mrf.mxu3  ;;  %v3098_v6 = vsel %vm3095_vm15, %v3097_v56, %v3093_v38  ;;  %v3136_v36 = vand.u32 2147483648, %v3109_v50  ;;  %v3134_v62 = vand.u32 2147483647, %v3109_v50 }
 0x798   :  { %v3111_v1 = vmul.f32 %v4237_v18, %v3108_v21  ;;  %4240 = vtanh.f32 %v3194_v46  ;;  %v3189_v59 = vadd.f32 %v3188_v29, %v3176_v37  ;;  %vm3116_vm0 = vweird.f32 %v4237_v18 }
 0x799   :  { %v3164_v42 = vpop.f32.mrf.mxu1  ;;  %v3177_v44 = vpop.f32.mrf.mxu2  ;;  %vm3117_vm2 = vmor %vm3115_vm1, %vm3116_vm0  ;;  %vm3130_vm5 = vweird.f32 %v3109_v50  ;;  %v3137_v24 = vor.u32 1.1754944e-38, %v3136_v36  ;;  %vm3135_vm7 = vcmp.eq.f32.partialorder %v3134_v62, 8.507059e+37 }
 0x79a   :  { %v3112_v61 = vsub.f32 1.0, %v3111_v1  ;;  %v3193_v57 = vmul.f32 %v3189_v59, %v3098_v6 }
 0x79c   :  { %v3113_v43 = vmul.f32 %v4237_v18, %v3112_v61  ;;  %v3195_v63 = vadd.f32 %v3193_v57, %v6663_v9 }
 0x79d   :  { %v4239_v3 = vpop.eup %4238 }
 0x79e   :  { %v4241_v31 = vpop.eup %4240  ;;  %v3126_v11 = vmul.f32 %v4239_v3, %v3109_v50  ;;  %v3114_v17 = vadd.f32 %v4237_v18, %v3113_v43  ;;  %4242 = vtanh.f32 %v3195_v63  ;;  %vm3131_vm4 = vweird.f32 %v4239_v3 }
 0x79f   :  { %v3198_v35 = vsub.f32 %v5845_v34, %v4241_v31  ;;  %v3190_v27 = vpop.f32.mrf.mxu3  ;;  %vm3132_vm6 = vmor %vm3130_vm5, %vm3131_vm4 }
 0x7a0   :  { %v3127_v41 = vsub.f32 1.0, %v3126_v11  ;;  %v3118_v23 = vsel %vm3117_vm2, %v4237_v18, %v3114_v17 }
 0x7a1   :  { %v3123_v55 = vsel %vm3120_vm3, %v3122_v5, %v3118_v23 }
 0x7a2   :  { %v3128_v26 = vmul.f32 %v4239_v3, %v3127_v41  ;;  %v3200_v60 = vmul.f32 %v3198_v35, %v3123_v55 }
 0x7a4   :  { %v3202_v7 = vadd.f32 %v4241_v31, %v3200_v60  ;;  %v3129_v20 = vadd.f32 %v4239_v3, %v3128_v26  ;;  %v4243_v39 = vpop.eup %4242 }
 0x7a5   :  { %v3199_v34 = vsub.f32 %v5852_v25, %v4243_v39 }
 0x7a6   :  { %v3133_v32 = vsel %vm3132_vm6, %v4239_v3, %v3129_v20 }
 0x7a7   :  { %v3138_v19 = vsel %vm3135_vm7, %v3137_v24, %v3133_v32 }
 0x7a8   :  { %v3201_v45 = vmul.f32 %v3199_v34, %v3138_v19 }
 0x7aa   :  { %v3203_v22 = vadd.f32 %v4243_v39, %v3201_v45 }
 0x7ab   :  { %4397 = dma.done.wait [#allocation5 + $0x3], 2048 }
 0x7ac   :  { %4398 = vsyncadd [#allocation5 + $0x3], 4294965248  ;;  %v4062_v30 = vld [vmem:[#allocation4 + $0x38] sm:$0xff]  ;;  %v4061_v28 = vld [vmem:[#allocation4 + $0x30] sm:$0xff]  ;;  %v3207_v48 = vpack.c.bf16 %v3202_v7, %v3202_v7  ;;  %v3208_v12 = vpack.c.bf16 %v3203_v22, %v3203_v22  ;;  %s4410_s21 = smov [#allocation9]   ;;  %s3375_s25 = sshll.u32 %s5910_s8, 4  ;;  %s3376_s25 = int_to_ptr.hbm [resolvable:$true] %s3375_s25 }
 0x7ad   :  { %v4070_v10 = vld [vmem:[#allocation4 + $0x78] sm:$0xff]  ;;  %3341 = vmatpush.bf16.msrb.mxu0 %v4062_v30  ;;  %v4069_v21 = vld [vmem:[#allocation4 + $0x70] sm:$0xff]  ;;  %v4060_v13 = vld [vmem:[#allocation4 + $0x28] sm:$0xff]  ;;  %s3373_s22 = sshll.u32 %s4410_s21, 4  ;;  %s3374_s22 = int_to_ptr.vmem [resolvable:$true] %s3373_s22 }
 0x7ae   :  { %3354 = vmatpush.bf16.msrb.mxu1 %v4070_v10  ;;  %v4068_v49 = vld [vmem:[#allocation4 + $0x68] sm:$0xff]  ;;  %v4059_v47 = vld [vmem:[#allocation4 + $0x20] sm:$0xff]  ;;  %v4058_v25 = vld [vmem:[#allocation4 + $0x18] sm:$0xff] }
 0x7af   :  { %v4067_v40 = vld [vmem:[#allocation4 + $0x60] sm:$0xff]  ;;  %v4066_v8 = vld [vmem:[#allocation4 + $0x58] sm:$0xff]  ;;  %v4057_v58 = vld [vmem:[#allocation4 + $0x10] sm:$0xff] }
 0x7b0   :  { %v4065_v51 = vld [vmem:[#allocation4 + $0x50] sm:$0xff]  ;;  %v4056_v4 = vld [vmem:[#allocation4 + $0x8] sm:$0xff]  ;;  %v4055_v53 = vld [vmem:[#allocation4] sm:$0xff] }
 0x7b1   :  { %3342 = vmatpush.bf16.msrb.mxu0 %v4061_v28  ;;  %v4064_v14 = vld [vmem:[#allocation4 + $0x48] sm:$0xff]  ;;  %v4063_v52 = vld [vmem:[#allocation4 + $0x40] sm:$0xff] }
 0x7b2   :  { %3355 = vmatpush.bf16.msrb.mxu1 %v4069_v21  ;;  %v4244_v54 = vld [vmem:[%s5905_s3] ss:$0 sm:$0xff] }
 0x7b5   :  { %3343 = vmatpush.bf16.msrb.mxu0 %v4060_v13 }
 0x7b6   :  { %3356 = vmatpush.bf16.msrb.mxu1 %v4068_v49 }
 0x7b9   :  { %3344 = vmatpush.bf16.msrb.mxu0 %v4059_v47 }
 0x7ba   :  { %3357 = vmatpush.bf16.msrb.mxu1 %v4067_v40 }
 0x7bd   :  { %3345 = vmatpush.bf16.msrb.mxu0 %v4058_v25 }
 0x7be   :  { %3358 = vmatpush.bf16.msrb.mxu1 %v4066_v8 }
 0x7c1   :  { %3346 = vmatpush.bf16.msrb.mxu0 %v4057_v58 }
 0x7c2   :  { %3359 = vmatpush.bf16.msrb.mxu1 %v4065_v51 }
 0x7c5   :  { %3347 = vmatpush.bf16.msrb.mxu0 %v4056_v4 }
 0x7c6   :  { %3360 = vmatpush.bf16.msrb.mxu1 %v4064_v14 }
 0x7c9   :  { %3348 = vmatpush.bf16.msrb.mxu0 %v4055_v53 }
 0x7ca   :  { %3361 = vmatpush.bf16.msrb.mxu1 %v4063_v52 }
 0x7cc   :  { %3349 = vmatmul.bf16.vlgmr.msrb.gmra.mxu0 %v3207_v48 }
 0x7cd   :  { %3362 = vmatmul.bf16.vlgmr.msrb.gmra.mxu1 %v3208_v12 }
 0x849   :  { %v3350_v0 = vpop.f32.mrf.mxu0 }
 0x84a   :  { %v3363_v50 = vpop.f32.mrf.mxu1  ;;  %v3351_v33 = vadd.f32 %v4244_v54, %v3350_v0 }
 0x84c   :  { %v3364_v16 = vadd.f32 %v3363_v50, %v3351_v33 }
 0x84e   :  { %3367 = vst [vmem:[#allocation9] sm:$0xff] %v3364_v16 }
 0x84f   :  { %3378 = dma.vmem_to_hbm [thread:$0]  %s3374_s22, 128, %s3376_s25, [#allocation8]  }
 0x851   :  { %v3352_v46 = vpop.f32.mrf.mxu0 }
 0x852   :  { %v3365_v18 = vpop.f32.mrf.mxu1 }
 0x853   :  { %4399 = dma.done.wait [#allocation8], 128  }
 0x854   :  { %4400 = vsyncadd [#allocation8], 4294967168 }
 0x855   :  { %3383 = vsyncpa [#allocation7], 1 }
 0x856   :  { %3384 = vsyncpa [#allocation8], 1 }
 0x857   :  { %3385 = vsyncmov [#allocation5] }
 0x85a   :  { %s3386_s3 = vpop.sfrf %3385 }
 0x85b   :  { %p3955_p0 = scmp.ne.s32.totalorder %s3386_s3, 0 }
 0x85d   :  { %3390 = shalt.err (%p3955_p0)  }
 0x85e   :  { %3392 = vsyncmov [#allocation5 + $0x1] }
 0x861   :  { %s3393_s26 = vpop.sfrf %3392 }
 0x862   :  { %p3956_p1 = scmp.ne.s32.totalorder %s3393_s26, 0 }
 0x864   :  { %3397 = shalt.err (%p3956_p1)  }
 0x865   :  { %3399 = vsyncmov [#allocation5 + $0x2] }
 0x868   :  { %s3400_s8 = vpop.sfrf %3399 }
 0x869   :  { %p3957_p2 = scmp.ne.s32.totalorder %s3400_s8, 0 }
 0x86b   :  { %3404 = shalt.err (%p3957_p2)  }
 0x86c   :  { %3406 = vsyncmov [#allocation5 + $0x3] }
 0x86f   :  { %s3407_s27 = vpop.sfrf %3406 }
 0x870   :  { %p3958_p3 = scmp.ne.s32.totalorder %s3407_s27, 0 }
 0x872   :  { %3411 = shalt.err (%p3958_p3)  }

</bundles_post_ra>
